<compile_context>
chip_gen: v5e
topology: v5e:2x2
jax: 0.10.0
libtpu: 0.0.40
codegen_flags: <defaults>
</compile_context>

<pallas_src>
import math
import functools

import jax
import jax.numpy as jnp
from jax.experimental import pallas as pl
from jax.experimental.pallas import tpu as pltpu


def transformer_block_kernel(
    x_ref, mask_ref,
    wqkv_ref, bqkv_ref, wout_ref, bout_ref,     # attention projections (pre-transposed, bf16)
    g1_ref, be1_ref,                            # attn_norm gamma / beta (f32)
    w1_ref, bf1_ref, w2_ref, bf2_ref,           # feed-forward (pre-transposed, bf16)
    g2_ref, be2_ref,                            # ff_norm gamma / beta (f32)
    o_ref,
    ctx_ref,                                    # VMEM scratch (S, F) f32
    *, n_heads):
    S, F = x_ref.shape
    d = F // n_heads
    eps = 1e-5
    neg = jnp.float32(-1e30)                    # finite "minus infinity"
    scale = 1.0 / math.sqrt(d)

    x = x_ref[...]                              # (S, F) f32
    pm = mask_ref[...]                          # (1, S) f32, 1.0 where padded

    # ---- qkv projection (bf16 operands, f32 accumulation) ----
    qkv = jnp.dot(x.astype(jnp.bfloat16), wqkv_ref[...],
                  preferred_element_type=jnp.float32) + bqkv_ref[0]
    q = qkv[:, :F] * scale                      # fold softmax scale into q once
    k = qkv[:, F:2 * F]
    v = qkv[:, 2 * F:]

    # ---- single additive attention bias (causal OR key padding), computed once ----
    row = jax.lax.broadcasted_iota(jnp.int32, (S, S), 0)
    col = jax.lax.broadcasted_iota(jnp.int32, (S, S), 1)
    masked = jnp.logical_or(col > row, pm > 0.5)          # (S, S)
    bias = jnp.where(masked, neg, jnp.float32(0.0))
    # zero the attention output when the whole sequence is padded (matches module)
    zero_mult = jnp.where(jnp.all(pm > 0.5), jnp.float32(0.0), jnp.float32(1.0))

    q_bf = q.astype(jnp.bfloat16)
    k_bf = k.astype(jnp.bfloat16)
    v_bf = v.astype(jnp.bfloat16)

    # contract over the head dim directly: no kh.T / XLU transpose
    dn = (((1,), (1,)), ((), ()))
    for h in range(n_heads):                    # static unroll; heads write into scratch
        sl = slice(h * d, (h + 1) * d)
        s = jax.lax.dot_general(q_bf[:, sl], k_bf[:, sl], dn,
                                preferred_element_type=jnp.float32) + bias
        m = jnp.max(s, axis=-1, keepdims=True)
        e = jnp.exp(s - m)
        inv = pl.reciprocal(jnp.sum(e, axis=-1, keepdims=True), approx=True)
        w = e * inv
        ctx_ref[:, sl] = jnp.dot(w.astype(jnp.bfloat16), v_bf[:, sl],
                                 preferred_element_type=jnp.float32)

    # zero_mult applied once to the merged (S, F) context instead of per-head (S, S)
    ctx = ctx_ref[...] * zero_mult
    attn_out = jnp.dot(ctx.astype(jnp.bfloat16), wout_ref[...],
                       preferred_element_type=jnp.float32) + bout_ref[0]

    # n_attn == 1 (no contexts), id_embed is None, dropout == identity
    # ---- attn LayerNorm (residual) ----
    h1 = x + attn_out
    mu = jnp.mean(h1, axis=-1, keepdims=True)
    var = jnp.mean(jnp.square(h1 - mu), axis=-1, keepdims=True)
    h1n = (h1 - mu) * jax.lax.rsqrt(var + eps) * g1_ref[0] + be1_ref[0]

    # ---- feed forward with tanh-approx gelu (same formula as reference) ----
    z = jnp.dot(h1n.astype(jnp.bfloat16), w1_ref[...],
                preferred_element_type=jnp.float32) + bf1_ref[0]
    g = 0.5 * z * (1.0 + jnp.tanh(math.sqrt(2.0 / math.pi) * (z + 0.044715 * z * z * z)))
    f = jnp.dot(g.astype(jnp.bfloat16), w2_ref[...],
                preferred_element_type=jnp.float32) + bf2_ref[0]

    # ---- ff LayerNorm (residual) ----
    h2 = h1n + f
    mu2 = jnp.mean(h2, axis=-1, keepdims=True)
    var2 = jnp.mean(jnp.square(h2 - mu2), axis=-1, keepdims=True)
    o_ref[...] = (h2 - mu2) * jax.lax.rsqrt(var2 + eps) * g2_ref[0] + be2_ref[0]


def transformer_block(x, padding_mask, params, n_heads):
    """x: (B, S, F) f32, padding_mask: (B, S) bool. Returns (y, padding_mask)."""
    B, S, F = x.shape
    mask = padding_mask.astype(jnp.float32).reshape(B, 1, S)

    bf16 = jnp.bfloat16
    # pre-transpose (kernel does x @ W_T + b) and pre-cast weights to bf16 (MXU mode)
    wqkv_t = params["Wqkv"].T.astype(bf16)      # (F, 3F)
    wout_t = params["Wout"].T.astype(bf16)      # (F, F)
    w1_t = params["W1"].T.astype(bf16)          # (F, 4F)
    w2_t = params["W2"].T.astype(bf16)          # (4F, F)
    row = lambda v: v.reshape(1, -1).astype(jnp.float32)

    kernel = functools.partial(transformer_block_kernel, n_heads=n_heads)

    # explicit scoped-VMEM budget: weights + in-flight activations + headroom
    nbytes = lambda a: int(a.size) * a.dtype.itemsize
    weight_bytes = sum(nbytes(w) for w in (wqkv_t, wout_t, w1_t, w2_t))
    act_bytes = 4 * (2 * S * F * 2      # x + out tiles (double-buffered)
                     + 3 * S * F        # qkv
                     + 4 * S * F        # ffn hidden
                     + 2 * S * S        # scores + exp
                     + S * F)           # ctx scratch
    vmem_limit_bytes = int(min(max(2 * weight_bytes + 2 * act_bytes, 8 << 20), 64 << 20))

    def build(single_buffer_weights):
        wkw = {"pipeline_mode": pl.Buffered(1)} if single_buffer_weights else {}

        def wspec(shape):  # constant-index weight / bias / LN-param block
            return pl.BlockSpec(shape, lambda b: (0,) * len(shape), **wkw)

        in_specs = [
            pl.BlockSpec((pl.Squeezed(), S, F), lambda b: (b, 0, 0)),   # x
            pl.BlockSpec((pl.Squeezed(), 1, S), lambda b: (b, 0, 0)),   # padding mask
            wspec(wqkv_t.shape), wspec((1, 3 * F)),
            wspec(wout_t.shape), wspec((1, F)),
            wspec((1, F)), wspec((1, F)),                               # attn_norm
            wspec(w1_t.shape), wspec((1, 4 * F)),
            wspec(w2_t.shape), wspec((1, F)),
            wspec((1, F)), wspec((1, F)),                               # ff_norm
        ]
        return pl.pallas_call(
            kernel,
            out_shape=jax.ShapeDtypeStruct((B, S, F), jnp.float32),
            grid=(B,),
            in_specs=in_specs,
            out_specs=pl.BlockSpec((pl.Squeezed(), S, F), lambda b: (b, 0, 0)),
            scratch_shapes=[pltpu.VMEM((S, F), jnp.float32)],
            compiler_params=pltpu.CompilerParams(
                dimension_semantics=("parallel",),      # batch steps are independent
                vmem_limit_bytes=vmem_limit_bytes),
        )

    args = (
        x, mask,
        wqkv_t, row(params["bqkv"]), wout_t, row(params["bout"]),
        row(params["ln1_g"]), row(params["ln1_b"]),
        w1_t, row(params["b1"]), w2_t, row(params["b2"]),
        row(params["ln2_g"]), row(params["ln2_b"]),
    )

    try:
        # preferred: constant weight blocks single-buffered (halves weight VMEM)
        y = jax.block_until_ready(build(True)(*args))
    except Exception:
        # fallback if this JAX build rejects pl.Buffered(1) on an input spec
        y = build(False)(*args)
    return y, padding_mask


# ---------------- pure-JAX reference (mirrors the PyTorch forward, bf16 dots) ----------------
def reference(x, padding_mask, params, n_heads):
    B, S, F = x.shape
    d = F // n_heads
    bf = lambda t: t.astype(jnp.bfloat16)
    scale = 1.0 / math.sqrt(d)

    qkv = jnp.dot(bf(x), bf(params["Wqkv"].T),
                  preferred_element_type=jnp.float32) + params["bqkv"]
    q, k, v = qkv[..., :F] * scale, qkv[..., F:2 * F], qkv[..., 2 * F:]
    qh = q.reshape(B, S, n_heads, d)
    kh = k.reshape(B, S, n_heads, d)
    vh = v.reshape(B, S, n_heads, d)

    s = jnp.einsum("bqhd,bkhd->bhqk", bf(qh), bf(kh),
                   preferred_element_type=jnp.float32)
    causal = jnp.triu(jnp.ones((S, S), dtype=bool), 1)
    masked = causal[None, None] | padding_mask[:, None, None, :]
    s = jnp.where(masked, -1e30, s)
    w = jax.nn.softmax(s, axis=-1)
    w = jnp.where(jnp.all(padding_mask, axis=-1)[:, None, None, None], 0.0, w)
    ctx = jnp.einsum("bhqk,bkhd->bqhd", bf(w), bf(vh),
                     preferred_element_type=jnp.float32).reshape(B, S, F)
    attn = jnp.dot(bf(ctx), bf(params["Wout"].T),
                   preferred_element_type=jnp.float32) + params["bout"]

    def ln(h, g, b):
        mu = h.mean(-1, keepdims=True)
        var = ((h - mu) ** 2).mean(-1, keepdims=True)
        return (h - mu) * jax.lax.rsqrt(var + 1e-5) * g + b

    h1 = ln(x + attn, params["ln1_g"], params["ln1_b"])
    z = jnp.dot(bf(h1), bf(params["W1"].T),
                preferred_element_type=jnp.float32) + params["b1"]
    gz = 0.5 * z * (1 + jnp.tanh(math.sqrt(2 / math.pi) * (z + 0.044715 * z ** 3)))
    f = jnp.dot(bf(gz), bf(params["W2"].T),
                preferred_element_type=jnp.float32) + params["b2"]
    return ln(h1 + f, params["ln2_g"], params["ln2_b"])


if __name__ == "__main__":
    # small but vreg-aligned shapes: F multiple of 128, S multiple of 8
    B, S, F, H = 2, 16, 128, 4
    key = jax.random.PRNGKey(0)
    ks = jax.random.split(key, 10)

    params = {
        "Wqkv": jax.random.normal(ks[0], (3 * F, F), jnp.float32) * 0.02,
        "bqkv": jax.random.normal(ks[1], (3 * F,), jnp.float32) * 0.02,
        "Wout": jax.random.normal(ks[2], (F, F), jnp.float32) * 0.02,
        "bout": jax.random.normal(ks[3], (F,), jnp.float32) * 0.02,
        "W1": jax.random.normal(ks[4], (4 * F, F), jnp.float32) * 0.02,
        "b1": jax.random.normal(ks[5], (4 * F,), jnp.float32) * 0.02,
        "W2": jax.random.normal(ks[6], (F, 4 * F), jnp.float32) * 0.02,
        "b2": jax.random.normal(ks[7], (F,), jnp.float32) * 0.02,
        "ln1_g": jnp.ones((F,), jnp.float32),
        "ln1_b": jnp.zeros((F,), jnp.float32),
        "ln2_g": jnp.ones((F,), jnp.float32),
        "ln2_b": jnp.zeros((F,), jnp.float32),
    }

    x = jax.random.normal(ks[8], (B, S, F), jnp.float32)
    # batch 1 has its last positions padded (keeps every query row non-degenerate)
    padding_mask = jnp.zeros((B, S), dtype=bool).at[1, -5:].set(True)

    y, pm_out = transformer_block(x, padding_mask, params, H)
    y = jax.block_until_ready(y)

    y_ref = reference(x, padding_mask, params, H)
    assert y.shape == (B, S, F)
    assert not jnp.any(jnp.isnan(y))
    assert jnp.allclose(y, y_ref, atol=1e-2, rtol=1e-2), (
        f"max err {jnp.max(jnp.abs(y - y_ref))}")

    print("KERNEL_OK")
</pallas_src>

<mosaic_0001>
module attributes {stable_mosaic.version = 11 : i64} {
  func.func @transformer_block_kernel(%arg0: i32, %arg1: memref<1x16x128xf32, #tpu.memory_space<vmem>>, %arg2: memref<1x1x16xf32, #tpu.memory_space<vmem>>, %arg3: memref<128x384xbf16, #tpu.memory_space<vmem>>, %arg4: memref<1x384xf32, #tpu.memory_space<vmem>>, %arg5: memref<128x128xbf16, #tpu.memory_space<vmem>>, %arg6: memref<1x128xf32, #tpu.memory_space<vmem>>, %arg7: memref<1x128xf32, #tpu.memory_space<vmem>>, %arg8: memref<1x128xf32, #tpu.memory_space<vmem>>, %arg9: memref<128x512xbf16, #tpu.memory_space<vmem>>, %arg10: memref<1x512xf32, #tpu.memory_space<vmem>>, %arg11: memref<512x128xbf16, #tpu.memory_space<vmem>>, %arg12: memref<1x128xf32, #tpu.memory_space<vmem>>, %arg13: memref<1x128xf32, #tpu.memory_space<vmem>>, %arg14: memref<1x128xf32, #tpu.memory_space<vmem>>, %arg15: memref<1x16x128xf32, #tpu.memory_space<vmem>>, %arg16: memref<16x128xf32, #tpu.memory_space<vmem>>) attributes {dimension_semantics = [#tpu.dimension_semantics<parallel>], iteration_bounds = array<i64: 2>, scalar_prefetch = 0 : i64, scratch_operands = 1 : i64, tpu.core_type = #tpu.core_type<tc>, window_params = [{transform_indices = @transform_0, window_bounds = array<i64: 1, 16, 128>}, {transform_indices = @transform_1, window_bounds = array<i64: 1, 1, 16>}, {pipeline_mode = #tpu.pipeline_mode<synchronous>, transform_indices = @transform_2, window_bounds = array<i64: 128, 384>}, {pipeline_mode = #tpu.pipeline_mode<synchronous>, transform_indices = @transform_3, window_bounds = array<i64: 1, 384>}, {pipeline_mode = #tpu.pipeline_mode<synchronous>, transform_indices = @transform_4, window_bounds = array<i64: 128, 128>}, {pipeline_mode = #tpu.pipeline_mode<synchronous>, transform_indices = @transform_5, window_bounds = array<i64: 1, 128>}, {pipeline_mode = #tpu.pipeline_mode<synchronous>, transform_indices = @transform_6, window_bounds = array<i64: 1, 128>}, {pipeline_mode = #tpu.pipeline_mode<synchronous>, transform_indices = @transform_7, window_bounds = array<i64: 1, 128>}, {pipeline_mode = #tpu.pipeline_mode<synchronous>, transform_indices = @transform_8, window_bounds = array<i64: 128, 512>}, {pipeline_mode = #tpu.pipeline_mode<synchronous>, transform_indices = @transform_9, window_bounds = array<i64: 1, 512>}, {pipeline_mode = #tpu.pipeline_mode<synchronous>, transform_indices = @transform_10, window_bounds = array<i64: 512, 128>}, {pipeline_mode = #tpu.pipeline_mode<synchronous>, transform_indices = @transform_11, window_bounds = array<i64: 1, 128>}, {pipeline_mode = #tpu.pipeline_mode<synchronous>, transform_indices = @transform_12, window_bounds = array<i64: 1, 128>}, {pipeline_mode = #tpu.pipeline_mode<synchronous>, transform_indices = @transform_13, window_bounds = array<i64: 1, 128>}, {transform_indices = @transform_14, window_bounds = array<i64: 1, 16, 128>}]} {
    %c0 = arith.constant 0 : index
    %c0_0 = arith.constant 0 : index
    %c0_1 = arith.constant 0 : index
    %0 = vector.load %arg1[%c0, %c0_0, %c0_1] : memref<1x16x128xf32, #tpu.memory_space<vmem>>, vector<1x16x128xf32>
    %1 = vector.shape_cast %0 : vector<1x16x128xf32> to vector<16x128xf32>
    %c0_2 = arith.constant 0 : index
    %c0_3 = arith.constant 0 : index
    %c0_4 = arith.constant 0 : index
    %2 = vector.load %arg2[%c0_2, %c0_3, %c0_4] : memref<1x1x16xf32, #tpu.memory_space<vmem>>, vector<1x1x16xf32>
    %3 = vector.shape_cast %2 : vector<1x1x16xf32> to vector<1x16xf32>
    %4 = arith.truncf %1 : vector<16x128xf32> to vector<16x128xbf16>
    %c0_5 = arith.constant 0 : index
    %c0_6 = arith.constant 0 : index
    %5 = vector.load %arg3[%c0_5, %c0_6] : memref<128x384xbf16, #tpu.memory_space<vmem>>, vector<128x384xbf16>
    %cst = arith.constant dense<0.000000e+00> : vector<16x384xf32>
    %6 = tpu.matmul %4, %5, %cst {dimension_numbers = #tpu.dot_dimension_numbers<[1], [0], [0], [1], [0, 0, 1, 1], [], []>} : vector<16x128xbf16>, vector<128x384xbf16>, vector<16x384xf32> -> vector<16x384xf32>
    %c0_7 = arith.constant 0 : index
    %c0_8 = arith.constant 0 : index
    %7 = vector.load %arg4[%c0_7, %c0_8] : memref<1x384xf32, #tpu.memory_space<vmem>>, vector<1x384xf32>
    %8 = vector.shape_cast %7 : vector<1x384xf32> to vector<384xf32>
    %9 = vector.shape_cast %8 : vector<384xf32> to vector<1x384xf32>
    %10 = vector.broadcast %9 : vector<1x384xf32> to vector<16x384xf32>
    %11 = arith.addf %6, %10 : vector<16x384xf32>
    %12 = vector.extract_strided_slice %11 {offsets = [0, 0], sizes = [16, 128], strides = [1, 1]} : vector<16x384xf32> to vector<16x128xf32>
    %cst_9 = arith.constant 0.176776692 : f32
    %13 = vector.broadcast %cst_9 : f32 to vector<16x128xf32>
    %14 = arith.mulf %12, %13 : vector<16x128xf32>
    %15 = vector.extract_strided_slice %11 {offsets = [0, 128], sizes = [16, 128], strides = [1, 1]} : vector<16x384xf32> to vector<16x128xf32>
    %16 = vector.extract_strided_slice %11 {offsets = [0, 256], sizes = [16, 128], strides = [1, 1]} : vector<16x384xf32> to vector<16x128xf32>
    %17 = tpu.iota {dimensions = array<i32: 0>} : vector<16x16xi32>
    %18 = tpu.iota {dimensions = array<i32: 1>} : vector<16x16xi32>
    %19 = arith.cmpi sgt, %18, %17 : vector<16x16xi32>
    %cst_10 = arith.constant 5.000000e-01 : f32
    %20 = vector.broadcast %cst_10 : f32 to vector<1x16xf32>
    %21 = arith.cmpf ogt, %3, %20 : vector<1x16xf32>
    %22 = vector.broadcast %21 : vector<1x16xi1> to vector<16x16xi1>
    %23 = arith.ori %19, %22 : vector<16x16xi1>
    %cst_11 = arith.constant -1.000000e+30 : f32
    %cst_12 = arith.constant 0.000000e+00 : f32
    %24 = vector.broadcast %cst_11 : f32 to vector<16x16xf32>
    %25 = vector.broadcast %cst_12 : f32 to vector<16x16xf32>
    %26 = arith.select %23, %24, %25 : vector<16x16xi1>, vector<16x16xf32>
    %cst_13 = arith.constant 5.000000e-01 : f32
    %27 = vector.broadcast %cst_13 : f32 to vector<1x16xf32>
    %28 = arith.cmpf ogt, %3, %27 : vector<1x16xf32>
    %cst_14 = arith.constant 1.000000e+00 : f32
    %cst_15 = arith.constant 0.000000e+00 : f32
    %29 = vector.broadcast %cst_14 : f32 to vector<1x16xf32>
    %30 = vector.broadcast %cst_15 : f32 to vector<1x16xf32>
    %31 = arith.select %28, %29, %30 : vector<1x16xi1>, vector<1x16xf32>
    %32 = vector.shape_cast %31 : vector<1x16xf32> to vector<1x1x16xf32>
    %cst_16 = arith.constant dense<0x7F800000> : vector<1xf32>
    %33 = vector.multi_reduction <minimumf>, %32, %cst_16 [1, 2] : vector<1x1x16xf32> to vector<1xf32>
    %34 = vector.shape_cast %33 : vector<1xf32> to vector<1x1x1xf32>
    %35 = vector.extract %34[0, 0, 0] : f32 from vector<1x1x1xf32>
    %cst_17 = arith.constant 0.000000e+00 : f32
    %36 = arith.cmpf ogt, %35, %cst_17 : f32
    %cst_18 = arith.constant 0.000000e+00 : f32
    %cst_19 = arith.constant 1.000000e+00 : f32
    %37 = arith.select %36, %cst_18, %cst_19 : f32
    %38 = arith.truncf %14 : vector<16x128xf32> to vector<16x128xbf16>
    %39 = arith.truncf %15 : vector<16x128xf32> to vector<16x128xbf16>
    %40 = arith.truncf %16 : vector<16x128xf32> to vector<16x128xbf16>
    %41 = vector.extract_strided_slice %38 {offsets = [0, 0], sizes = [16, 32], strides = [1, 1]} : vector<16x128xbf16> to vector<16x32xbf16>
    %42 = vector.extract_strided_slice %39 {offsets = [0, 0], sizes = [16, 32], strides = [1, 1]} : vector<16x128xbf16> to vector<16x32xbf16>
    %cst_20 = arith.constant dense<0.000000e+00> : vector<16x16xf32>
    %43 = tpu.matmul %41, %42, %cst_20 {dimension_numbers = #tpu.dot_dimension_numbers<[1], [1], [0], [0], [0, 0, 1, 0], [], []>} : vector<16x32xbf16>, vector<16x32xbf16>, vector<16x16xf32> -> vector<16x16xf32>
    %44 = arith.addf %43, %26 : vector<16x16xf32>
    %cst_21 = arith.constant dense<0xFF800000> : vector<16xf32>
    %45 = vector.multi_reduction <maximumf>, %44, %cst_21 [1] : vector<16x16xf32> to vector<16xf32>
    %46 = vector.shape_cast %45 : vector<16xf32> to vector<16x1xf32>
    %47 = vector.broadcast %46 : vector<16x1xf32> to vector<16x16xf32>
    %48 = arith.subf %44, %47 : vector<16x16xf32>
    %49 = math.exp %48 : vector<16x16xf32>
    %cst_22 = arith.constant dense<0.000000e+00> : vector<16xf32>
    %50 = vector.multi_reduction <add>, %49, %cst_22 [1] : vector<16x16xf32> to vector<16xf32>
    %51 = vector.shape_cast %50 : vector<16xf32> to vector<16x1xf32>
    %52 = tpu.reciprocal %51 {approx = true} : vector<16x1xf32> -> vector<16x1xf32>
    %53 = vector.broadcast %52 : vector<16x1xf32> to vector<16x16xf32>
    %54 = arith.mulf %49, %53 : vector<16x16xf32>
    %55 = arith.truncf %54 : vector<16x16xf32> to vector<16x16xbf16>
    %56 = vector.extract_strided_slice %40 {offsets = [0, 0], sizes = [16, 32], strides = [1, 1]} : vector<16x128xbf16> to vector<16x32xbf16>
    %cst_23 = arith.constant dense<0.000000e+00> : vector<16x32xf32>
    %57 = tpu.matmul %55, %56, %cst_23 {dimension_numbers = #tpu.dot_dimension_numbers<[1], [0], [0], [1], [0, 0, 1, 1], [], []>} : vector<16x16xbf16>, vector<16x32xbf16>, vector<16x32xf32> -> vector<16x32xf32>
    %c0_24 = arith.constant 0 : index
    %c0_25 = arith.constant 0 : index
    %58 = vector.load %arg16[%c0_24, %c0_25] : memref<16x128xf32, #tpu.memory_space<vmem>>, vector<16x32xf32>
    tpu.vector_store %arg16[%c0_24, %c0_25], %57 {strides = array<i32>} : memref<16x128xf32, #tpu.memory_space<vmem>>, vector<16x32xf32>,
    %59 = vector.extract_strided_slice %38 {offsets = [0, 32], sizes = [16, 32], strides = [1, 1]} : vector<16x128xbf16> to vector<16x32xbf16>
    %60 = vector.extract_strided_slice %39 {offsets = [0, 32], sizes = [16, 32], strides = [1, 1]} : vector<16x128xbf16> to vector<16x32xbf16>
    %cst_26 = arith.constant dense<0.000000e+00> : vector<16x16xf32>
    %61 = tpu.matmul %59, %60, %cst_26 {dimension_numbers = #tpu.dot_dimension_numbers<[1], [1], [0], [0], [0, 0, 1, 0], [], []>} : vector<16x32xbf16>, vector<16x32xbf16>, vector<16x16xf32> -> vector<16x16xf32>
    %62 = arith.addf %61, %26 : vector<16x16xf32>
    %cst_27 = arith.constant dense<0xFF800000> : vector<16xf32>
    %63 = vector.multi_reduction <maximumf>, %62, %cst_27 [1] : vector<16x16xf32> to vector<16xf32>
    %64 = vector.shape_cast %63 : vector<16xf32> to vector<16x1xf32>
    %65 = vector.broadcast %64 : vector<16x1xf32> to vector<16x16xf32>
    %66 = arith.subf %62, %65 : vector<16x16xf32>
    %67 = math.exp %66 : vector<16x16xf32>
    %cst_28 = arith.constant dense<0.000000e+00> : vector<16xf32>
    %68 = vector.multi_reduction <add>, %67, %cst_28 [1] : vector<16x16xf32> to vector<16xf32>
    %69 = vector.shape_cast %68 : vector<16xf32> to vector<16x1xf32>
    %70 = tpu.reciprocal %69 {approx = true} : vector<16x1xf32> -> vector<16x1xf32>
    %71 = vector.broadcast %70 : vector<16x1xf32> to vector<16x16xf32>
    %72 = arith.mulf %67, %71 : vector<16x16xf32>
    %73 = arith.truncf %72 : vector<16x16xf32> to vector<16x16xbf16>
    %74 = vector.extract_strided_slice %40 {offsets = [0, 32], sizes = [16, 32], strides = [1, 1]} : vector<16x128xbf16> to vector<16x32xbf16>
    %cst_29 = arith.constant dense<0.000000e+00> : vector<16x32xf32>
    %75 = tpu.matmul %73, %74, %cst_29 {dimension_numbers = #tpu.dot_dimension_numbers<[1], [0], [0], [1], [0, 0, 1, 1], [], []>} : vector<16x16xbf16>, vector<16x32xbf16>, vector<16x32xf32> -> vector<16x32xf32>
    %c0_30 = arith.constant 0 : index
    %c32 = arith.constant 32 : index
    %76 = vector.load %arg16[%c0_30, %c32] : memref<16x128xf32, #tpu.memory_space<vmem>>, vector<16x32xf32>
    tpu.vector_store %arg16[%c0_30, %c32], %75 {strides = array<i32>} : memref<16x128xf32, #tpu.memory_space<vmem>>, vector<16x32xf32>,
    %77 = vector.extract_strided_slice %38 {offsets = [0, 64], sizes = [16, 32], strides = [1, 1]} : vector<16x128xbf16> to vector<16x32xbf16>
    %78 = vector.extract_strided_slice %39 {offsets = [0, 64], sizes = [16, 32], strides = [1, 1]} : vector<16x128xbf16> to vector<16x32xbf16>
    %cst_31 = arith.constant dense<0.000000e+00> : vector<16x16xf32>
    %79 = tpu.matmul %77, %78, %cst_31 {dimension_numbers = #tpu.dot_dimension_numbers<[1], [1], [0], [0], [0, 0, 1, 0], [], []>} : vector<16x32xbf16>, vector<16x32xbf16>, vector<16x16xf32> -> vector<16x16xf32>
    %80 = arith.addf %79, %26 : vector<16x16xf32>
    %cst_32 = arith.constant dense<0xFF800000> : vector<16xf32>
    %81 = vector.multi_reduction <maximumf>, %80, %cst_32 [1] : vector<16x16xf32> to vector<16xf32>
    %82 = vector.shape_cast %81 : vector<16xf32> to vector<16x1xf32>
    %83 = vector.broadcast %82 : vector<16x1xf32> to vector<16x16xf32>
    %84 = arith.subf %80, %83 : vector<16x16xf32>
    %85 = math.exp %84 : vector<16x16xf32>
    %cst_33 = arith.constant dense<0.000000e+00> : vector<16xf32>
    %86 = vector.multi_reduction <add>, %85, %cst_33 [1] : vector<16x16xf32> to vector<16xf32>
    %87 = vector.shape_cast %86 : vector<16xf32> to vector<16x1xf32>
    %88 = tpu.reciprocal %87 {approx = true} : vector<16x1xf32> -> vector<16x1xf32>
    %89 = vector.broadcast %88 : vector<16x1xf32> to vector<16x16xf32>
    %90 = arith.mulf %85, %89 : vector<16x16xf32>
    %91 = arith.truncf %90 : vector<16x16xf32> to vector<16x16xbf16>
    %92 = vector.extract_strided_slice %40 {offsets = [0, 64], sizes = [16, 32], strides = [1, 1]} : vector<16x128xbf16> to vector<16x32xbf16>
    %cst_34 = arith.constant dense<0.000000e+00> : vector<16x32xf32>
    %93 = tpu.matmul %91, %92, %cst_34 {dimension_numbers = #tpu.dot_dimension_numbers<[1], [0], [0], [1], [0, 0, 1, 1], [], []>} : vector<16x16xbf16>, vector<16x32xbf16>, vector<16x32xf32> -> vector<16x32xf32>
    %c0_35 = arith.constant 0 : index
    %c64 = arith.constant 64 : index
    %94 = vector.load %arg16[%c0_35, %c64] : memref<16x128xf32, #tpu.memory_space<vmem>>, vector<16x32xf32>
    tpu.vector_store %arg16[%c0_35, %c64], %93 {strides = array<i32>} : memref<16x128xf32, #tpu.memory_space<vmem>>, vector<16x32xf32>,
    %95 = vector.extract_strided_slice %38 {offsets = [0, 96], sizes = [16, 32], strides = [1, 1]} : vector<16x128xbf16> to vector<16x32xbf16>
    %96 = vector.extract_strided_slice %39 {offsets = [0, 96], sizes = [16, 32], strides = [1, 1]} : vector<16x128xbf16> to vector<16x32xbf16>
    %cst_36 = arith.constant dense<0.000000e+00> : vector<16x16xf32>
    %97 = tpu.matmul %95, %96, %cst_36 {dimension_numbers = #tpu.dot_dimension_numbers<[1], [1], [0], [0], [0, 0, 1, 0], [], []>} : vector<16x32xbf16>, vector<16x32xbf16>, vector<16x16xf32> -> vector<16x16xf32>
    %98 = arith.addf %97, %26 : vector<16x16xf32>
    %cst_37 = arith.constant dense<0xFF800000> : vector<16xf32>
    %99 = vector.multi_reduction <maximumf>, %98, %cst_37 [1] : vector<16x16xf32> to vector<16xf32>
    %100 = vector.shape_cast %99 : vector<16xf32> to vector<16x1xf32>
    %101 = vector.broadcast %100 : vector<16x1xf32> to vector<16x16xf32>
    %102 = arith.subf %98, %101 : vector<16x16xf32>
    %103 = math.exp %102 : vector<16x16xf32>
    %cst_38 = arith.constant dense<0.000000e+00> : vector<16xf32>
    %104 = vector.multi_reduction <add>, %103, %cst_38 [1] : vector<16x16xf32> to vector<16xf32>
    %105 = vector.shape_cast %104 : vector<16xf32> to vector<16x1xf32>
    %106 = tpu.reciprocal %105 {approx = true} : vector<16x1xf32> -> vector<16x1xf32>
    %107 = vector.broadcast %106 : vector<16x1xf32> to vector<16x16xf32>
    %108 = arith.mulf %103, %107 : vector<16x16xf32>
    %109 = arith.truncf %108 : vector<16x16xf32> to vector<16x16xbf16>
    %110 = vector.extract_strided_slice %40 {offsets = [0, 96], sizes = [16, 32], strides = [1, 1]} : vector<16x128xbf16> to vector<16x32xbf16>
    %cst_39 = arith.constant dense<0.000000e+00> : vector<16x32xf32>
    %111 = tpu.matmul %109, %110, %cst_39 {dimension_numbers = #tpu.dot_dimension_numbers<[1], [0], [0], [1], [0, 0, 1, 1], [], []>} : vector<16x16xbf16>, vector<16x32xbf16>, vector<16x32xf32> -> vector<16x32xf32>
    %c0_40 = arith.constant 0 : index
    %c96 = arith.constant 96 : index
    %112 = vector.load %arg16[%c0_40, %c96] : memref<16x128xf32, #tpu.memory_space<vmem>>, vector<16x32xf32>
    tpu.vector_store %arg16[%c0_40, %c96], %111 {strides = array<i32>} : memref<16x128xf32, #tpu.memory_space<vmem>>, vector<16x32xf32>,
    %c0_41 = arith.constant 0 : index
    %c0_42 = arith.constant 0 : index
    %113 = vector.load %arg16[%c0_41, %c0_42] : memref<16x128xf32, #tpu.memory_space<vmem>>, vector<16x128xf32>
    %114 = vector.broadcast %37 : f32 to vector<16x128xf32>
    %115 = arith.mulf %113, %114 : vector<16x128xf32>
    %116 = arith.truncf %115 : vector<16x128xf32> to vector<16x128xbf16>
    %c0_43 = arith.constant 0 : index
    %c0_44 = arith.constant 0 : index
    %117 = vector.load %arg5[%c0_43, %c0_44] : memref<128x128xbf16, #tpu.memory_space<vmem>>, vector<128x128xbf16>
    %cst_45 = arith.constant dense<0.000000e+00> : vector<16x128xf32>
    %118 = tpu.matmul %116, %117, %cst_45 {dimension_numbers = #tpu.dot_dimension_numbers<[1], [0], [0], [1], [0, 0, 1, 1], [], []>} : vector<16x128xbf16>, vector<128x128xbf16>, vector<16x128xf32> -> vector<16x128xf32>
    %c0_46 = arith.constant 0 : index
    %c0_47 = arith.constant 0 : index
    %119 = vector.load %arg6[%c0_46, %c0_47] : memref<1x128xf32, #tpu.memory_space<vmem>>, vector<1x128xf32>
    %120 = vector.shape_cast %119 : vector<1x128xf32> to vector<128xf32>
    %121 = vector.shape_cast %120 : vector<128xf32> to vector<1x128xf32>
    %122 = vector.broadcast %121 : vector<1x128xf32> to vector<16x128xf32>
    %123 = arith.addf %118, %122 : vector<16x128xf32>
    %124 = arith.addf %1, %123 : vector<16x128xf32>
    %cst_48 = arith.constant dense<0.000000e+00> : vector<16xf32>
    %125 = vector.multi_reduction <add>, %124, %cst_48 [1] : vector<16x128xf32> to vector<16xf32>
    %126 = vector.shape_cast %125 : vector<16xf32> to vector<16x1xf32>
    %cst_49 = arith.constant 1.280000e+02 : f32
    %127 = vector.broadcast %cst_49 : f32 to vector<16x1xf32>
    %128 = arith.divf %126, %127 : vector<16x1xf32>
    %129 = vector.broadcast %128 : vector<16x1xf32> to vector<16x128xf32>
    %130 = arith.subf %124, %129 : vector<16x128xf32>
    %131 = arith.mulf %130, %130 : vector<16x128xf32>
    %cst_50 = arith.constant dense<0.000000e+00> : vector<16xf32>
    %132 = vector.multi_reduction <add>, %131, %cst_50 [1] : vector<16x128xf32> to vector<16xf32>
    %133 = vector.shape_cast %132 : vector<16xf32> to vector<16x1xf32>
    %cst_51 = arith.constant 1.280000e+02 : f32
    %134 = vector.broadcast %cst_51 : f32 to vector<16x1xf32>
    %135 = arith.divf %133, %134 : vector<16x1xf32>
    %136 = vector.broadcast %128 : vector<16x1xf32> to vector<16x128xf32>
    %137 = arith.subf %124, %136 : vector<16x128xf32>
    %cst_52 = arith.constant 9.99999974E-6 : f32
    %138 = vector.broadcast %cst_52 : f32 to vector<16x1xf32>
    %139 = arith.addf %135, %138 : vector<16x1xf32>
    %140 = math.rsqrt %139 : vector<16x1xf32>
    %141 = vector.broadcast %140 : vector<16x1xf32> to vector<16x128xf32>
    %142 = arith.mulf %137, %141 : vector<16x128xf32>
    %c0_53 = arith.constant 0 : index
    %c0_54 = arith.constant 0 : index
    %143 = vector.load %arg7[%c0_53, %c0_54] : memref<1x128xf32, #tpu.memory_space<vmem>>, vector<1x128xf32>
    %144 = vector.shape_cast %143 : vector<1x128xf32> to vector<128xf32>
    %145 = vector.shape_cast %144 : vector<128xf32> to vector<1x128xf32>
    %146 = vector.broadcast %145 : vector<1x128xf32> to vector<16x128xf32>
    %147 = arith.mulf %142, %146 : vector<16x128xf32>
    %c0_55 = arith.constant 0 : index
    %c0_56 = arith.constant 0 : index
    %148 = vector.load %arg8[%c0_55, %c0_56] : memref<1x128xf32, #tpu.memory_space<vmem>>, vector<1x128xf32>
    %149 = vector.shape_cast %148 : vector<1x128xf32> to vector<128xf32>
    %150 = vector.shape_cast %149 : vector<128xf32> to vector<1x128xf32>
    %151 = vector.broadcast %150 : vector<1x128xf32> to vector<16x128xf32>
    %152 = arith.addf %147, %151 : vector<16x128xf32>
    %153 = arith.truncf %152 : vector<16x128xf32> to vector<16x128xbf16>
    %c0_57 = arith.constant 0 : index
    %c0_58 = arith.constant 0 : index
    %154 = vector.load %arg9[%c0_57, %c0_58] : memref<128x512xbf16, #tpu.memory_space<vmem>>, vector<128x512xbf16>
    %cst_59 = arith.constant dense<0.000000e+00> : vector<16x512xf32>
    %155 = tpu.matmul %153, %154, %cst_59 {dimension_numbers = #tpu.dot_dimension_numbers<[1], [0], [0], [1], [0, 0, 1, 1], [], []>} : vector<16x128xbf16>, vector<128x512xbf16>, vector<16x512xf32> -> vector<16x512xf32>
    %c0_60 = arith.constant 0 : index
    %c0_61 = arith.constant 0 : index
    %156 = vector.load %arg10[%c0_60, %c0_61] : memref<1x512xf32, #tpu.memory_space<vmem>>, vector<1x512xf32>
    %157 = vector.shape_cast %156 : vector<1x512xf32> to vector<512xf32>
    %158 = vector.shape_cast %157 : vector<512xf32> to vector<1x512xf32>
    %159 = vector.broadcast %158 : vector<1x512xf32> to vector<16x512xf32>
    %160 = arith.addf %155, %159 : vector<16x512xf32>
    %cst_62 = arith.constant 5.000000e-01 : f32
    %161 = vector.broadcast %cst_62 : f32 to vector<16x512xf32>
    %162 = arith.mulf %161, %160 : vector<16x512xf32>
    %cst_63 = arith.constant 4.471500e-02 : f32
    %163 = vector.broadcast %cst_63 : f32 to vector<16x512xf32>
    %164 = arith.mulf %163, %160 : vector<16x512xf32>
    %165 = arith.mulf %164, %160 : vector<16x512xf32>
    %166 = arith.mulf %165, %160 : vector<16x512xf32>
    %167 = arith.addf %160, %166 : vector<16x512xf32>
    %cst_64 = arith.constant 0.797884583 : f32
    %168 = vector.broadcast %cst_64 : f32 to vector<16x512xf32>
    %169 = arith.mulf %168, %167 : vector<16x512xf32>
    %170 = math.tanh %169 : vector<16x512xf32>
    %cst_65 = arith.constant 1.000000e+00 : f32
    %171 = vector.broadcast %cst_65 : f32 to vector<16x512xf32>
    %172 = arith.addf %171, %170 : vector<16x512xf32>
    %173 = arith.mulf %162, %172 : vector<16x512xf32>
    %174 = arith.truncf %173 : vector<16x512xf32> to vector<16x512xbf16>
    %c0_66 = arith.constant 0 : index
    %c0_67 = arith.constant 0 : index
    %175 = vector.load %arg11[%c0_66, %c0_67] : memref<512x128xbf16, #tpu.memory_space<vmem>>, vector<512x128xbf16>
    %cst_68 = arith.constant dense<0.000000e+00> : vector<16x128xf32>
    %176 = tpu.matmul %174, %175, %cst_68 {dimension_numbers = #tpu.dot_dimension_numbers<[1], [0], [0], [1], [0, 0, 1, 1], [], []>} : vector<16x512xbf16>, vector<512x128xbf16>, vector<16x128xf32> -> vector<16x128xf32>
    %c0_69 = arith.constant 0 : index
    %c0_70 = arith.constant 0 : index
    %177 = vector.load %arg12[%c0_69, %c0_70] : memref<1x128xf32, #tpu.memory_space<vmem>>, vector<1x128xf32>
    %178 = vector.shape_cast %177 : vector<1x128xf32> to vector<128xf32>
    %179 = vector.shape_cast %178 : vector<128xf32> to vector<1x128xf32>
    %180 = vector.broadcast %179 : vector<1x128xf32> to vector<16x128xf32>
    %181 = arith.addf %176, %180 : vector<16x128xf32>
    %182 = arith.addf %152, %181 : vector<16x128xf32>
    %cst_71 = arith.constant dense<0.000000e+00> : vector<16xf32>
    %183 = vector.multi_reduction <add>, %182, %cst_71 [1] : vector<16x128xf32> to vector<16xf32>
    %184 = vector.shape_cast %183 : vector<16xf32> to vector<16x1xf32>
    %cst_72 = arith.constant 1.280000e+02 : f32
    %185 = vector.broadcast %cst_72 : f32 to vector<16x1xf32>
    %186 = arith.divf %184, %185 : vector<16x1xf32>
    %187 = vector.broadcast %186 : vector<16x1xf32> to vector<16x128xf32>
    %188 = arith.subf %182, %187 : vector<16x128xf32>
    %189 = arith.mulf %188, %188 : vector<16x128xf32>
    %cst_73 = arith.constant dense<0.000000e+00> : vector<16xf32>
    %190 = vector.multi_reduction <add>, %189, %cst_73 [1] : vector<16x128xf32> to vector<16xf32>
    %191 = vector.shape_cast %190 : vector<16xf32> to vector<16x1xf32>
    %cst_74 = arith.constant 1.280000e+02 : f32
    %192 = vector.broadcast %cst_74 : f32 to vector<16x1xf32>
    %193 = arith.divf %191, %192 : vector<16x1xf32>
    %194 = vector.broadcast %186 : vector<16x1xf32> to vector<16x128xf32>
    %195 = arith.subf %182, %194 : vector<16x128xf32>
    %cst_75 = arith.constant 9.99999974E-6 : f32
    %196 = vector.broadcast %cst_75 : f32 to vector<16x1xf32>
    %197 = arith.addf %193, %196 : vector<16x1xf32>
    %198 = math.rsqrt %197 : vector<16x1xf32>
    %199 = vector.broadcast %198 : vector<16x1xf32> to vector<16x128xf32>
    %200 = arith.mulf %195, %199 : vector<16x128xf32>
    %c0_76 = arith.constant 0 : index
    %c0_77 = arith.constant 0 : index
    %201 = vector.load %arg13[%c0_76, %c0_77] : memref<1x128xf32, #tpu.memory_space<vmem>>, vector<1x128xf32>
    %202 = vector.shape_cast %201 : vector<1x128xf32> to vector<128xf32>
    %203 = vector.shape_cast %202 : vector<128xf32> to vector<1x128xf32>
    %204 = vector.broadcast %203 : vector<1x128xf32> to vector<16x128xf32>
    %205 = arith.mulf %200, %204 : vector<16x128xf32>
    %c0_78 = arith.constant 0 : index
    %c0_79 = arith.constant 0 : index
    %206 = vector.load %arg14[%c0_78, %c0_79] : memref<1x128xf32, #tpu.memory_space<vmem>>, vector<1x128xf32>
    %207 = vector.shape_cast %206 : vector<1x128xf32> to vector<128xf32>
    %208 = vector.shape_cast %207 : vector<128xf32> to vector<1x128xf32>
    %209 = vector.broadcast %208 : vector<1x128xf32> to vector<16x128xf32>
    %210 = arith.addf %205, %209 : vector<16x128xf32>
    %c0_80 = arith.constant 0 : index
    %c0_81 = arith.constant 0 : index
    %c0_82 = arith.constant 0 : index
    %211 = vector.load %arg15[%c0_80, %c0_81, %c0_82] : memref<1x16x128xf32, #tpu.memory_space<vmem>>, vector<1x16x128xf32>
    %212 = vector.shape_cast %211 : vector<1x16x128xf32> to vector<16x128xf32>
    %213 = vector.shape_cast %210 : vector<16x128xf32> to vector<1x16x128xf32>
    tpu.vector_store %arg15[%c0_80, %c0_81, %c0_82], %213 {strides = array<i32>} : memref<1x16x128xf32, #tpu.memory_space<vmem>>, vector<1x16x128xf32>,
    return
  }
  func.func @transform_0(%arg0: i32) -> (i32, i32, i32) {
    %c0_i32 = arith.constant 0 : i32
    %c0_i32_0 = arith.constant 0 : i32
    %c0_i32_1 = arith.constant 0 : i32
    return %arg0, %c0_i32, %c0_i32_0 : i32, i32, i32
  }
  func.func @transform_1(%arg0: i32) -> (i32, i32, i32) {
    %c0_i32 = arith.constant 0 : i32
    %c0_i32_0 = arith.constant 0 : i32
    %c0_i32_1 = arith.constant 0 : i32
    return %arg0, %c0_i32, %c0_i32_0 : i32, i32, i32
  }
  func.func @transform_2(%arg0: i32) -> (i32, i32) {
    %c0_i32 = arith.constant 0 : i32
    %c0_i32_0 = arith.constant 0 : i32
    %c0_i32_1 = arith.constant 0 : i32
    return %c0_i32, %c0_i32_0 : i32, i32
  }
  func.func @transform_3(%arg0: i32) -> (i32, i32) {
    %c0_i32 = arith.constant 0 : i32
    %c0_i32_0 = arith.constant 0 : i32
    %c0_i32_1 = arith.constant 0 : i32
    return %c0_i32, %c0_i32_0 : i32, i32
  }
  func.func @transform_4(%arg0: i32) -> (i32, i32) {
    %c0_i32 = arith.constant 0 : i32
    %c0_i32_0 = arith.constant 0 : i32
    %c0_i32_1 = arith.constant 0 : i32
    return %c0_i32, %c0_i32_0 : i32, i32
  }
  func.func @transform_5(%arg0: i32) -> (i32, i32) {
    %c0_i32 = arith.constant 0 : i32
    %c0_i32_0 = arith.constant 0 : i32
    %c0_i32_1 = arith.constant 0 : i32
    return %c0_i32, %c0_i32_0 : i32, i32
  }
  func.func @transform_6(%arg0: i32) -> (i32, i32) {
    %c0_i32 = arith.constant 0 : i32
    %c0_i32_0 = arith.constant 0 : i32
    %c0_i32_1 = arith.constant 0 : i32
    return %c0_i32, %c0_i32_0 : i32, i32
  }
  func.func @transform_7(%arg0: i32) -> (i32, i32) {
    %c0_i32 = arith.constant 0 : i32
    %c0_i32_0 = arith.constant 0 : i32
    %c0_i32_1 = arith.constant 0 : i32
    return %c0_i32, %c0_i32_0 : i32, i32
  }
  func.func @transform_8(%arg0: i32) -> (i32, i32) {
    %c0_i32 = arith.constant 0 : i32
    %c0_i32_0 = arith.constant 0 : i32
    %c0_i32_1 = arith.constant 0 : i32
    return %c0_i32, %c0_i32_0 : i32, i32
  }
  func.func @transform_9(%arg0: i32) -> (i32, i32) {
    %c0_i32 = arith.constant 0 : i32
    %c0_i32_0 = arith.constant 0 : i32
    %c0_i32_1 = arith.constant 0 : i32
    return %c0_i32, %c0_i32_0 : i32, i32
  }
  func.func @transform_10(%arg0: i32) -> (i32, i32) {
    %c0_i32 = arith.constant 0 : i32
    %c0_i32_0 = arith.constant 0 : i32
    %c0_i32_1 = arith.constant 0 : i32
    return %c0_i32, %c0_i32_0 : i32, i32
  }
  func.func @transform_11(%arg0: i32) -> (i32, i32) {
    %c0_i32 = arith.constant 0 : i32
    %c0_i32_0 = arith.constant 0 : i32
    %c0_i32_1 = arith.constant 0 : i32
    return %c0_i32, %c0_i32_0 : i32, i32
  }
  func.func @transform_12(%arg0: i32) -> (i32, i32) {
    %c0_i32 = arith.constant 0 : i32
    %c0_i32_0 = arith.constant 0 : i32
    %c0_i32_1 = arith.constant 0 : i32
    return %c0_i32, %c0_i32_0 : i32, i32
  }
  func.func @transform_13(%arg0: i32) -> (i32, i32) {
    %c0_i32 = arith.constant 0 : i32
    %c0_i32_0 = arith.constant 0 : i32
    %c0_i32_1 = arith.constant 0 : i32
    return %c0_i32, %c0_i32_0 : i32, i32
  }
  func.func @transform_14(%arg0: i32) -> (i32, i32, i32) {
    %c0_i32 = arith.constant 0 : i32
    %c0_i32_0 = arith.constant 0 : i32
    %c0_i32_1 = arith.constant 0 : i32
    return %arg0, %c0_i32, %c0_i32_0 : i32, i32, i32
  }
}

module attributes {stable_mosaic.version = 11 : i64} {
  func.func @transformer_block_kernel(%arg0: i32, %arg1: memref<1x16x128xf32, #tpu.memory_space<vmem>>, %arg2: memref<1x1x16xf32, #tpu.memory_space<vmem>>, %arg3: memref<128x384xbf16, #tpu.memory_space<vmem>>, %arg4: memref<1x384xf32, #tpu.memory_space<vmem>>, %arg5: memref<128x128xbf16, #tpu.memory_space<vmem>>, %arg6: memref<1x128xf32, #tpu.memory_space<vmem>>, %arg7: memref<1x128xf32, #tpu.memory_space<vmem>>, %arg8: memref<1x128xf32, #tpu.memory_space<vmem>>, %arg9: memref<128x512xbf16, #tpu.memory_space<vmem>>, %arg10: memref<1x512xf32, #tpu.memory_space<vmem>>, %arg11: memref<512x128xbf16, #tpu.memory_space<vmem>>, %arg12: memref<1x128xf32, #tpu.memory_space<vmem>>, %arg13: memref<1x128xf32, #tpu.memory_space<vmem>>, %arg14: memref<1x128xf32, #tpu.memory_space<vmem>>, %arg15: memref<1x16x128xf32, #tpu.memory_space<vmem>>, %arg16: memref<16x128xf32, #tpu.memory_space<vmem>>) attributes {dimension_semantics = [#tpu.dimension_semantics<parallel>], iteration_bounds = array<i64: 2>, scalar_prefetch = 0 : i64, scratch_operands = 1 : i64, tpu.core_type = #tpu.core_type<tc>, window_params = [{transform_indices = @transform_0, window_bounds = array<i64: 1, 16, 128>}, {transform_indices = @transform_1, window_bounds = array<i64: 1, 1, 16>}, {pipeline_mode = #tpu.pipeline_mode<synchronous>, transform_indices = @transform_2, window_bounds = array<i64: 128, 384>}, {pipeline_mode = #tpu.pipeline_mode<synchronous>, transform_indices = @transform_3, window_bounds = array<i64: 1, 384>}, {pipeline_mode = #tpu.pipeline_mode<synchronous>, transform_indices = @transform_4, window_bounds = array<i64: 128, 128>}, {pipeline_mode = #tpu.pipeline_mode<synchronous>, transform_indices = @transform_5, window_bounds = array<i64: 1, 128>}, {pipeline_mode = #tpu.pipeline_mode<synchronous>, transform_indices = @transform_6, window_bounds = array<i64: 1, 128>}, {pipeline_mode = #tpu.pipeline_mode<synchronous>, transform_indices = @transform_7, window_bounds = array<i64: 1, 128>}, {pipeline_mode = #tpu.pipeline_mode<synchronous>, transform_indices = @transform_8, window_bounds = array<i64: 128, 512>}, {pipeline_mode = #tpu.pipeline_mode<synchronous>, transform_indices = @transform_9, window_bounds = array<i64: 1, 512>}, {pipeline_mode = #tpu.pipeline_mode<synchronous>, transform_indices = @transform_10, window_bounds = array<i64: 512, 128>}, {pipeline_mode = #tpu.pipeline_mode<synchronous>, transform_indices = @transform_11, window_bounds = array<i64: 1, 128>}, {pipeline_mode = #tpu.pipeline_mode<synchronous>, transform_indices = @transform_12, window_bounds = array<i64: 1, 128>}, {pipeline_mode = #tpu.pipeline_mode<synchronous>, transform_indices = @transform_13, window_bounds = array<i64: 1, 128>}, {transform_indices = @transform_14, window_bounds = array<i64: 1, 16, 128>}]} {
    %c0 = arith.constant 0 : index
    %c0_0 = arith.constant 0 : index
    %c0_1 = arith.constant 0 : index
    %0 = vector.load %arg1[%c0, %c0_0, %c0_1] : memref<1x16x128xf32, #tpu.memory_space<vmem>>, vector<1x16x128xf32>
    %1 = vector.shape_cast %0 : vector<1x16x128xf32> to vector<16x128xf32>
    %c0_2 = arith.constant 0 : index
    %c0_3 = arith.constant 0 : index
    %c0_4 = arith.constant 0 : index
    %2 = vector.load %arg2[%c0_2, %c0_3, %c0_4] : memref<1x1x16xf32, #tpu.memory_space<vmem>>, vector<1x1x16xf32>
    %3 = vector.shape_cast %2 : vector<1x1x16xf32> to vector<1x16xf32>
    %4 = arith.truncf %1 : vector<16x128xf32> to vector<16x128xbf16>
    %c0_5 = arith.constant 0 : index
    %c0_6 = arith.constant 0 : index
    %5 = vector.load %arg3[%c0_5, %c0_6] : memref<128x384xbf16, #tpu.memory_space<vmem>>, vector<128x384xbf16>
    %cst = arith.constant dense<0.000000e+00> : vector<16x384xf32>
    %6 = tpu.matmul %4, %5, %cst {dimension_numbers = #tpu.dot_dimension_numbers<[1], [0], [0], [1], [0, 0, 1, 1], [], []>} : vector<16x128xbf16>, vector<128x384xbf16>, vector<16x384xf32> -> vector<16x384xf32>
    %c0_7 = arith.constant 0 : index
    %c0_8 = arith.constant 0 : index
    %7 = vector.load %arg4[%c0_7, %c0_8] : memref<1x384xf32, #tpu.memory_space<vmem>>, vector<1x384xf32>
    %8 = vector.shape_cast %7 : vector<1x384xf32> to vector<384xf32>
    %9 = vector.shape_cast %8 : vector<384xf32> to vector<1x384xf32>
    %10 = vector.broadcast %9 : vector<1x384xf32> to vector<16x384xf32>
    %11 = arith.addf %6, %10 : vector<16x384xf32>
    %12 = vector.extract_strided_slice %11 {offsets = [0, 0], sizes = [16, 128], strides = [1, 1]} : vector<16x384xf32> to vector<16x128xf32>
    %cst_9 = arith.constant 0.176776692 : f32
    %13 = vector.broadcast %cst_9 : f32 to vector<16x128xf32>
    %14 = arith.mulf %12, %13 : vector<16x128xf32>
    %15 = vector.extract_strided_slice %11 {offsets = [0, 128], sizes = [16, 128], strides = [1, 1]} : vector<16x384xf32> to vector<16x128xf32>
    %16 = vector.extract_strided_slice %11 {offsets = [0, 256], sizes = [16, 128], strides = [1, 1]} : vector<16x384xf32> to vector<16x128xf32>
    %17 = tpu.iota {dimensions = array<i32: 0>} : vector<16x16xi32>
    %18 = tpu.iota {dimensions = array<i32: 1>} : vector<16x16xi32>
    %19 = arith.cmpi sgt, %18, %17 : vector<16x16xi32>
    %cst_10 = arith.constant 5.000000e-01 : f32
    %20 = vector.broadcast %cst_10 : f32 to vector<1x16xf32>
    %21 = arith.cmpf ogt, %3, %20 : vector<1x16xf32>
    %22 = vector.broadcast %21 : vector<1x16xi1> to vector<16x16xi1>
    %23 = arith.ori %19, %22 : vector<16x16xi1>
    %cst_11 = arith.constant -1.000000e+30 : f32
    %cst_12 = arith.constant 0.000000e+00 : f32
    %24 = vector.broadcast %cst_11 : f32 to vector<16x16xf32>
    %25 = vector.broadcast %cst_12 : f32 to vector<16x16xf32>
    %26 = arith.select %23, %24, %25 : vector<16x16xi1>, vector<16x16xf32>
    %cst_13 = arith.constant 5.000000e-01 : f32
    %27 = vector.broadcast %cst_13 : f32 to vector<1x16xf32>
    %28 = arith.cmpf ogt, %3, %27 : vector<1x16xf32>
    %cst_14 = arith.constant 1.000000e+00 : f32
    %cst_15 = arith.constant 0.000000e+00 : f32
    %29 = vector.broadcast %cst_14 : f32 to vector<1x16xf32>
    %30 = vector.broadcast %cst_15 : f32 to vector<1x16xf32>
    %31 = arith.select %28, %29, %30 : vector<1x16xi1>, vector<1x16xf32>
    %32 = vector.shape_cast %31 : vector<1x16xf32> to vector<1x1x16xf32>
    %cst_16 = arith.constant dense<0x7F800000> : vector<1xf32>
    %33 = vector.multi_reduction <minimumf>, %32, %cst_16 [1, 2] : vector<1x1x16xf32> to vector<1xf32>
    %34 = vector.shape_cast %33 : vector<1xf32> to vector<1x1x1xf32>
    %35 = vector.extract %34[0, 0, 0] : f32 from vector<1x1x1xf32>
    %cst_17 = arith.constant 0.000000e+00 : f32
    %36 = arith.cmpf ogt, %35, %cst_17 : f32
    %cst_18 = arith.constant 0.000000e+00 : f32
    %cst_19 = arith.constant 1.000000e+00 : f32
    %37 = arith.select %36, %cst_18, %cst_19 : f32
    %38 = arith.truncf %14 : vector<16x128xf32> to vector<16x128xbf16>
    %39 = arith.truncf %15 : vector<16x128xf32> to vector<16x128xbf16>
    %40 = arith.truncf %16 : vector<16x128xf32> to vector<16x128xbf16>
    %41 = vector.extract_strided_slice %38 {offsets = [0, 0], sizes = [16, 32], strides = [1, 1]} : vector<16x128xbf16> to vector<16x32xbf16>
    %42 = vector.extract_strided_slice %39 {offsets = [0, 0], sizes = [16, 32], strides = [1, 1]} : vector<16x128xbf16> to vector<16x32xbf16>
    %cst_20 = arith.constant dense<0.000000e+00> : vector<16x16xf32>
    %43 = tpu.matmul %41, %42, %cst_20 {dimension_numbers = #tpu.dot_dimension_numbers<[1], [1], [0], [0], [0, 0, 1, 0], [], []>} : vector<16x32xbf16>, vector<16x32xbf16>, vector<16x16xf32> -> vector<16x16xf32>
    %44 = arith.addf %43, %26 : vector<16x16xf32>
    %cst_21 = arith.constant dense<0xFF800000> : vector<16xf32>
    %45 = vector.multi_reduction <maximumf>, %44, %cst_21 [1] : vector<16x16xf32> to vector<16xf32>
    %46 = vector.shape_cast %45 : vector<16xf32> to vector<16x1xf32>
    %47 = vector.broadcast %46 : vector<16x1xf32> to vector<16x16xf32>
    %48 = arith.subf %44, %47 : vector<16x16xf32>
    %49 = math.exp %48 : vector<16x16xf32>
    %cst_22 = arith.constant dense<0.000000e+00> : vector<16xf32>
    %50 = vector.multi_reduction <add>, %49, %cst_22 [1] : vector<16x16xf32> to vector<16xf32>
    %51 = vector.shape_cast %50 : vector<16xf32> to vector<16x1xf32>
    %52 = tpu.reciprocal %51 {approx = true} : vector<16x1xf32> -> vector<16x1xf32>
    %53 = vector.broadcast %52 : vector<16x1xf32> to vector<16x16xf32>
    %54 = arith.mulf %49, %53 : vector<16x16xf32>
    %55 = arith.truncf %54 : vector<16x16xf32> to vector<16x16xbf16>
    %56 = vector.extract_strided_slice %40 {offsets = [0, 0], sizes = [16, 32], strides = [1, 1]} : vector<16x128xbf16> to vector<16x32xbf16>
    %cst_23 = arith.constant dense<0.000000e+00> : vector<16x32xf32>
    %57 = tpu.matmul %55, %56, %cst_23 {dimension_numbers = #tpu.dot_dimension_numbers<[1], [0], [0], [1], [0, 0, 1, 1], [], []>} : vector<16x16xbf16>, vector<16x32xbf16>, vector<16x32xf32> -> vector<16x32xf32>
    %c0_24 = arith.constant 0 : index
    %c0_25 = arith.constant 0 : index
    %58 = vector.load %arg16[%c0_24, %c0_25] : memref<16x128xf32, #tpu.memory_space<vmem>>, vector<16x32xf32>
    tpu.vector_store %arg16[%c0_24, %c0_25], %57 {strides = array<i32>} : memref<16x128xf32, #tpu.memory_space<vmem>>, vector<16x32xf32>,
    %59 = vector.extract_strided_slice %38 {offsets = [0, 32], sizes = [16, 32], strides = [1, 1]} : vector<16x128xbf16> to vector<16x32xbf16>
    %60 = vector.extract_strided_slice %39 {offsets = [0, 32], sizes = [16, 32], strides = [1, 1]} : vector<16x128xbf16> to vector<16x32xbf16>
    %cst_26 = arith.constant dense<0.000000e+00> : vector<16x16xf32>
    %61 = tpu.matmul %59, %60, %cst_26 {dimension_numbers = #tpu.dot_dimension_numbers<[1], [1], [0], [0], [0, 0, 1, 0], [], []>} : vector<16x32xbf16>, vector<16x32xbf16>, vector<16x16xf32> -> vector<16x16xf32>
    %62 = arith.addf %61, %26 : vector<16x16xf32>
    %cst_27 = arith.constant dense<0xFF800000> : vector<16xf32>
    %63 = vector.multi_reduction <maximumf>, %62, %cst_27 [1] : vector<16x16xf32> to vector<16xf32>
    %64 = vector.shape_cast %63 : vector<16xf32> to vector<16x1xf32>
    %65 = vector.broadcast %64 : vector<16x1xf32> to vector<16x16xf32>
    %66 = arith.subf %62, %65 : vector<16x16xf32>
    %67 = math.exp %66 : vector<16x16xf32>
    %cst_28 = arith.constant dense<0.000000e+00> : vector<16xf32>
    %68 = vector.multi_reduction <add>, %67, %cst_28 [1] : vector<16x16xf32> to vector<16xf32>
    %69 = vector.shape_cast %68 : vector<16xf32> to vector<16x1xf32>
    %70 = tpu.reciprocal %69 {approx = true} : vector<16x1xf32> -> vector<16x1xf32>
    %71 = vector.broadcast %70 : vector<16x1xf32> to vector<16x16xf32>
    %72 = arith.mulf %67, %71 : vector<16x16xf32>
    %73 = arith.truncf %72 : vector<16x16xf32> to vector<16x16xbf16>
    %74 = vector.extract_strided_slice %40 {offsets = [0, 32], sizes = [16, 32], strides = [1, 1]} : vector<16x128xbf16> to vector<16x32xbf16>
    %cst_29 = arith.constant dense<0.000000e+00> : vector<16x32xf32>
    %75 = tpu.matmul %73, %74, %cst_29 {dimension_numbers = #tpu.dot_dimension_numbers<[1], [0], [0], [1], [0, 0, 1, 1], [], []>} : vector<16x16xbf16>, vector<16x32xbf16>, vector<16x32xf32> -> vector<16x32xf32>
    %c0_30 = arith.constant 0 : index
    %c32 = arith.constant 32 : index
    %76 = vector.load %arg16[%c0_30, %c32] : memref<16x128xf32, #tpu.memory_space<vmem>>, vector<16x32xf32>
    tpu.vector_store %arg16[%c0_30, %c32], %75 {strides = array<i32>} : memref<16x128xf32, #tpu.memory_space<vmem>>, vector<16x32xf32>,
    %77 = vector.extract_strided_slice %38 {offsets = [0, 64], sizes = [16, 32], strides = [1, 1]} : vector<16x128xbf16> to vector<16x32xbf16>
    %78 = vector.extract_strided_slice %39 {offsets = [0, 64], sizes = [16, 32], strides = [1, 1]} : vector<16x128xbf16> to vector<16x32xbf16>
    %cst_31 = arith.constant dense<0.000000e+00> : vector<16x16xf32>
    %79 = tpu.matmul %77, %78, %cst_31 {dimension_numbers = #tpu.dot_dimension_numbers<[1], [1], [0], [0], [0, 0, 1, 0], [], []>} : vector<16x32xbf16>, vector<16x32xbf16>, vector<16x16xf32> -> vector<16x16xf32>
    %80 = arith.addf %79, %26 : vector<16x16xf32>
    %cst_32 = arith.constant dense<0xFF800000> : vector<16xf32>
    %81 = vector.multi_reduction <maximumf>, %80, %cst_32 [1] : vector<16x16xf32> to vector<16xf32>
    %82 = vector.shape_cast %81 : vector<16xf32> to vector<16x1xf32>
    %83 = vector.broadcast %82 : vector<16x1xf32> to vector<16x16xf32>
    %84 = arith.subf %80, %83 : vector<16x16xf32>
    %85 = math.exp %84 : vector<16x16xf32>
    %cst_33 = arith.constant dense<0.000000e+00> : vector<16xf32>
    %86 = vector.multi_reduction <add>, %85, %cst_33 [1] : vector<16x16xf32> to vector<16xf32>
    %87 = vector.shape_cast %86 : vector<16xf32> to vector<16x1xf32>
    %88 = tpu.reciprocal %87 {approx = true} : vector<16x1xf32> -> vector<16x1xf32>
    %89 = vector.broadcast %88 : vector<16x1xf32> to vector<16x16xf32>
    %90 = arith.mulf %85, %89 : vector<16x16xf32>
    %91 = arith.truncf %90 : vector<16x16xf32> to vector<16x16xbf16>
    %92 = vector.extract_strided_slice %40 {offsets = [0, 64], sizes = [16, 32], strides = [1, 1]} : vector<16x128xbf16> to vector<16x32xbf16>
    %cst_34 = arith.constant dense<0.000000e+00> : vector<16x32xf32>
    %93 = tpu.matmul %91, %92, %cst_34 {dimension_numbers = #tpu.dot_dimension_numbers<[1], [0], [0], [1], [0, 0, 1, 1], [], []>} : vector<16x16xbf16>, vector<16x32xbf16>, vector<16x32xf32> -> vector<16x32xf32>
    %c0_35 = arith.constant 0 : index
    %c64 = arith.constant 64 : index
    %94 = vector.load %arg16[%c0_35, %c64] : memref<16x128xf32, #tpu.memory_space<vmem>>, vector<16x32xf32>
    tpu.vector_store %arg16[%c0_35, %c64], %93 {strides = array<i32>} : memref<16x128xf32, #tpu.memory_space<vmem>>, vector<16x32xf32>,
    %95 = vector.extract_strided_slice %38 {offsets = [0, 96], sizes = [16, 32], strides = [1, 1]} : vector<16x128xbf16> to vector<16x32xbf16>
    %96 = vector.extract_strided_slice %39 {offsets = [0, 96], sizes = [16, 32], strides = [1, 1]} : vector<16x128xbf16> to vector<16x32xbf16>
    %cst_36 = arith.constant dense<0.000000e+00> : vector<16x16xf32>
    %97 = tpu.matmul %95, %96, %cst_36 {dimension_numbers = #tpu.dot_dimension_numbers<[1], [1], [0], [0], [0, 0, 1, 0], [], []>} : vector<16x32xbf16>, vector<16x32xbf16>, vector<16x16xf32> -> vector<16x16xf32>
    %98 = arith.addf %97, %26 : vector<16x16xf32>
    %cst_37 = arith.constant dense<0xFF800000> : vector<16xf32>
    %99 = vector.multi_reduction <maximumf>, %98, %cst_37 [1] : vector<16x16xf32> to vector<16xf32>
    %100 = vector.shape_cast %99 : vector<16xf32> to vector<16x1xf32>
    %101 = vector.broadcast %100 : vector<16x1xf32> to vector<16x16xf32>
    %102 = arith.subf %98, %101 : vector<16x16xf32>
    %103 = math.exp %102 : vector<16x16xf32>
    %cst_38 = arith.constant dense<0.000000e+00> : vector<16xf32>
    %104 = vector.multi_reduction <add>, %103, %cst_38 [1] : vector<16x16xf32> to vector<16xf32>
    %105 = vector.shape_cast %104 : vector<16xf32> to vector<16x1xf32>
    %106 = tpu.reciprocal %105 {approx = true} : vector<16x1xf32> -> vector<16x1xf32>
    %107 = vector.broadcast %106 : vector<16x1xf32> to vector<16x16xf32>
    %108 = arith.mulf %103, %107 : vector<16x16xf32>
    %109 = arith.truncf %108 : vector<16x16xf32> to vector<16x16xbf16>
    %110 = vector.extract_strided_slice %40 {offsets = [0, 96], sizes = [16, 32], strides = [1, 1]} : vector<16x128xbf16> to vector<16x32xbf16>
    %cst_39 = arith.constant dense<0.000000e+00> : vector<16x32xf32>
    %111 = tpu.matmul %109, %110, %cst_39 {dimension_numbers = #tpu.dot_dimension_numbers<[1], [0], [0], [1], [0, 0, 1, 1], [], []>} : vector<16x16xbf16>, vector<16x32xbf16>, vector<16x32xf32> -> vector<16x32xf32>
    %c0_40 = arith.constant 0 : index
    %c96 = arith.constant 96 : index
    %112 = vector.load %arg16[%c0_40, %c96] : memref<16x128xf32, #tpu.memory_space<vmem>>, vector<16x32xf32>
    tpu.vector_store %arg16[%c0_40, %c96], %111 {strides = array<i32>} : memref<16x128xf32, #tpu.memory_space<vmem>>, vector<16x32xf32>,
    %c0_41 = arith.constant 0 : index
    %c0_42 = arith.constant 0 : index
    %113 = vector.load %arg16[%c0_41, %c0_42] : memref<16x128xf32, #tpu.memory_space<vmem>>, vector<16x128xf32>
    %114 = vector.broadcast %37 : f32 to vector<16x128xf32>
    %115 = arith.mulf %113, %114 : vector<16x128xf32>
    %116 = arith.truncf %115 : vector<16x128xf32> to vector<16x128xbf16>
    %c0_43 = arith.constant 0 : index
    %c0_44 = arith.constant 0 : index
    %117 = vector.load %arg5[%c0_43, %c0_44] : memref<128x128xbf16, #tpu.memory_space<vmem>>, vector<128x128xbf16>
    %cst_45 = arith.constant dense<0.000000e+00> : vector<16x128xf32>
    %118 = tpu.matmul %116, %117, %cst_45 {dimension_numbers = #tpu.dot_dimension_numbers<[1], [0], [0], [1], [0, 0, 1, 1], [], []>} : vector<16x128xbf16>, vector<128x128xbf16>, vector<16x128xf32> -> vector<16x128xf32>
    %c0_46 = arith.constant 0 : index
    %c0_47 = arith.constant 0 : index
    %119 = vector.load %arg6[%c0_46, %c0_47] : memref<1x128xf32, #tpu.memory_space<vmem>>, vector<1x128xf32>
    %120 = vector.shape_cast %119 : vector<1x128xf32> to vector<128xf32>
    %121 = vector.shape_cast %120 : vector<128xf32> to vector<1x128xf32>
    %122 = vector.broadcast %121 : vector<1x128xf32> to vector<16x128xf32>
    %123 = arith.addf %118, %122 : vector<16x128xf32>
    %124 = arith.addf %1, %123 : vector<16x128xf32>
    %cst_48 = arith.constant dense<0.000000e+00> : vector<16xf32>
    %125 = vector.multi_reduction <add>, %124, %cst_48 [1] : vector<16x128xf32> to vector<16xf32>
    %126 = vector.shape_cast %125 : vector<16xf32> to vector<16x1xf32>
    %cst_49 = arith.constant 1.280000e+02 : f32
    %127 = vector.broadcast %cst_49 : f32 to vector<16x1xf32>
    %128 = arith.divf %126, %127 : vector<16x1xf32>
    %129 = vector.broadcast %128 : vector<16x1xf32> to vector<16x128xf32>
    %130 = arith.subf %124, %129 : vector<16x128xf32>
    %131 = arith.mulf %130, %130 : vector<16x128xf32>
    %cst_50 = arith.constant dense<0.000000e+00> : vector<16xf32>
    %132 = vector.multi_reduction <add>, %131, %cst_50 [1] : vector<16x128xf32> to vector<16xf32>
    %133 = vector.shape_cast %132 : vector<16xf32> to vector<16x1xf32>
    %cst_51 = arith.constant 1.280000e+02 : f32
    %134 = vector.broadcast %cst_51 : f32 to vector<16x1xf32>
    %135 = arith.divf %133, %134 : vector<16x1xf32>
    %136 = vector.broadcast %128 : vector<16x1xf32> to vector<16x128xf32>
    %137 = arith.subf %124, %136 : vector<16x128xf32>
    %cst_52 = arith.constant 9.99999974E-6 : f32
    %138 = vector.broadcast %cst_52 : f32 to vector<16x1xf32>
    %139 = arith.addf %135, %138 : vector<16x1xf32>
    %140 = math.rsqrt %139 : vector<16x1xf32>
    %141 = vector.broadcast %140 : vector<16x1xf32> to vector<16x128xf32>
    %142 = arith.mulf %137, %141 : vector<16x128xf32>
    %c0_53 = arith.constant 0 : index
    %c0_54 = arith.constant 0 : index
    %143 = vector.load %arg7[%c0_53, %c0_54] : memref<1x128xf32, #tpu.memory_space<vmem>>, vector<1x128xf32>
    %144 = vector.shape_cast %143 : vector<1x128xf32> to vector<128xf32>
    %145 = vector.shape_cast %144 : vector<128xf32> to vector<1x128xf32>
    %146 = vector.broadcast %145 : vector<1x128xf32> to vector<16x128xf32>
    %147 = arith.mulf %142, %146 : vector<16x128xf32>
    %c0_55 = arith.constant 0 : index
    %c0_56 = arith.constant 0 : index
    %148 = vector.load %arg8[%c0_55, %c0_56] : memref<1x128xf32, #tpu.memory_space<vmem>>, vector<1x128xf32>
    %149 = vector.shape_cast %148 : vector<1x128xf32> to vector<128xf32>
    %150 = vector.shape_cast %149 : vector<128xf32> to vector<1x128xf32>
    %151 = vector.broadcast %150 : vector<1x128xf32> to vector<16x128xf32>
    %152 = arith.addf %147, %151 : vector<16x128xf32>
    %153 = arith.truncf %152 : vector<16x128xf32> to vector<16x128xbf16>
    %c0_57 = arith.constant 0 : index
    %c0_58 = arith.constant 0 : index
    %154 = vector.load %arg9[%c0_57, %c0_58] : memref<128x512xbf16, #tpu.memory_space<vmem>>, vector<128x512xbf16>
    %cst_59 = arith.constant dense<0.000000e+00> : vector<16x512xf32>
    %155 = tpu.matmul %153, %154, %cst_59 {dimension_numbers = #tpu.dot_dimension_numbers<[1], [0], [0], [1], [0, 0, 1, 1], [], []>} : vector<16x128xbf16>, vector<128x512xbf16>, vector<16x512xf32> -> vector<16x512xf32>
    %c0_60 = arith.constant 0 : index
    %c0_61 = arith.constant 0 : index
    %156 = vector.load %arg10[%c0_60, %c0_61] : memref<1x512xf32, #tpu.memory_space<vmem>>, vector<1x512xf32>
    %157 = vector.shape_cast %156 : vector<1x512xf32> to vector<512xf32>
    %158 = vector.shape_cast %157 : vector<512xf32> to vector<1x512xf32>
    %159 = vector.broadcast %158 : vector<1x512xf32> to vector<16x512xf32>
    %160 = arith.addf %155, %159 : vector<16x512xf32>
    %cst_62 = arith.constant 5.000000e-01 : f32
    %161 = vector.broadcast %cst_62 : f32 to vector<16x512xf32>
    %162 = arith.mulf %161, %160 : vector<16x512xf32>
    %cst_63 = arith.constant 4.471500e-02 : f32
    %163 = vector.broadcast %cst_63 : f32 to vector<16x512xf32>
    %164 = arith.mulf %163, %160 : vector<16x512xf32>
    %165 = arith.mulf %164, %160 : vector<16x512xf32>
    %166 = arith.mulf %165, %160 : vector<16x512xf32>
    %167 = arith.addf %160, %166 : vector<16x512xf32>
    %cst_64 = arith.constant 0.797884583 : f32
    %168 = vector.broadcast %cst_64 : f32 to vector<16x512xf32>
    %169 = arith.mulf %168, %167 : vector<16x512xf32>
    %170 = math.tanh %169 : vector<16x512xf32>
    %cst_65 = arith.constant 1.000000e+00 : f32
    %171 = vector.broadcast %cst_65 : f32 to vector<16x512xf32>
    %172 = arith.addf %171, %170 : vector<16x512xf32>
    %173 = arith.mulf %162, %172 : vector<16x512xf32>
    %174 = arith.truncf %173 : vector<16x512xf32> to vector<16x512xbf16>
    %c0_66 = arith.constant 0 : index
    %c0_67 = arith.constant 0 : index
    %175 = vector.load %arg11[%c0_66, %c0_67] : memref<512x128xbf16, #tpu.memory_space<vmem>>, vector<512x128xbf16>
    %cst_68 = arith.constant dense<0.000000e+00> : vector<16x128xf32>
    %176 = tpu.matmul %174, %175, %cst_68 {dimension_numbers = #tpu.dot_dimension_numbers<[1], [0], [0], [1], [0, 0, 1, 1], [], []>} : vector<16x512xbf16>, vector<512x128xbf16>, vector<16x128xf32> -> vector<16x128xf32>
    %c0_69 = arith.constant 0 : index
    %c0_70 = arith.constant 0 : index
    %177 = vector.load %arg12[%c0_69, %c0_70] : memref<1x128xf32, #tpu.memory_space<vmem>>, vector<1x128xf32>
    %178 = vector.shape_cast %177 : vector<1x128xf32> to vector<128xf32>
    %179 = vector.shape_cast %178 : vector<128xf32> to vector<1x128xf32>
    %180 = vector.broadcast %179 : vector<1x128xf32> to vector<16x128xf32>
    %181 = arith.addf %176, %180 : vector<16x128xf32>
    %182 = arith.addf %152, %181 : vector<16x128xf32>
    %cst_71 = arith.constant dense<0.000000e+00> : vector<16xf32>
    %183 = vector.multi_reduction <add>, %182, %cst_71 [1] : vector<16x128xf32> to vector<16xf32>
    %184 = vector.shape_cast %183 : vector<16xf32> to vector<16x1xf32>
    %cst_72 = arith.constant 1.280000e+02 : f32
    %185 = vector.broadcast %cst_72 : f32 to vector<16x1xf32>
    %186 = arith.divf %184, %185 : vector<16x1xf32>
    %187 = vector.broadcast %186 : vector<16x1xf32> to vector<16x128xf32>
    %188 = arith.subf %182, %187 : vector<16x128xf32>
    %189 = arith.mulf %188, %188 : vector<16x128xf32>
    %cst_73 = arith.constant dense<0.000000e+00> : vector<16xf32>
    %190 = vector.multi_reduction <add>, %189, %cst_73 [1] : vector<16x128xf32> to vector<16xf32>
    %191 = vector.shape_cast %190 : vector<16xf32> to vector<16x1xf32>
    %cst_74 = arith.constant 1.280000e+02 : f32
    %192 = vector.broadcast %cst_74 : f32 to vector<16x1xf32>
    %193 = arith.divf %191, %192 : vector<16x1xf32>
    %194 = vector.broadcast %186 : vector<16x1xf32> to vector<16x128xf32>
    %195 = arith.subf %182, %194 : vector<16x128xf32>
    %cst_75 = arith.constant 9.99999974E-6 : f32
    %196 = vector.broadcast %cst_75 : f32 to vector<16x1xf32>
    %197 = arith.addf %193, %196 : vector<16x1xf32>
    %198 = math.rsqrt %197 : vector<16x1xf32>
    %199 = vector.broadcast %198 : vector<16x1xf32> to vector<16x128xf32>
    %200 = arith.mulf %195, %199 : vector<16x128xf32>
    %c0_76 = arith.constant 0 : index
    %c0_77 = arith.constant 0 : index
    %201 = vector.load %arg13[%c0_76, %c0_77] : memref<1x128xf32, #tpu.memory_space<vmem>>, vector<1x128xf32>
    %202 = vector.shape_cast %201 : vector<1x128xf32> to vector<128xf32>
    %203 = vector.shape_cast %202 : vector<128xf32> to vector<1x128xf32>
    %204 = vector.broadcast %203 : vector<1x128xf32> to vector<16x128xf32>
    %205 = arith.mulf %200, %204 : vector<16x128xf32>
    %c0_78 = arith.constant 0 : index
    %c0_79 = arith.constant 0 : index
    %206 = vector.load %arg14[%c0_78, %c0_79] : memref<1x128xf32, #tpu.memory_space<vmem>>, vector<1x128xf32>
    %207 = vector.shape_cast %206 : vector<1x128xf32> to vector<128xf32>
    %208 = vector.shape_cast %207 : vector<128xf32> to vector<1x128xf32>
    %209 = vector.broadcast %208 : vector<1x128xf32> to vector<16x128xf32>
    %210 = arith.addf %205, %209 : vector<16x128xf32>
    %c0_80 = arith.constant 0 : index
    %c0_81 = arith.constant 0 : index
    %c0_82 = arith.constant 0 : index
    %211 = vector.load %arg15[%c0_80, %c0_81, %c0_82] : memref<1x16x128xf32, #tpu.memory_space<vmem>>, vector<1x16x128xf32>
    %212 = vector.shape_cast %211 : vector<1x16x128xf32> to vector<16x128xf32>
    %213 = vector.shape_cast %210 : vector<16x128xf32> to vector<1x16x128xf32>
    tpu.vector_store %arg15[%c0_80, %c0_81, %c0_82], %213 {strides = array<i32>} : memref<1x16x128xf32, #tpu.memory_space<vmem>>, vector<1x16x128xf32>,
    return
  }
  func.func @transform_0(%arg0: i32) -> (i32, i32, i32) {
    %c0_i32 = arith.constant 0 : i32
    %c0_i32_0 = arith.constant 0 : i32
    %c0_i32_1 = arith.constant 0 : i32
    return %arg0, %c0_i32, %c0_i32_0 : i32, i32, i32
  }
  func.func @transform_1(%arg0: i32) -> (i32, i32, i32) {
    %c0_i32 = arith.constant 0 : i32
    %c0_i32_0 = arith.constant 0 : i32
    %c0_i32_1 = arith.constant 0 : i32
    return %arg0, %c0_i32, %c0_i32_0 : i32, i32, i32
  }
  func.func @transform_2(%arg0: i32) -> (i32, i32) {
    %c0_i32 = arith.constant 0 : i32
    %c0_i32_0 = arith.constant 0 : i32
    %c0_i32_1 = arith.constant 0 : i32
    return %c0_i32, %c0_i32_0 : i32, i32
  }
  func.func @transform_3(%arg0: i32) -> (i32, i32) {
    %c0_i32 = arith.constant 0 : i32
    %c0_i32_0 = arith.constant 0 : i32
    %c0_i32_1 = arith.constant 0 : i32
    return %c0_i32, %c0_i32_0 : i32, i32
  }
  func.func @transform_4(%arg0: i32) -> (i32, i32) {
    %c0_i32 = arith.constant 0 : i32
    %c0_i32_0 = arith.constant 0 : i32
    %c0_i32_1 = arith.constant 0 : i32
    return %c0_i32, %c0_i32_0 : i32, i32
  }
  func.func @transform_5(%arg0: i32) -> (i32, i32) {
    %c0_i32 = arith.constant 0 : i32
    %c0_i32_0 = arith.constant 0 : i32
    %c0_i32_1 = arith.constant 0 : i32
    return %c0_i32, %c0_i32_0 : i32, i32
  }
  func.func @transform_6(%arg0: i32) -> (i32, i32) {
    %c0_i32 = arith.constant 0 : i32
    %c0_i32_0 = arith.constant 0 : i32
    %c0_i32_1 = arith.constant 0 : i32
    return %c0_i32, %c0_i32_0 : i32, i32
  }
  func.func @transform_7(%arg0: i32) -> (i32, i32) {
    %c0_i32 = arith.constant 0 : i32
    %c0_i32_0 = arith.constant 0 : i32
    %c0_i32_1 = arith.constant 0 : i32
    return %c0_i32, %c0_i32_0 : i32, i32
  }
  func.func @transform_8(%arg0: i32) -> (i32, i32) {
    %c0_i32 = arith.constant 0 : i32
    %c0_i32_0 = arith.constant 0 : i32
    %c0_i32_1 = arith.constant 0 : i32
    return %c0_i32, %c0_i32_0 : i32, i32
  }
  func.func @transform_9(%arg0: i32) -> (i32, i32) {
    %c0_i32 = arith.constant 0 : i32
    %c0_i32_0 = arith.constant 0 : i32
    %c0_i32_1 = arith.constant 0 : i32
    return %c0_i32, %c0_i32_0 : i32, i32
  }
  func.func @transform_10(%arg0: i32) -> (i32, i32) {
    %c0_i32 = arith.constant 0 : i32
    %c0_i32_0 = arith.constant 0 : i32
    %c0_i32_1 = arith.constant 0 : i32
    return %c0_i32, %c0_i32_0 : i32, i32
  }
  func.func @transform_11(%arg0: i32) -> (i32, i32) {
    %c0_i32 = arith.constant 0 : i32
    %c0_i32_0 = arith.constant 0 : i32
    %c0_i32_1 = arith.constant 0 : i32
    return %c0_i32, %c0_i32_0 : i32, i32
  }
  func.func @transform_12(%arg0: i32) -> (i32, i32) {
    %c0_i32 = arith.constant 0 : i32
    %c0_i32_0 = arith.constant 0 : i32
    %c0_i32_1 = arith.constant 0 : i32
    return %c0_i32, %c0_i32_0 : i32, i32
  }
  func.func @transform_13(%arg0: i32) -> (i32, i32) {
    %c0_i32 = arith.constant 0 : i32
    %c0_i32_0 = arith.constant 0 : i32
    %c0_i32_1 = arith.constant 0 : i32
    return %c0_i32, %c0_i32_0 : i32, i32
  }
  func.func @transform_14(%arg0: i32) -> (i32, i32, i32) {
    %c0_i32 = arith.constant 0 : i32
    %c0_i32_0 = arith.constant 0 : i32
    %c0_i32_1 = arith.constant 0 : i32
    return %arg0, %c0_i32, %c0_i32_0 : i32, i32, i32
  }
}

</mosaic_0001>

<bundles_post_ra>
// kernel: tpu_custom_call.1
= control target key start
LH: loop header
LB: loop body
LE: loop exit
PB: predicated region body
PF: predicated region fallthrough
CT: control target
= control target key end

     0   :  { %s3658_s0 = inlined_call_operand.hbm [shape: f32[2,16,128], index: 0, kind: input, shape index: {}]   ;;  %s3659_s1 = inlined_call_operand.hbm [shape: f32[2,1,16], index: 1, kind: input, shape index: {}]   ;;  %s3660_s2 = inlined_call_operand.hbm [shape: bf16[128,384], index: 2, kind: input, shape index: {}]   ;;  %s3661_s3 = inlined_call_operand.hbm [shape: f32[1,384], index: 3, kind: input, shape index: {}]   ;;  %s3662_s4 = inlined_call_operand.hbm [shape: bf16[128,128], index: 4, kind: input, shape index: {}]   ;;  %s3663_s5 = inlined_call_operand.vmem [shape: f32[1,128], index: 5, kind: input, shape index: {}]   ;;  %s3664_s6 = inlined_call_operand.vmem [shape: f32[1,128], index: 6, kind: input, shape index: {}]   ;;  %s3665_s7 = inlined_call_operand.vmem [shape: f32[1,128], index: 7, kind: input, shape index: {}]   ;;  %s3666_s8 = inlined_call_operand.hbm [shape: bf16[128,512], index: 8, kind: input, shape index: {}]   ;;  %s3667_s9 = inlined_call_operand.vmem [shape: f32[1,512], index: 9, kind: input, shape index: {}]   ;;  %s3668_s10 = inlined_call_operand.hbm [shape: bf16[512,128], index: 10, kind: input, shape index: {}]   ;;  %s3669_s11 = inlined_call_operand.vmem [shape: f32[1,128], index: 11, kind: input, shape index: {}]   ;;  %s3670_s12 = inlined_call_operand.vmem [shape: f32[1,128], index: 12, kind: input, shape index: {}]   ;;  %s3671_s13 = inlined_call_operand.vmem [shape: f32[1,128], index: 13, kind: input, shape index: {}]   ;;  %s3672_s14 = inlined_call_operand.hbm [shape: f32[2,16,128], index: 14, kind: output, shape index: {}]  }
   0x1   :  { %3679 = sst [smem:[#allocation27_spill]] %s3660_s2 }
   0x2   :  { %3680 = sst [smem:[#allocation28_spill]] %s3661_s3 }
   0x3   :  { %3681 = sst [smem:[#allocation29_spill]] %s3662_s4 }
   0x4   :  { %3682 = sst [smem:[#allocation30_spill]] %s3666_s8 }
   0x5   :  { %3683 = sst [smem:[#allocation31_spill]] %s3668_s10 }
   0x6   :  { %3684 = sst [smem:[#allocation32_spill]] %s3670_s12 }
   0x7   :  { %3685 = sst [smem:[#allocation33_spill]] %s3671_s13 }
   0x8   :  { %3686 = sst [smem:[#allocation34_spill]] %s3672_s14 }
   0x9   :  { %19 = vsyncpa [#allocation4], 0 }
   0xa   :  { %21 = vsyncpa [#allocation4 + $0x1], 0 }
   0xb   :  { %22 = vsyncpa [#allocation7], 0 }
   0xc   :  { %24 = vsyncpa [#allocation7 + $0x1], 0 }
   0xd   :  { %25 = vsyncpa [#allocation10], 0 }
   0xe   :  { %26 = vsyncpa [#allocation13], 0 }
   0xf   :  { %27 = vsyncpa [#allocation5], 0 }
  0x10   :  { %29 = vsyncpa [#allocation5 + $0x1], 0  ;;  %s3268_s29 = smov 0   ;;  %s3270_s30 = smov 0  }
  0x11   :  { %s3272_s15 = smov 0   ;;  %s3274_s16 = smov 0  }
  0x12 LB: > { %3687 = sst [smem:[#allocation22_spill]] %s3158_s29  ;;  %s3292_s20 = sadd.s32 4294967295, %s3170_s16   ;;  %s3170_s16 = sphi %s3274_s16, %s3710_s16   ;;  %s3166_s15 = sphi %s3272_s15, %s3712_s15   ;;  %s3162_s30 = sphi %s3270_s30, %s3714_s30   ;;  %s3158_s29 = sphi %s3268_s29, %s3713_s29  }
  0x13   : > { %3688 = sst [smem:[#allocation23_spill]] %s3166_s15  ;;  %p2181_p0 = scmp.ge.s32.totalorder %s3170_s16, 1 }
  0x14   : > { %s3689_s2 = sld [smem:[#allocation27_spill]]  ;;  %p56_p1 = scmp.eq.s32.totalorder %s3292_s20, 0 }
  0x15   : > { %p370_p2 = scmp.lt.s32.totalorder %s3170_s16, 3  ;;  %s3172_s22 = smov [#allocation8]  }
  0x16   : > { %s383_s23 = sshll.u32 %s3172_s22, 4  ;;  %s3691_s3 = sld [smem:[#allocation28_spill]]  ;;  %s384_s23 = int_to_ptr.vmem [resolvable:$true] %s383_s23 }
  0x17   : > { %p3297_p3 = pnand %p2181_p0, %p370_p2  ;;  %s3693_s8 = sld [smem:[#allocation30_spill]] }
  0x18   : > { %s3173_s22 = smov [#allocation9]   ;;  %s3174_s14 = smov 192  }
  0x19   : > { %p2722_p4 = pneg %p3297_p3  ;;  %s3175_s13 = smov 12  }
  0x1a   : > { %s381_s19 = sshll.u32 %s3689_s2, 4  ;;  %s398_s2 = sshll.u32 %s3173_s22, 4  ;;  %s382_s19 = int_to_ptr.hbm [resolvable:$true] %s381_s19  ;;  %s399_s2 = int_to_ptr.vmem [resolvable:$true] %s398_s2 }
  0x1b   : > { %p3309_p6 = pnand %p2722_p4, %p56_p1  ;;  %s3176_s24 = smov [#allocation12]  }
  0x1c   : > { %s396_s26 = sshll.u32 %s3691_s3, 4  ;;  %s432_s25 = sshll.u32 %s3176_s24, 4  ;;  %s397_s26 = int_to_ptr.hbm [resolvable:$true] %s396_s26  ;;  %s433_s25 = int_to_ptr.vmem [resolvable:$true] %s432_s25 }
  0x1d   : > { %s430_s18 = sshll.u32 %s3693_s8, 4  ;;  %s3694_s4 = sld [smem:[#allocation29_spill]]  ;;  %s431_s18 = int_to_ptr.hbm [resolvable:$true] %s430_s18 }
  0x1e   : > { %2725 = dma.hbm_to_vmem [thread:$0]  (!%p3309_p6), %s382_s19, 3072, %s384_s23, [#allocation7], %s3174_s14, %s3174_s14, %s3175_s13  }
  0x1f   : > { %2728 = dma.hbm_to_vmem [thread:$0]  (!%p3309_p6), %s397_s26, 48, %s399_s2, [#allocation10]  }
  0x20   : > { %s3177_s17 = smov 256   ;;  %s3178_s22 = smov 16  }
  0x21   : > { %2734 = dma.hbm_to_vmem [thread:$0]  (!%p3309_p6), %s431_s18, 4096, %s433_s25, [#allocation13], %s3177_s17, %s3177_s17, %s3178_s22  }
  0x22   : > { %s3179_s13 = smov [#allocation11]   ;;  %s3180_s14 = smov 64  }
  0x23   : > { %s407_s28 = sshll.u32 %s3694_s4, 4  ;;  %s409_s2 = sshll.u32 %s3179_s13, 4  ;;  %s408_s28 = int_to_ptr.hbm [resolvable:$true] %s407_s28  ;;  %s410_s2 = int_to_ptr.vmem [resolvable:$true] %s409_s2 }
  0x24   : > { %s3181_s3 = smov 4   ;;  %s3695_s10 = sld [smem:[#allocation31_spill]] }
  0x25   : > { %2731 = dma.hbm_to_vmem [thread:$0]  (!%p3309_p6), %s408_s28, 1024, %s410_s2, [#allocation10], %s3180_s14, %s3180_s14, %s3181_s3  }
  0x26   : > { %s3182_s26 = smov [#allocation14]   ;;  %s2180_s24 = sadd.s32 4294967294, %s3170_s16  }
  0x27   : > { %s449_s18 = sshll.u32 %s3182_s26, 4  ;;  %s3334_s25 = sadd.s32 1, %s3170_s16   ;;  %s450_s18 = int_to_ptr.vmem [resolvable:$true] %s449_s18 }
  0x28   : > { %3696 = sst [smem:[#allocation24_spill]] %s3334_s25  ;;  %s42_s17 = sadd.s32 1, %s3166_s15 }
  0x29   : > { %s39_s28 = ssub.s32 %s3170_s16, %s3334_s25  ;;  %p49_p7 = scmp.ne.s32.totalorder %s3166_s15, %s3162_s30 }
  0x2a   : > { %s447_s23 = sshll.u32 %s3695_s10, 4  ;;  %p40_p8 = scmp.eq.s32.totalorder %s39_s28, 0  ;;  %s448_s23 = int_to_ptr.hbm [resolvable:$true] %s447_s23 }
  0x2b   : > { %2737 = dma.hbm_to_vmem [thread:$0]  (!%p3309_p6), %s448_s23, 4096, %s450_s18, [#allocation13], %s3180_s14, %s3180_s14, %s3181_s3  }
  0x2c   : > { %p50_p9 = scmp.eq.s32.totalorder %s3170_s16, 0  ;;  %p55_p10 = scmp.ne.s32.totalorder %s3162_s30, %s3158_s29 }
  0x2d   : > { %p357_p11 = scmp.eq.s32.totalorder %s3292_s20, 1  ;;  %p363_p2 = scmp.eq.s32.totalorder %s2180_s24, 1 }
  0x2e   : > { %s3346_s22 = scalar_select %p40_p8, %s3166_s15, %s42_s17  }
  0x2f   : > { %p3348_p12 = por %p50_p9, %p49_p7  ;;  %p3354_p13 = por %p56_p1, %p55_p10 }
  0x30   : > { %3697 = sst [smem:[#allocation25_spill]] %s3346_s22  ;;  %p3358_p0 = por %p357_p11, %p49_p7 }
  0x31   : > { %p2754_p4 = scmp.lt.s32.totalorder %s3170_s16, 2  ;;  %s3364_s14 = sand.u32 1, %s3166_s15  }
  0x32   : > { %p3366_p6 = por %p363_p2, %p55_p10  ;;  %s2188_s12 = sshll.u32 %s3364_s14, 4 }
  0x33   : > { %s2596_s19 = sshll.u32 %s3170_s16, 4  ;;  %s476_s28 = scalar_lea.vmem [#allocation3], %s2188_s12 }
  0x34   : > { %s3701_s3 = scalar_select %p3366_p6, 1, 0 }
  0x35   : > { %s481_s18 = scalar_lea.hbm %s3658_s0, %s2596_s19  ;;  %s484_s4 = sshll.u32 %s476_s28, 4  ;;  %s485_s4 = int_to_ptr.vmem [resolvable:$true] %s484_s4 }
  0x36   : > { %3702 = sst [smem:[#allocation26_spill]] %s3701_s3  ;;  %s482_s17 = sshll.u32 %s481_s18, 4  ;;  %s483_s17 = int_to_ptr.hbm [resolvable:$true] %s482_s17 }
  0x37   : > { %p3377_p7 = pnand %p2754_p4, %p3348_p12  ;;  %s494_s8 = sand.u32 1, %s3170_s16  }
  0x38   : > { %s473_s10 = scalar_lea.sflag [#allocation4], %s3364_s14  ;;  %s3028_s22 = sshra.s32 %s483_s17, 4  ;;  %s3029_s22 = int_to_ptr.hbm [resolvable:$true] %s3028_s22 }
  0x39   : > { %s3030_s15 = scalar_lea.hbm %s3029_s22, 16  ;;  %p3032_p9 = pneg %p3377_p7 }
  0x3a   : > { %p3031_p8 = scmp.ne.s32.totalorder %s3029_s22, %s3030_s15  ;;  %s3035_s19 = scalar_lea.hbm %s3658_s0, 32 }
  0x3b   : > { %p3036_p12 = scmp.lt.s32.totalorder %s3029_s22, %s3658_s0  ;;  %p3037_p2 = scmp.lt.s32.totalorder %s3035_s19, %s3030_s15 }
  0x3c   : > { %p3033_p10 = pnand %p3032_p9, %p3031_p8 }
  0x3d   : > { %p3038_p4 = por %p3037_p2, %p3036_p12 }
  0x3e   : > { %p3034_p11 = pneg %p3033_p10 }
  0x40   : > { %p3039_p5 = pnand %p3038_p4, %p3034_p11 }
  0x42   : > { %3042 = shalt.err (!%p3039_p5)
}
  0x43   : > { %s3183_s18 = smov 128   ;;  %s3184_s28 = smov 8  }
  0x44   : > { %2741 = dma.hbm_to_vmem [thread:$0]  (!%p3377_p7), %s483_s17, 256, %s485_s4, %s473_s10, %s3183_s18, %s3183_s18, %s3184_s28  }
  0x45   : > { %s500_s12 = scalar_lea.hbm %s3659_s1, %s3170_s16  ;;  %s497_s29 = scalar_lea.vmem [#allocation6], %s3364_s14 }
  0x46   : > { %s502_s13 = sshll.u32 %s500_s12, 4  ;;  %s504_s23 = sshll.u32 %s497_s29, 4  ;;  %s503_s13 = int_to_ptr.hbm [resolvable:$true] %s502_s13  ;;  %s505_s23 = int_to_ptr.vmem [resolvable:$true] %s504_s23 }
  0x47   : > { %s495_s15 = scalar_lea.sflag [#allocation7], %s494_s8  ;;  %s3058_s22 = sshra.s32 %s503_s13, 4  ;;  %s3059_s22 = int_to_ptr.hbm [resolvable:$true] %s3058_s22 }
  0x48   : > { %s3060_s19 = scalar_lea.hbm %s3059_s22, 1  ;;  %s3065_s10 = scalar_lea.hbm %s3659_s1, 2 }
  0x49   : > { %p3061_p5 = scmp.ne.s32.totalorder %s3059_s22, %s3060_s19  ;;  %p3066_p11 = scmp.lt.s32.totalorder %s3059_s22, %s3659_s1 }
  0x4a   : > { %p3067_p12 = scmp.lt.s32.totalorder %s3065_s10, %s3060_s19 }
  0x4b   : > { %p3063_p8 = pnand %p3061_p5, %p3032_p9 }
  0x4c   : > { %p3068_p2 = por %p3067_p12, %p3066_p11 }
  0x4d   : > { %p3064_p10 = pneg %p3063_p8 }
  0x4f   : > { %p3069_p4 = pnand %p3068_p2, %p3064_p10 }
  0x51   : > { %3072 = shalt.err (!%p3069_p4)
}
  0x52   : > { %2744 = dma.hbm_to_vmem [thread:$0]  (!%p3377_p7), %s503_s13, 16, %s505_s23, %s495_s15  }
  0x53   : > { %513 = sbr.rel (%p3297_p3) target bundleno = 2393 (0x959), region = 76  ;;  %s3415_s8 = sand.u32 (!%p3297_p3), 1, %s3162_s30  }
  0x54   : > { %s2192_s29 = sshll.u32 (!%p3297_p3), %s3415_s8, 4  ;;  %s516_s14 = scalar_lea.sflag (!%p3297_p3), [#allocation4], %s3415_s8 }
  0x55   : > { %s3421_s17 = scalar_lea.vmem (!%p3297_p3), [#allocation3], %s2192_s29 }
  0x58   : > { %3133 = dma.done.wait (%p3354_p13), %s516_s14, 256  }
  0x59   : > { %3135 = vsyncadd (%p3354_p13), %s516_s14, 4294967040  ;;  %s525_s21 = sand.u32 1, %s3292_s20   ;;  %s528_s18 = scalar_lea.vmem [#allocation6], %s3415_s8 }
  0x5a   : > { %s526_s24 = scalar_lea.sflag [#allocation7], %s525_s21 }
  0x5b   : > { %3137 = dma.done.wait (%p3354_p13), %s526_s24, 16  }
  0x5c   : > { %3139 = vsyncadd (%p3354_p13), %s526_s24, 4294967280 }
  0x5d   : > { %3141 = dma.done.wait (%p56_p1), [#allocation7], 3072  }
  0x5e   : > { %3143 = vsyncadd (%p56_p1), [#allocation7], 4294964224 }
  0x5f   : > { %3145 = dma.done.wait (%p56_p1), [#allocation10], 1072  }
  0x60   : > { %3147 = vsyncadd (%p56_p1), [#allocation10], 4294966224 }
  0x61   : > { %3149 = dma.done.wait (%p56_p1), [#allocation13], 8192  }
  0x62   : > { %3151 = vsyncadd (%p56_p1), [#allocation13], 4294959104  ;;  %v2285_v0 = vld [vmem:[#allocation8 + $0xa8] sm:$0xf]  ;;  %v2619_v1 = vld [vmem:[#allocation8 + $0xb0] sm:$0xf0] }
  0x63   : > { %v2618_v2 = vld [vmem:[#allocation8 + $0xac] sm:$0xf]  ;;  %v2286_v3 = vor.u32 %v2619_v1, %v2285_v0  ;;  %v2287_v4 = vld [vmem:[#allocation8 + $0xb4] sm:$0xf0]  ;;  %v2273_v5 = vld [vmem:[#allocation8 + $0x90] sm:$0xf] }
  0x64   : > { %v2616_v6 = vld [vmem:[#allocation8 + $0x98] sm:$0xf0]  ;;  %v2290_v7 = vor.u32 %v2618_v2, %v2287_v4  ;;  %v2615_v8 = vld [vmem:[#allocation8 + $0x94] sm:$0xf]  ;;  %v2275_v9 = vld [vmem:[#allocation8 + $0x9c] sm:$0xf0] }
  0x65   : > { %776 = vmatpush.bf16.msra.mxu0 %v2286_v3  ;;  %v2274_v10 = vor.u32 %v2616_v6, %v2273_v5  ;;  %v2278_v11 = vor.u32 %v2615_v8, %v2275_v9  ;;  %v2261_v12 = vld [vmem:[#allocation8 + $0x78] sm:$0xf]  ;;  %v2613_v13 = vld [vmem:[#allocation8 + $0x80] sm:$0xf0]  ;;  %v2612_v14 = vld [vmem:[#allocation8 + $0x7c] sm:$0xf] }
  0x66   : > { %790 = vmatpush.bf16.msra.mxu1 %v2290_v7  ;;  %v2263_v15 = vld [vmem:[#allocation8 + $0x84] sm:$0xf0]  ;;  %v2262_v16 = vor.u32 %v2613_v13, %v2261_v12  ;;  %v2249_v18 = vld [vmem:[#allocation8 + $0x60] sm:$0xf]  ;;  %v2610_v19 = vld [vmem:[#allocation8 + $0x68] sm:$0xf0] }
  0x67   : > { %v2266_v17 = vor.u32 %v2612_v14, %v2263_v15  ;;  %v2609_v20 = vld [vmem:[#allocation8 + $0x64] sm:$0xf]  ;;  %v2251_v21 = vld [vmem:[#allocation8 + $0x6c] sm:$0xf0]  ;;  %v2250_v22 = vor.u32 %v2610_v19, %v2249_v18  ;;  %v2237_v23 = vld [vmem:[#allocation8 + $0x48] sm:$0xf] }
  0x68   : > { %v2293_v24 = vld [vmem:[#allocation8 + $0xb0] sm:$0xf]  ;;  %v2620_v25 = vld [vmem:[#allocation8 + $0xb8] sm:$0xf0]  ;;  %v2254_v26 = vor.u32 %v2609_v20, %v2251_v21  ;;  %v2607_v27 = vld [vmem:[#allocation8 + $0x50] sm:$0xf0] }
  0x69   : > { %777 = vmatpush.bf16.msra.mxu0 %v2274_v10  ;;  %v2294_v28 = vor.u32 %v2620_v25, %v2293_v24  ;;  %v2281_v29 = vld [vmem:[#allocation8 + $0x98] sm:$0xf]  ;;  %v2617_v30 = vld [vmem:[#allocation8 + $0xa0] sm:$0xf0]  ;;  %v2606_v31 = vld [vmem:[#allocation8 + $0x4c] sm:$0xf]  ;;  %v2238_v34 = vor.u32 %v2607_v27, %v2237_v23 }
  0x6a   : > { %791 = vmatpush.bf16.msra.mxu1 %v2278_v11  ;;  %v2239_v32 = vld [vmem:[#allocation8 + $0x54] sm:$0xf0]  ;;  %v2282_v33 = vor.u32 %v2617_v30, %v2281_v29  ;;  %v2269_v35 = vld [vmem:[#allocation8 + $0x80] sm:$0xf]  ;;  %v2614_v36 = vld [vmem:[#allocation8 + $0x88] sm:$0xf0] }
  0x6b   : > { %804 = vmatpush.bf16.msra.mxu2 %v2294_v28  ;;  %v2242_v37 = vor.u32 %v2606_v31, %v2239_v32  ;;  %v2225_v38 = vld [vmem:[#allocation8 + $0x30] sm:$0xf]  ;;  %v2604_v39 = vld [vmem:[#allocation8 + $0x38] sm:$0xf0]  ;;  %v2603_v40 = vld [vmem:[#allocation8 + $0x34] sm:$0xf]  ;;  %v2270_v42 = vor.u32 %v2614_v36, %v2269_v35 }
  0x6c   : > { %v2227_v41 = vld [vmem:[#allocation8 + $0x3c] sm:$0xf0]  ;;  %v2226_v43 = vor.u32 %v2604_v39, %v2225_v38  ;;  %v2257_v44 = vld [vmem:[#allocation8 + $0x68] sm:$0xf]  ;;  %v2611_v45 = vld [vmem:[#allocation8 + $0x70] sm:$0xf0] }
  0x6d   : > { %778 = vmatpush.bf16.msra.mxu0 %v2262_v16  ;;  %v2230_v46 = vor.u32 %v2603_v40, %v2227_v41  ;;  %v2213_v47 = vld [vmem:[#allocation8 + $0x18] sm:$0xf]  ;;  %v2601_v48 = vld [vmem:[#allocation8 + $0x20] sm:$0xf0]  ;;  %v2600_v49 = vld [vmem:[#allocation8 + $0x1c] sm:$0xf]  ;;  %v2258_v51 = vor.u32 %v2611_v45, %v2257_v44 }
  0x6e   : > { %792 = vmatpush.bf16.msra.mxu1 %v2266_v17  ;;  %v2215_v50 = vld [vmem:[#allocation8 + $0x24] sm:$0xf0]  ;;  %v2214_v52 = vor.u32 %v2601_v48, %v2213_v47  ;;  %v2245_v53 = vld [vmem:[#allocation8 + $0x50] sm:$0xf]  ;;  %v2608_v54 = vld [vmem:[#allocation8 + $0x58] sm:$0xf0]  ;;  %v820_v48 = vlaneseq }
  0x6f   : > { %805 = vmatpush.bf16.msra.mxu2 %v2282_v33  ;;  %v2218_v55 = vor.u32 %v2600_v49, %v2215_v50  ;;  %v2201_v56 = vld [vmem:[#allocation8] sm:$0xf]  ;;  %v2598_v57 = vld [vmem:[#allocation8 + $0x8] sm:$0xf0]  ;;  %v2597_v58 = vld [vmem:[#allocation8 + $0x4] sm:$0xf]  ;;  %v2246_v61 = vor.u32 %v2608_v54, %v2245_v53 }
  0x70   : > { %v2203_v59 = vld [vmem:[#allocation8 + $0xc] sm:$0xf0]  ;;  %v2202_v62 = vor.u32 %v2598_v57, %v2201_v56  ;;  %v3449_v63 = vld [vmem:[%s3421_s17 + $0x8] sm:$0xff]  ;;  %v2221_v5 = vld [vmem:[#allocation8 + $0x20] sm:$0xf]  ;;  %vm865_vm0 = vcmask 261120  }
  0x71   : > { %779 = vmatpush.bf16.msra.mxu0 %v2250_v22  ;;  %v3446_v60 = vld [vmem:[%s3421_s17] sm:$0xff]  ;;  %v2233_v0 = vld [vmem:[#allocation8 + $0x38] sm:$0xf]  ;;  %v2206_v2 = vor.u32 %v2597_v58, %v2203_v59  ;;  %v2209_v8 = vld [vmem:[#allocation8 + $0x8] sm:$0xf]  ;;  %s3185_s27 = smov 96  }
  0x72   : > { %793 = vmatpush.bf16.msra.mxu1 %v2254_v26  ;;  %v2605_v1 = vld [vmem:[#allocation8 + $0x40] sm:$0xf0]  ;;  %v607_v3 = vpack.c.bf16 %v3449_v63, %v3446_v60  ;;  %v2602_v6 = vld [vmem:[#allocation8 + $0x28] sm:$0xf0]  ;;  %v2599_v9 = vld [vmem:[#allocation8 + $0x10] sm:$0xf0] }
  0x73   : > { %806 = vmatpush.bf16.msra.mxu2 %v2270_v42  ;;  %v2234_v4 = vor.u32 %v2605_v1, %v2233_v0  ;;  %v2222_v7 = vor.u32 %v2602_v6, %v2221_v5  ;;  %v2210_v10 = vor.u32 %v2599_v9, %v2209_v8  ;;  %v640_v11 = vld [vmem:[#allocation9] sm:$0x7]  ;;  %s3186_s28 = smov 64   ;;  %s3187_s12 = smov 32   ;;  %v3469_v47 = vld [vmem:[%s528_s18] sm:$0x1] }
  0x74   : > { %v643_v14 = vperm.slane %v640_v11, 1  ;;  %v642_v15 = vperm.slane %v640_v11, 0  ;;  %v644_v30 = vperm.slane %v640_v11, 2  ;;  %vm827_vm1 = vcmp.gt.f32.partialorder %v3469_v47, 0.5  ;;  %s3704_s18 = sld [smem:[#allocation32_spill]]  ;;  %s602_s26 = scalar_lea.vmem [#allocation15], %s2192_s29 }
  0x75   : > { %780 = vmatpush.bf16.msra.mxu0 %v2238_v34  ;;  %v3188_v49 = vmov 0   ;;  %vm886_vm5 = vcmask 130048   ;;  %vm836_vm8 = vcmask 122880   ;;  %vm1010_vm9 = vcmask 523520   ;;  %s3706_s22 = sld [smem:[#allocation34_spill]]  ;;  %s2038_s4 = sshll.u32 %s602_s26, 4  ;;  %s2039_s4 = int_to_ptr.vmem [resolvable:$true] %s2038_s4 }
  0x76   : > { %794 = vmatpush.bf16.msra.mxu1 %v2242_v37  ;;  %v828_v50 = vsel %vm827_vm1, 1, %v3188_v49  ;;  %vm1088_vm10 = vcmask 785920   ;;  %vm1166_vm11 = vcmask 1048320  }
  0x77   : > { %807 = vmatpush.bf16.msra.mxu2 %v2258_v51  ;;  %v821_v51 = vshrl.u32 %v820_v48, 7  ;;  %v829_v53 = vperm.slane %v828_v50, 0 }
  0x79   : > { %781 = vmatpush.bf16.msra.mxu0 %v2226_v43  ;;  %vm830_vm3 = vcmp.eq.s32.totalorder %v829_v53, 1  ;;  %v822_v54 = vadd.s32 8, %v821_v51 }
  0x7a   : > { %795 = vmatpush.bf16.msra.mxu1 %v2230_v46 }
  0x7b   : > { %808 = vmatpush.bf16.msra.mxu2 %v2246_v61  ;;  %s3108_s17 = scalar_lea.hbm %s3706_s22, 32 }
  0x7d   : > { %782 = vmatpush.bf16.msra.mxu0 %v2214_v52  ;;  %v824_v52 = vand.u32 127, %v820_v48 }
  0x7e   : > { %796 = vmatpush.bf16.msra.mxu1 %v2218_v55  ;;  %v3189_v55 = vmov 0.0  }
  0x7f   : > { %809 = vmatpush.bf16.msra.mxu2 %v2234_v4  ;;  %vm825_vm2 = vcmp.gt.s32.totalorder %v824_v52, %v821_v51  ;;  %vm826_vm6 = vcmp.gt.s32.totalorder %v824_v52, %v822_v54 }
  0x80   : > { %vm831_vm4 = vmor %vm825_vm2, %vm830_vm3 }
  0x81   : > { %783 = vmatpush.bf16.msra.mxu0 %v2202_v62  ;;  %v3475_v56 = vsel %vm831_vm4, -1e+30, %v3189_v55  ;;  %vm832_vm7 = vmor %vm826_vm6, %vm830_vm3 }
  0x82   : > { %797 = vmatpush.bf16.msra.mxu1 %v2206_v2  ;;  %v3480_v61 = vsel %vm832_vm7, -1e+30, %v3189_v55 }
  0x83   : > { %810 = vmatpush.bf16.msra.mxu2 %v2222_v7 }
  0x84   : > { %784 = vmatmul.bf16.vlgmr.msra.gmra.mxu0 %v607_v3 }
  0x85   : > { %798 = vmatmul.bf16.vlgmr.msra.gmra.mxu1 %v607_v3 }
  0x87   : > { %811 = vmatpush.bf16.msra.mxu2 %v2210_v10 }
  0x8a   : > { %812 = vmatmul.bf16.vlgmr.msra.gmra.mxu2 %v607_v3 }
 0x101   : > { %v785_v12 = vpop.f32.mrf.mxu0 }
 0x102   : > { %v799_v13 = vpop.f32.mrf.mxu1  ;;  %v786_v20 = vadd.f32 %v785_v12, %v642_v15 }
 0x103   : > { %v800_v16 = vadd.f32 %v799_v13, %v643_v14 }
 0x104   : > { %v818_v25 = vmul.f32 0.17677669, %v786_v20 }
 0x105   : > { %v851_v21 = vpack.c.bf16 %v800_v16, %v800_v16 }
 0x106   : > { %v849_v32 = vpack.c.bf16 %v818_v25, %v818_v25 }
 0x107   : > { %v862_v26 = vunpack.c.l.b16 %v851_v21 }
 0x108   : > { %v857_v36 = vunpack.c.l.b16 %v849_v32 }
 0x109   : > { %v787_v17 = vpop.f32.mrf.mxu0 }
 0x10a   : > { %v788_v18 = vadd.f32 %v787_v17, %v642_v15  ;;  %v801_v19 = vpop.f32.mrf.mxu1 }
 0x10b   : > { %v802_v22 = vadd.f32 %v801_v19, %v643_v14 }
 0x10c   : > { %v819_v23 = vmul.f32 0.17677669, %v788_v18 }
 0x10d   : > { %v852_v24 = vpack.c.bf16 %v802_v22, %v802_v22  ;;  %v813_v31 = vpop.f32.mrf.mxu2 }
 0x10e   : > { %v850_v28 = vpack.c.bf16 %v819_v23, %v819_v23  ;;  %v814_v35 = vadd.f32 %v813_v31, %v644_v30 }
 0x10f   : > { %v863_v27 = vunpack.c.l.b16 %v852_v24 }
 0x110   : > { %v858_v34 = vunpack.c.l.b16 %v850_v28  ;;  %v853_v38 = vpack.c.bf16 %v814_v35, %v814_v35 }
 0x111   : > { %v3453_v29 = vpack.c.b16 %v863_v27, %v862_v26 }
 0x112   : > { %v859_v37 = vpack.c.b16 %v858_v34, %v857_v36  ;;  %v912_v41 = vunpack.c.l.b16 %v853_v38 }
 0x113   : > { %937 = vrot.lane.b32.xlu2 %v3453_v29, %s3185_s27  ;;  %v870_v33 = vsel %vm865_vm0, %v3453_v29, 0 }
 0x114   : > { %879 = vmatpush.bf16.xpose.msra.mxu3 %v870_v33 }
 0x115   : > { %v815_v39 = vpop.f32.mrf.mxu2 }
 0x116   : > { %v816_v40 = vadd.f32 %v815_v39, %v644_v30 }
 0x118   : > { %v854_v42 = vpack.c.bf16 %v816_v40, %v816_v40 }
 0x11a   : > { %v913_v43 = vunpack.c.l.b16 %v854_v42 }
 0x11b   : > { %935 = vrot.lane.b32.xlu2 %v859_v37, %s3185_s27  ;;  %2295 = vmatmul.msk.bf16.vlgmr.msra.gmra.mxu3 %vm865_vm0, %v859_v37 }
 0x11c   : > { %v3461_v44 = vpack.c.b16 %v913_v43, %v912_v41 }
 0x11e   : > { %926 = vmatpush.bf16.msrb.mxu3 %v3461_v44 }
 0x123   : > { %1013 = vrot.lane.b32.xlu2 %v859_v37, %s3186_s28 }
 0x12b   : > { %1091 = vrot.lane.b32.xlu2 %v859_v37, %s3187_s12 }
 0x16d   : > { %v938_v45 = vpop.permute.xlu2 %937 }
 0x16e   : > { %v943_v46 = vsel %vm865_vm0, %v938_v45, 0 }
 0x16f   : > { %952 = vmatpush.bf16.xpose.msra.mxu3 %v943_v46 }
 0x175   : > { %v936_v12 = vpop.permute.xlu2 %935 }
 0x17d   : > { %v1014_v15 = vpop.permute.xlu2 %1013 }
 0x185   : > { %v1092_v28 = vpop.permute.xlu2 %1091 }
 0x19e   : > { %v881_v57 = vpop.f32.mrf.mxu3 }
 0x19f   : > { %v882_v58 = vadd.f32 %v881_v57, %v3475_v56 }
 0x1a1   : > { %v887_v59 = vsel %vm886_vm5, %v882_v58, -inf }
 0x1a2   : > { %888 = vmax.xlane.f32.xlu0 %v887_v59 }
 0x1a6   : > { %v883_v62 = vpop.f32.mrf.mxu3 }
 0x1a7   : > { %v884_v0 = vadd.f32 %v883_v62, %v3480_v61 }
 0x1a9   : > { %v890_v1 = vsel %vm886_vm5, %v884_v0, -inf }
 0x1aa   : > { %891 = vmax.xlane.f32.xlu0 %v890_v1 }
 0x1be   : > { %1015 = vrot.lane.b32.xlu0 %v3453_v29, %s3186_s28 }
 0x215   : > { %v889_v2 = vpop.xlane.xlu0 %888 }
 0x216   : > { %v893_v3 = vsub.f32 %v882_v58, %v889_v2 }
 0x218   : > { %v895_v4 = vmul.f32 1.442695, %v893_v3 }
 0x21a   : > { %2820 = vpow2.f32 %v895_v4 }
 0x21d   : > { %v892_v5 = vpop.xlane.xlu0 %891 }
 0x21e   : > { %v894_v6 = vsub.f32 %v884_v0, %v892_v5 }
 0x220   : > { %v2821_v7 = vpop.eup %2820  ;;  %v897_v8 = vmul.f32 1.442695, %v894_v6 }
 0x221   : > { %v899_v9 = vsel %vm886_vm5, %v2821_v7, 0.0 }
 0x222   : > { %2822 = vpow2.f32 %v897_v8  ;;  %900 = vadd.xlane.f32.xlu1 %v899_v9 }
 0x228   : > { %v2823_v10 = vpop.eup %2822 }
 0x229   : > { %v902_v11 = vsel %vm886_vm5, %v2823_v10, 0.0 }
 0x22a   : > { %903 = vadd.xlane.f32.xlu1 %v902_v11 }
 0x230   : > { %v1016_v13 = vpop.permute.xlu0 %1015 }
 0x231   : > { %v1021_v14 = vsel %vm865_vm0, %v1016_v13, 0 }
 0x232   : > { %1030 = vmatpush.bf16.xpose.msrb.mxu2 %v1021_v14 }
 0x239   : > { %2299 = vmatmul.msk.bf16.vlgmr.msrb.gmra.mxu2 %vm865_vm0, %v1014_v15 }
 0x243   : > { %1093 = vrot.lane.b32.xlu1 %v3453_v29, %s3187_s12 }
 0x295   : > { %v901_v16 = vpop.xlane.xlu1 %900 }
 0x296   : > { %2824 = vrcp.f32 %v901_v16 }
 0x29c   : > { %v2825_v18 = vpop.eup %2824 }
 0x29d   : > { %v904_v17 = vpop.xlane.xlu1 %903  ;;  %v907_v20 = vmul.f32 %v2825_v18, %v2821_v7 }
 0x29e   : > { %2826 = vrcp.f32 %v904_v17 }
 0x2a4   : > { %v2827_v19 = vpop.eup %2826 }
 0x2a5   : > { %v908_v21 = vmul.f32 %v2827_v19, %v2823_v10 }
 0x2a7   : > { %v909_v22 = vpack.c.bf16 %v908_v21, %v907_v20  ;;  %v835_v21 = vsel %vm827_vm1, 1.0, %v3189_v55 }
 0x2a9   : > { %2296 = vmatmul.msk.bf16.vlgmr.msrb.gmra.mxu3 %vm886_vm5, %v909_v22 }
 0x2b5   : > { %v1094_v23 = vpop.permute.xlu1 %1093 }
 0x2b6   : > { %v1099_v24 = vsel %vm865_vm0, %v1094_v23, 0  ;;  %v837_v23 = vsel %vm836_vm8, %v835_v21, inf  ;;  %v3190_v21 = vmov 128.0  }
 0x2b7   : > { %1108 = vmatpush.bf16.xpose.msrb.mxu3 %v1099_v24 }
 0x2b9   : > { %2297 = vmatmul.msk.bf16.vlgmr.msra.gmra.mxu3 %vm865_vm0, %v936_v12 }
 0x2bc   : > { %v1032_v25 = vpop.f32.mrf.mxu2 }
 0x2bd   : > { %v1033_v26 = vadd.f32 %v1032_v25, %v3475_v56 }
 0x2bf   : > { %v1037_v27 = vsel %vm886_vm5, %v1033_v26, -inf }
 0x2c0   : > { %1038 = vmax.xlane.f32.xlu1 %v1037_v27 }
 0x2c4   : > { %v1034_v39 = vpop.f32.mrf.mxu2 }
 0x2c5   : > { %v1035_v40 = vadd.f32 %v1034_v39, %v3480_v61 }
 0x2c7   : > { %v1040_v45 = vsel %vm886_vm5, %v1035_v40, -inf }
 0x2c9   : > { %2301 = vmatmul.msk.bf16.vlgmr.msrb.gmra.mxu3 %vm865_vm0, %v1092_v28 }
 0x32c   : > { %v928_v29 = vpop.f32.mrf.mxu3 }
 0x32d   : > { %933 = vst.msk [vmem:[#allocation2] sm:$0xff] %vm865_vm0, %v928_v29 }
 0x333   : > { %v1039_v30 = vpop.xlane.xlu1 %1038 }
 0x334   : > { %v1043_v31 = vsub.f32 %v1033_v26, %v1039_v30  ;;  %v930_v32 = vpop.f32.mrf.mxu3 }
 0x335   : > { %934 = vst.msk [vmem:[#allocation2 + $0x8] sm:$0xff] %vm865_vm0, %v930_v32 }
 0x336   : > { %v1045_v33 = vmul.f32 1.442695, %v1043_v31 }
 0x338   : > { %2828 = vpow2.f32 %v1045_v33 }
 0x33c   : > { %v954_v34 = vpop.f32.mrf.mxu3 }
 0x33d   : > { %v955_v35 = vadd.f32 %v954_v34, %v3475_v56 }
 0x33e   : > { %v3501_v36 = vpop.eup %2828 }
 0x33f   : > { %v959_v37 = vsel %vm886_vm5, %v955_v35, -inf  ;;  %v1049_v38 = vsel %vm886_vm5, %v3501_v36, 0.0 }
 0x340   : > { %960 = vmax.xlane.f32.xlu2 %v959_v37  ;;  %1050 = vadd.xlane.f32.xlu1 %v1049_v38 }
 0x344   : > { %v956_v41 = vpop.f32.mrf.mxu3 }
 0x345   : > { %v957_v42 = vadd.f32 %v956_v41, %v3480_v61 }
 0x347   : > { %v962_v43 = vsel %vm886_vm5, %v957_v42, -inf }
 0x348   : > { %963 = vmax.xlane.f32.xlu0 %v962_v43  ;;  %1041 = vmax.xlane.f32.xlu2 %v1040_v45 }
 0x34c   : > { %v1110_v46 = vpop.f32.mrf.mxu3 }
 0x34d   : > { %v1111_v48 = vadd.f32 %v1110_v46, %v3475_v56 }
 0x34f   : > { %v1115_v49 = vsel %vm886_vm5, %v1111_v48, -inf }
 0x350   : > { %1116 = vmax.xlane.f32.xlu0 %v1115_v49 }
 0x354   : > { %v1112_v50 = vpop.f32.mrf.mxu3 }
 0x355   : > { %v1113_v51 = vadd.f32 %v1112_v50, %v3480_v61 }
 0x357   : > { %v1118_v52 = vsel %vm886_vm5, %v1113_v51, -inf }
 0x358   : > { %1119 = vmax.xlane.f32.xlu2 %v1118_v52 }
 0x370   : > { %982 = vrot.lane.b32.xlu2 %v3461_v44, %s3185_s27 }
 0x399   : > { %838 = vmin.xlane.f32.xlu2 %v837_v23 }
 0x3b3   : > { %v961_v53 = vpop.xlane.xlu2 %960  ;;  %v1051_v18 = vpop.xlane.xlu1 %1050 }
 0x3b4   : > { %v965_v54 = vsub.f32 %v955_v35, %v961_v53 }
 0x3b6   : > { %v967_v57 = vmul.f32 1.442695, %v965_v54 }
 0x3b8   : > { %2830 = vpow2.f32 %v967_v57  ;;  %v2628_v57 = vld [vmem:[#allocation11 + $0x38] sm:$0xff] }
 0x3b9   : > { %1243 = vmatpush.bf16.msrb.mxu1 %v2628_v57  ;;  %v2443_v57 = vld [vmem:[#allocation12 + $0xd8] sm:$0xf0] }
 0x3bb   : > { %v1042_v58 = vpop.xlane.xlu2 %1041  ;;  %v964_v59 = vpop.xlane.xlu0 %963 }
 0x3bc   : > { %v1044_v62 = vsub.f32 %v1035_v40, %v1042_v58  ;;  %v966_v1 = vsub.f32 %v957_v42, %v964_v59  ;;  %v2627_v58 = vld [vmem:[#allocation11 + $0x30] sm:$0xff]  ;;  %v2626_v59 = vld [vmem:[#allocation11 + $0x28] sm:$0xff] }
 0x3bd   : > { %1244 = vmatpush.bf16.msrb.mxu1 %v2627_v58 }
 0x3be   : > { %v2831_v56 = vpop.eup %2830  ;;  %v1047_v0 = vmul.f32 1.442695, %v1044_v62  ;;  %v969_v61 = vmul.f32 1.442695, %v966_v1  ;;  %v2625_v62 = vld [vmem:[#allocation11 + $0x20] sm:$0xff]  ;;  %v2622_v1 = vld [vmem:[#allocation11 + $0x8] sm:$0xff] }
 0x3bf   : > { %v971_v2 = vsel %vm886_vm5, %v2831_v56, 0.0 }
 0x3c0   : > { %2832 = vpow2.f32 %v1047_v0  ;;  %972 = vadd.xlane.f32.xlu1 %v971_v2  ;;  %v2623_v0 = vld [vmem:[#allocation11 + $0x10] sm:$0xff]  ;;  %v2621_v2 = vld [vmem:[#allocation11] sm:$0xff] }
 0x3c1   : > { %2834 = vpow2.f32 %v969_v61  ;;  %1245 = vmatpush.bf16.msrb.mxu1 %v2626_v59  ;;  %v2417_v59 = vld [vmem:[#allocation12 + $0xa0] sm:$0xf] }
 0x3c3   : > { %v1117_v3 = vpop.xlane.xlu0 %1116 }
 0x3c4   : > { %v1121_v4 = vsub.f32 %v1111_v48, %v1117_v3 }
 0x3c5   : > { %1246 = vmatpush.bf16.msrb.mxu1 %v2625_v62  ;;  %v2651_v62 = vld [vmem:[#allocation12 + $0xac] sm:$0xf0] }
 0x3c6   : > { %v2833_v5 = vpop.eup %2832  ;;  %v1123_v6 = vmul.f32 1.442695, %v1121_v4 }
 0x3c7   : > { %v1052_v7 = vsel %vm886_vm5, %v2833_v5, 0.0  ;;  %v2835_v9 = vpop.eup %2834 }
 0x3c8   : > { %2836 = vpow2.f32 %v1123_v6  ;;  %1053 = vadd.xlane.f32.xlu0 %v1052_v7  ;;  %v974_v13 = vsel %vm886_vm5, %v2835_v9, 0.0 }
 0x3cb   : > { %v1120_v8 = vpop.xlane.xlu2 %1119 }
 0x3cc   : > { %v1122_v10 = vsub.f32 %v1113_v51, %v1120_v8 }
 0x3ce   : > { %v2837_v11 = vpop.eup %2836  ;;  %v1125_v12 = vmul.f32 1.442695, %v1122_v10 }
 0x3cf   : > { %v1127_v14 = vsel %vm886_vm5, %v2837_v11, 0.0 }
 0x3d0   : > { %2838 = vpow2.f32 %v1125_v12  ;;  %975 = vadd.xlane.f32.xlu0 %v974_v13  ;;  %1128 = vadd.xlane.f32.xlu1 %v1127_v14  ;;  %v2814_v14 = vld [vmem:[%s3663_s5] ss:$0 sm:$0xff] }
 0x3d3   : > { %v983_v15 = vpop.permute.xlu2 %982 }
 0x3d4   : > { %995 = vmatpush.bf16.msrb.mxu0 %v983_v15 }
 0x3d6   : > { %v2839_v16 = vpop.eup %2838 }
 0x3d7   : > { %v1130_v17 = vsel %vm886_vm5, %v2839_v16, 0.0 }
 0x3d8   : > { %1131 = vadd.xlane.f32.xlu0 %v1130_v17 }
 0x3e9   : > { %1060 = vrot.lane.b32.xlu1 %v3461_v44, %s3186_s28 }
 0x3ec   : > { %1138 = vrot.lane.b32.xlu0 %v3461_v44, %s3187_s12 }
 0x40c   : > { %v839_v41 = vpop.xlane.xlu2 %838 }
 0x40d   : > { %v840_v42 = vrot.slane %v839_v41, 4 }
 0x40f   : > { %v841_v45 = vmin.f32 %v839_v41, %v840_v42  ;;  %v2658_v41 = vld [vmem:[#allocation12 + $0xec] sm:$0xf]  ;;  %v2459_v42 = vld [vmem:[#allocation12 + $0xf8] sm:$0xf0] }
 0x411   : > { %v842_v46 = vrot.slane %v841_v45, 2 }
 0x413   : > { %v843_v49 = vmin.f32 %v841_v45, %v842_v46  ;;  %v2433_v45 = vld [vmem:[#allocation12 + $0xc0] sm:$0xf]  ;;  %v2655_v46 = vld [vmem:[#allocation12 + $0xcc] sm:$0xf0] }
 0x433   : > { %v973_v20 = vpop.xlane.xlu1 %972 }
 0x434   : > { %2840 = vrcp.f32 %v973_v20 }
 0x43a   : > { %v2841_v24 = vpop.eup %2840 }
 0x43b   : > { %v1054_v19 = vpop.xlane.xlu0 %1053  ;;  %v979_v26 = vmul.f32 %v2841_v24, %v2831_v56  ;;  %v2624_v56 = vld [vmem:[#allocation11 + $0x18] sm:$0xff] }
 0x43c   : > { %1247 = vmatpush.bf16.msrb.mxu1 %v2624_v56  ;;  %v2649_v56 = vld [vmem:[#allocation12 + $0xa4] sm:$0xf] }
 0x440   : > { %1248 = vmatpush.bf16.msrb.mxu1 %v2623_v0  ;;  %v2418_v0 = vor.u32 %v2651_v62, %v2417_v59 }
 0x443   : > { %v976_v22 = vpop.xlane.xlu0 %975  ;;  %v1129_v29 = vpop.xlane.xlu1 %1128 }
 0x444   : > { %2842 = vrcp.f32 %v976_v22  ;;  %1249 = vmatpush.bf16.msrb.mxu1 %v2622_v1  ;;  %v2419_v1 = vld [vmem:[#allocation12 + $0xb0] sm:$0xf0] }
 0x445   : > { %2844 = vrcp.f32 %v1054_v19 }
 0x446   : > { %2846 = vrcp.f32 %v1051_v18 }
 0x448   : > { %1250 = vmatpush.bf16.msrb.mxu1 %v2621_v2  ;;  %v2425_v2 = vld [vmem:[#allocation12 + $0xa8] sm:$0xf] }
 0x44a   : > { %v2843_v25 = vpop.eup %2842 }
 0x44b   : > { %v980_v27 = vmul.f32 %v2843_v25, %v2835_v9  ;;  %v1132_v44 = vpop.xlane.xlu0 %1131  ;;  %v2845_v47 = vpop.eup %2844 }
 0x44c   : > { %2848 = vrcp.f32 %v1132_v44  ;;  %v2847_v55 = vpop.eup %2846  ;;  %v1058_v31 = vmul.f32 %v2845_v47, %v2833_v5 }
 0x44d   : > { %v981_v28 = vpack.c.bf16 %v980_v27, %v979_v26  ;;  %2850 = vrcp.f32 %v1129_v29  ;;  %v1057_v33 = vmul.f32 %v2847_v55, %v3501_v36  ;;  %v844_v36 = vrot.slane %v843_v49, 1 }
 0x44e   : > { %2852 = vrcp.f32 %v3190_v21  ;;  %v2643_v21 = vld [vmem:[#allocation12 + $0x6c] sm:$0xf0] }
 0x44f   : > { %2298 = vmatmul.msk.bf16.vlgmr.msrb.gmra.mxu0 %vm886_vm5, %v981_v28  ;;  %v1059_v37 = vpack.c.bf16 %v1058_v31, %v1057_v33  ;;  %v845_v50 = vmin.f32 %v843_v49, %v844_v36  ;;  %v2449_v31 = vld [vmem:[#allocation12 + $0xe0] sm:$0xf]  ;;  %v2657_v33 = vld [vmem:[#allocation12 + $0xe4] sm:$0xf]  ;;  %v2434_v49 = vor.u32 %v2655_v46, %v2433_v45  ;;  %v2435_v36 = vld [vmem:[#allocation12 + $0xd0] sm:$0xf0] }
 0x450   : > { %v2635_v45 = vld [vmem:[#allocation12 + $0x2c] sm:$0xf0]  ;;  %v2633_v46 = vld [vmem:[#allocation12 + $0x24] sm:$0xf] }
 0x451   : > { %2694 = vpush %v845_v50  ;;  %v2441_v50 = vld [vmem:[#allocation12 + $0xc8] sm:$0xf] }
 0x452   : > { %v2849_v30 = vpop.eup %2848 }
 0x453   : > { %v2851_v32 = vpop.eup %2850  ;;  %v1136_v35 = vmul.f32 %v2849_v30, %v2839_v16 }
 0x454   : > { %v1135_v38 = vmul.f32 %v2851_v32, %v2837_v11  ;;  %v2853_v22 = vpop.eup %2852  ;;  %v2659_v32 = vld [vmem:[#allocation12 + $0xec] sm:$0xf0] }
 0x455   : > { %v1264_v23 = vmul.f32 128.0, %v2853_v22  ;;  %vm1268_vm12 = vweird.f32 %v2853_v22 }
 0x456   : > { %v1137_v40 = vpack.c.bf16 %v1136_v35, %v1135_v38  ;;  %v2451_v35 = vld [vmem:[#allocation12 + $0xf0] sm:$0xf0]  ;;  %v2660_v38 = vld [vmem:[#allocation12 + $0xf4] sm:$0xf0] }
 0x457   : > { %v1265_v24 = vsub.f32 1.0, %v1264_v23 }
 0x459   : > { %v1266_v25 = vmul.f32 %v2853_v22, %v1265_v24  ;;  %v2387_v24 = vld [vmem:[#allocation12 + $0x70] sm:$0xf0] }
 0x45b   : > { %v1061_v34 = vpop.permute.xlu1 %1060  ;;  %v1267_v26 = vadd.f32 %v2853_v22, %v1266_v25  ;;  %v2393_v25 = vld [vmem:[#allocation12 + $0x68] sm:$0xf] }
 0x45c   : > { %1073 = vmatpush.bf16.msra.mxu2 %v1061_v34  ;;  %v2450_v34 = vor.u32 %v2659_v32, %v2449_v31  ;;  %v2639_v31 = vld [vmem:[#allocation12 + $0x4c] sm:$0xf0]  ;;  %v2637_v32 = vld [vmem:[#allocation12 + $0x44] sm:$0xf] }
 0x45d   : > { %v3543_v27 = vsel %vm1268_vm12, %v2853_v22, %v1267_v26  ;;  %v2641_v22 = vld [vmem:[#allocation12 + $0x64] sm:$0xf]  ;;  %v2644_v26 = vld [vmem:[#allocation12 + $0x74] sm:$0xf0] }
 0x45e   : > { %v1139_v39 = vpop.permute.xlu0 %1138 }
 0x45f   : > { %2300 = vmatmul.msk.bf16.vlgmr.msra.gmra.mxu2 %vm886_vm5, %v1059_v37  ;;  %1151 = vmatpush.bf16.msra.mxu0 %v1139_v39  ;;  %v2457_v37 = vld [vmem:[#allocation12 + $0xe8] sm:$0xf]  ;;  %v2454_v39 = vor.u32 %v2657_v33, %v2451_v35 }
 0x460   : > { %1521 = vmatpush.bf16.msrb.mxu2 %v2450_v34  ;;  %v2371_v34 = vld [vmem:[#allocation12 + $0x50] sm:$0xf0]  ;;  %v2377_v35 = vld [vmem:[#allocation12 + $0x48] sm:$0xf] }
 0x461   : > { %1535 = vmatpush.bf16.msra.mxu3 %v2454_v39 }
 0x462   : > { %2302 = vmatmul.msk.bf16.vlgmr.msra.gmra.mxu0 %vm886_vm5, %v1137_v40  ;;  %v2458_v40 = vor.u32 %v2660_v38, %v2457_v37  ;;  %v2640_v37 = vld [vmem:[#allocation12 + $0x54] sm:$0xf0]  ;;  %v2374_v38 = vor.u32 %v2637_v32, %v2371_v34 }
 0x463   : > { %v2378_v39 = vor.u32 %v2640_v37, %v2377_v35  ;;  %v2692_v34 = vld [vmem:[#allocation14 + $0xf8] sm:$0xff]  ;;  %v2691_v35 = vld [vmem:[#allocation14 + $0xf0] sm:$0xff] }
 0x464   : > { %1549 = vmatpush.bf16.msrb.mxu0 %v2458_v40  ;;  %1522 = vmatpush.bf16.msrb.mxu2 %v2434_v49  ;;  %v2638_v40 = vld [vmem:[#allocation12 + $0x4c] sm:$0xf]  ;;  %v2355_v49 = vld [vmem:[#allocation12 + $0x30] sm:$0xf0]  ;;  %v2668_v37 = vld [vmem:[#allocation14 + $0x38] sm:$0xff] }
 0x468   : > { %1523 = vmatpush.bf16.msrb.mxu2 %v2418_v0  ;;  %v2629_v0 = vld [vmem:[#allocation12 + $0x4] sm:$0xf] }
 0x482   : > { %s2695_s13 = spop %2694 }
 0x483   : > { %p847_p1 = scmp.gt.f32.partialorder %s2695_s13, 0.0  ;;  %s2693_s13 = sshll.u32 %s3292_s20, 4 }
 0x484   : > { %s2037_s19 = scalar_lea.hbm %s3706_s22, %s2693_s13  ;;  %s2026_s20 = scalar_lea.sflag [#allocation5], %s3415_s8 }
 0x485   : > { %s848_s23 = scalar_select %p847_p1, 0.0, 1.0 }
 0x486   : > { %s2040_s10 = sshll.u32 %s2037_s19, 4  ;;  %s2041_s10 = int_to_ptr.hbm [resolvable:$true] %s2040_s10 }
 0x487   : > { %v1171_v9 = vstv %s848_s23  ;;  %s3102_s25 = sshra.s32 %s2041_s10, 4  ;;  %s3103_s25 = int_to_ptr.hbm [resolvable:$true] %s3102_s25 }
 0x488   : > { %s3104_s3 = scalar_lea.hbm %s3103_s25, 16  ;;  %p3109_p9 = scmp.lt.s32.totalorder %s3103_s25, %s3706_s22 }
 0x489   : > { %p3105_p3 = scmp.ne.s32.totalorder %s3103_s25, %s3104_s3  ;;  %p3110_p5 = scmp.lt.s32.totalorder %s3108_s17, %s3104_s3 }
 0x48b   : > { %p3106_p13 = pnand %p3105_p3, %p3358_p0  ;;  %p3111_p8 = por %p3110_p5, %p3109_p9 }
 0x48d   : > { %p3107_p7 = pneg %p3106_p13 }
 0x48f   : > { %p3112_p10 = pnand %p3111_p8, %p3107_p7 }
 0x4cc   : > { %v997_v43 = vpop.f32.mrf.mxu0 }
 0x4d4   : > { %v999_v51 = vpop.f32.mrf.mxu0 }
 0x4df   : > { %v1153_v53 = vpop.f32.mrf.mxu0 }
 0x4e2   : > { %v1075_v48 = vpop.f32.mrf.mxu2 }
 0x4e3   : > { %1082 = vrot.lane.b32.xlu0 %v1075_v48, %s3186_s28  ;;  %v2653_v48 = vld [vmem:[#allocation12 + $0xc4] sm:$0xf] }
 0x4e7   : > { %v1155_v54 = vpop.f32.mrf.mxu0 }
 0x4ea   : > { %v1077_v52 = vpop.f32.mrf.mxu2 }
 0x4eb   : > { %1084 = vrot.lane.b32.xlu1 %v1077_v52, %s3186_s28  ;;  %1004 = vrot.lane.b32.xlu0 %v997_v43, %s3187_s12  ;;  %v2462_v43 = vor.u32 %v2658_v41, %v2459_v42  ;;  %v2438_v52 = vor.u32 %v2653_v48, %v2435_v36  ;;  %v2379_v41 = vld [vmem:[#allocation12 + $0x58] sm:$0xf0]  ;;  %v2361_v36 = vld [vmem:[#allocation12 + $0x28] sm:$0xf] }
 0x4ec   : > { %v2382_v42 = vor.u32 %v2638_v40, %v2379_v41  ;;  %v2690_v40 = vld [vmem:[#allocation14 + $0xe8] sm:$0xff]  ;;  %v2667_v41 = vld [vmem:[#allocation14 + $0x30] sm:$0xff] }
 0x4ed   : > { %1563 = vmatpush.bf16.msra.mxu1 %v2462_v43  ;;  %1536 = vmatpush.bf16.msra.mxu3 %v2438_v52  ;;  %v2353_v43 = vld [vmem:[#allocation12 + $0x20] sm:$0xf]  ;;  %v2358_v52 = vor.u32 %v2633_v46, %v2355_v49  ;;  %v2666_v46 = vld [vmem:[#allocation14 + $0x28] sm:$0xff]  ;;  %v2680_v49 = vld [vmem:[#allocation14 + $0x98] sm:$0xff] }
 0x4ee   : > { %v2354_v48 = vor.u32 %v2635_v45, %v2353_v43  ;;  %v2681_v43 = vld [vmem:[#allocation14 + $0xa0] sm:$0xff] }
 0x4ef   : > { %v2689_v45 = vld [vmem:[#allocation14 + $0xe0] sm:$0xff] }
 0x4f3   : > { %1006 = vrot.lane.b32.xlu1 %v999_v51, %s3187_s12  ;;  %1160 = vrot.lane.b32.xlu0 %v1153_v53, %s3185_s27  ;;  %v2656_v51 = vld [vmem:[#allocation12 + $0xd4] sm:$0xf0]  ;;  %s3705_s12 = sld [smem:[#allocation33_spill]] }
 0x4f4   : > { %v2442_v53 = vor.u32 %v2656_v51, %v2441_v50  ;;  %v2636_v50 = vld [vmem:[#allocation12 + $0x34] sm:$0xf0] }
 0x4f6   : > { %1550 = vmatpush.bf16.msrb.mxu0 %v2442_v53  ;;  %v2362_v53 = vor.u32 %v2636_v50, %v2361_v36  ;;  %v2688_v36 = vld [vmem:[#allocation14 + $0xd8] sm:$0xff]  ;;  %v2665_v50 = vld [vmem:[#allocation14 + $0x20] sm:$0xff] }
 0x4fb   : > { %1162 = vrot.lane.b32.xlu1 %v1155_v54, %s3185_s27  ;;  %v2654_v54 = vld [vmem:[#allocation12 + $0xcc] sm:$0xf] }
 0x4fc   : > { %v2446_v58 = vor.u32 %v2654_v54, %v2443_v57  ;;  %v2634_v54 = vld [vmem:[#allocation12 + $0x2c] sm:$0xf]  ;;  %v2363_v57 = vld [vmem:[#allocation12 + $0x38] sm:$0xf0] }
 0x4fd   : > { %v2366_v62 = vor.u32 %v2634_v54, %v2363_v57  ;;  %v2664_v54 = vld [vmem:[#allocation14 + $0x18] sm:$0xff] }
 0x4fe   : > { %1564 = vmatpush.bf16.msra.mxu1 %v2446_v58  ;;  %v2337_v58 = vld [vmem:[#allocation12] sm:$0xf]  ;;  %v2672_v57 = vld [vmem:[#allocation14 + $0x58] sm:$0xff] }
 0x555   : > { %v1083_v61 = vpop.permute.xlu0 %1082 }
 0x55d   : > { %v1085_v3 = vpop.permute.xlu1 %1084  ;;  %v1005_v4 = vpop.permute.xlu0 %1004 }
 0x55e   : > { %1011 = vst.msk [vmem:[#allocation2] sm:$0xff] %vm1010_vm9, %v1005_v4 }
 0x55f   : > { %1089 = vst.msk [vmem:[#allocation2] sm:$0xff] %vm1088_vm10, %v1083_v61  ;;  %v2652_v61 = vld [vmem:[#allocation12 + $0xb4] sm:$0xf0] }
 0x560   : > { %v2426_v4 = vor.u32 %v2652_v61, %v2425_v2 }
 0x562   : > { %1551 = vmatpush.bf16.msrb.mxu0 %v2426_v4  ;;  %v2632_v4 = vld [vmem:[#allocation12 + $0x14] sm:$0xf0] }
 0x565   : > { %v1007_v5 = vpop.permute.xlu1 %1006  ;;  %v1161_v6 = vpop.permute.xlu0 %1160 }
 0x566   : > { %1012 = vst.msk [vmem:[#allocation2 + $0x8] sm:$0xff] %vm1010_vm9, %v1007_v5  ;;  %v2650_v5 = vld [vmem:[#allocation12 + $0xac] sm:$0xf] }
 0x567   : > { %1167 = vst.msk [vmem:[#allocation2] sm:$0xff] %vm1166_vm11, %v1161_v6  ;;  %v2427_v6 = vld [vmem:[#allocation12 + $0xb8] sm:$0xf0] }
 0x568   : > { %1090 = vst.msk [vmem:[#allocation2 + $0x8] sm:$0xff] %vm1088_vm10, %v1085_v3  ;;  %v2422_v3 = vor.u32 %v2649_v56, %v2419_v1  ;;  %v2631_v56 = vld [vmem:[#allocation12 + $0xc] sm:$0xf0]  ;;  %v2339_v1 = vld [vmem:[#allocation12 + $0x10] sm:$0xf0] }
 0x569   : > { %v2338_v2 = vor.u32 %v2631_v56, %v2337_v58  ;;  %v2342_v61 = vor.u32 %v2629_v0, %v2339_v1  ;;  %v2678_v58 = vld [vmem:[#allocation14 + $0x88] sm:$0xff]  ;;  %v2663_v56 = vld [vmem:[#allocation14 + $0x10] sm:$0xff]  ;;  %v2677_v1 = vld [vmem:[#allocation14 + $0x80] sm:$0xff] }
 0x56a   : > { %1537 = vmatpush.bf16.msra.mxu3 %v2422_v3  ;;  %v2345_v3 = vld [vmem:[#allocation12 + $0x8] sm:$0xf]  ;;  %v2671_v0 = vld [vmem:[#allocation14 + $0x50] sm:$0xff] }
 0x56d   : > { %v1163_v7 = vpop.permute.xlu1 %1162 }
 0x56e   : > { %1168 = vst.msk [vmem:[#allocation2 + $0x8] sm:$0xff] %vm1166_vm11, %v1163_v7  ;;  %v1169_v8 = vld [vmem:[#allocation2] sm:$0xff]  ;;  %v2430_v7 = vor.u32 %v2650_v5, %v2427_v6 }
 0x56f   : > { %v1172_v11 = vmul.f32 %v1171_v9, %v1169_v8  ;;  %v2401_v8 = vld [vmem:[#allocation12 + $0x80] sm:$0xf]  ;;  %v2630_v5 = vld [vmem:[#allocation12 + $0xc] sm:$0xf] }
 0x570   : > { %1565 = vmatpush.bf16.msra.mxu1 %v2430_v7  ;;  %v2346_v7 = vor.u32 %v2632_v4, %v2345_v3  ;;  %v2662_v4 = vld [vmem:[#allocation14 + $0x8] sm:$0xff] }
 0x575   : > { %v1170_v10 = vld [vmem:[#allocation2 + $0x8] sm:$0xff] }
 0x576   : > { %v1173_v12 = vmul.f32 %v1171_v9, %v1170_v10  ;;  %v2647_v9 = vld [vmem:[#allocation12 + $0x8c] sm:$0xf0]  ;;  %v2645_v10 = vld [vmem:[#allocation12 + $0x84] sm:$0xf] }
 0x578   : > { %v1174_v13 = vpack.c.bf16 %v1173_v12, %v1172_v11  ;;  %v2402_v11 = vor.u32 %v2647_v9, %v2401_v8  ;;  %v2403_v12 = vld [vmem:[#allocation12 + $0x90] sm:$0xf0]  ;;  %v2347_v8 = vld [vmem:[#allocation12 + $0x18] sm:$0xf0] }
 0x579   : > { %v2350_v9 = vor.u32 %v2630_v5, %v2347_v8  ;;  %v2670_v5 = vld [vmem:[#allocation14 + $0x48] sm:$0xff] }
 0x57a   : > { %1251 = vmatmul.bf16.vlgmr.msrb.gmra.mxu1 %v1174_v13  ;;  %v2409_v13 = vld [vmem:[#allocation12 + $0x88] sm:$0xf]  ;;  %1524 = vmatpush.bf16.msrb.mxu2 %v2402_v11 }
 0x5f7   : > { %v1252_v15 = vpop.f32.mrf.mxu1 }
 0x5f8   : > { %v1253_v16 = vadd.f32 %v2814_v14, %v1252_v15  ;;  %v2406_v15 = vor.u32 %v2645_v10, %v2403_v12 }
 0x5fa   : > { %v1257_v17 = vadd.f32 %v1253_v16, %v3446_v60  ;;  %1538 = vmatpush.bf16.msra.mxu3 %v2406_v15 }
 0x5fc   : > { %1259 = vadd.xlane.f32.xlu0 %v1257_v17 }
 0x5ff   : > { %v1254_v18 = vpop.f32.mrf.mxu1 }
 0x600   : > { %v1255_v19 = vadd.f32 %v2814_v14, %v1254_v18  ;;  %v2648_v14 = vld [vmem:[#allocation12 + $0x94] sm:$0xf0]  ;;  %v2411_v18 = vld [vmem:[#allocation12 + $0x98] sm:$0xf0] }
 0x601   : > { %v2410_v16 = vor.u32 %v2648_v14, %v2409_v13 }
 0x602   : > { %v1258_v20 = vadd.f32 %v1255_v19, %v3449_v63 }
 0x603   : > { %1552 = vmatpush.bf16.msrb.mxu0 %v2410_v16 }
 0x604   : > { %1261 = vadd.xlane.f32.xlu2 %v1258_v20 }
 0x66f   : > { %v1260_v28 = vpop.xlane.xlu0 %1259 }
 0x670   : > { %v1270_v44 = vmul.f32 %v3543_v27, %v1260_v28  ;;  %v2390_v28 = vor.u32 %v2641_v22, %v2387_v24 }
 0x672   : > { %v3546_v60 = vsub.f32 %v1257_v17, %v1270_v44  ;;  %v2646_v17 = vld [vmem:[#allocation12 + $0x8c] sm:$0xf]  ;;  %v2394_v44 = vor.u32 %v2644_v26, %v2393_v25  ;;  %1539 = vmatpush.bf16.msra.mxu3 %v2390_v28  ;;  %v2815_v26 = vld [vmem:[%s3664_s6] ss:$0 sm:$0xff] }
 0x673   : > { %v2414_v19 = vor.u32 %v2646_v17, %v2411_v18 }
 0x674   : > { %v1274_v29 = vmul.f32 %v3546_v60, %v3546_v60  ;;  %1553 = vmatpush.bf16.msrb.mxu0 %v2394_v44 }
 0x675   : > { %1566 = vmatpush.bf16.msra.mxu1 %v2414_v19 }
 0x676   : > { %1276 = vadd.xlane.f32.xlu1 %v1274_v29  ;;  %v2642_v29 = vld [vmem:[#allocation12 + $0x6c] sm:$0xf]  ;;  %1540 = vmatpush.bf16.msra.mxu3 %v2374_v38  ;;  %v2676_v38 = vld [vmem:[#allocation14 + $0x78] sm:$0xff] }
 0x677   : > { %v1262_v63 = vpop.xlane.xlu2 %1261 }
 0x678   : > { %v1271_v47 = vmul.f32 %v3543_v27, %v1262_v63  ;;  %v2395_v63 = vld [vmem:[#allocation12 + $0x78] sm:$0xf0]  ;;  %1554 = vmatpush.bf16.msrb.mxu0 %v2378_v39  ;;  %v2682_v39 = vld [vmem:[#allocation14 + $0xa8] sm:$0xff] }
 0x67a   : > { %v3551_v55 = vsub.f32 %v1258_v20, %v1271_v47  ;;  %v2385_v20 = vld [vmem:[#allocation12 + $0x60] sm:$0xf]  ;;  %v2398_v47 = vor.u32 %v2642_v29, %v2395_v63  ;;  %1541 = vmatpush.bf16.msra.mxu3 %v2358_v52  ;;  %v2679_v52 = vld [vmem:[#allocation14 + $0x90] sm:$0xff] }
 0x67b   : > { %v2386_v23 = vor.u32 %v2643_v21, %v2385_v20 }
 0x67c   : > { %v1275_v30 = vmul.f32 %v3551_v55, %v3551_v55  ;;  %1567 = vmatpush.bf16.msra.mxu1 %v2398_v47  ;;  %1555 = vmatpush.bf16.msrb.mxu0 %v2362_v53  ;;  %v2816_v47 = vld [vmem:[%s3665_s7] ss:$0 sm:$0xff]  ;;  %v2687_v53 = vld [vmem:[#allocation14 + $0xd0] sm:$0xff] }
 0x67d   : > { %1525 = vmatpush.bf16.msrb.mxu2 %v2386_v23 }
 0x67e   : > { %1278 = vadd.xlane.f32.xlu2 %v1275_v30  ;;  %v2369_v30 = vld [vmem:[#allocation12 + $0x40] sm:$0xf]  ;;  %1542 = vmatpush.bf16.msra.mxu3 %v2342_v61 }
 0x67f   : > { %v2370_v33 = vor.u32 %v2639_v31, %v2369_v30 }
 0x680   : > { %1568 = vmatpush.bf16.msra.mxu1 %v2382_v42  ;;  %1556 = vmatpush.bf16.msrb.mxu0 %v2346_v7  ;;  %v2675_v42 = vld [vmem:[#allocation14 + $0x70] sm:$0xff] }
 0x681   : > { %1526 = vmatpush.bf16.msrb.mxu2 %v2370_v33  ;;  %v2684_v33 = vld [vmem:[#allocation14 + $0xb8] sm:$0xff] }
 0x682   : > { %1927 = vmatpush.bf16.msrb.mxu3 %v2676_v38 }
 0x684   : > { %1569 = vmatpush.bf16.msra.mxu1 %v2366_v62  ;;  %1941 = vmatpush.bf16.msra.mxu0 %v2684_v33  ;;  %v3574_v62 = vld [vmem:[%s3667_s9] sm:$0xf] }
 0x685   : > { %1527 = vmatpush.bf16.msrb.mxu2 %v2354_v48  ;;  %v2674_v48 = vld [vmem:[#allocation14 + $0x68] sm:$0xff]  ;;  %v1355_v61 = vperm.slane %v3574_v62, 2  ;;  %v1356_v3 = vperm.slane %v3574_v62, 3 }
 0x686   : > { %1928 = vmatpush.bf16.msrb.mxu3 %v2675_v42 }
 0x688   : > { %1570 = vmatpush.bf16.msra.mxu1 %v2350_v9 }
 0x689   : > { %1528 = vmatpush.bf16.msrb.mxu2 %v2338_v2  ;;  %v2685_v2 = vld [vmem:[#allocation14 + $0xc0] sm:$0xff] }
 0x68a   : > { %1929 = vmatpush.bf16.msrb.mxu3 %v2674_v48 }
 0x68c   : > { %1955 = vmatpush.bf16.msrb.mxu1 %v2692_v34 }
 0x68d   : > { %1913 = vmatpush.bf16.msra.mxu2 %v2668_v37 }
 0x690   : > { %1956 = vmatpush.bf16.msrb.mxu1 %v2691_v35 }
 0x691   : > { %1914 = vmatpush.bf16.msra.mxu2 %v2667_v41 }
 0x694   : > { %1957 = vmatpush.bf16.msrb.mxu1 %v2690_v40 }
 0x695   : > { %1915 = vmatpush.bf16.msra.mxu2 %v2666_v46 }
 0x698   : > { %1958 = vmatpush.bf16.msrb.mxu1 %v2689_v45 }
 0x699   : > { %1916 = vmatpush.bf16.msra.mxu2 %v2665_v50 }
 0x69c   : > { %1959 = vmatpush.bf16.msrb.mxu1 %v2688_v36 }
 0x69d   : > { %1917 = vmatpush.bf16.msra.mxu2 %v2664_v54 }
 0x6a0   : > { %1960 = vmatpush.bf16.msrb.mxu1 %v2687_v53 }
 0x6a1   : > { %1918 = vmatpush.bf16.msra.mxu2 %v2663_v56 }
 0x6a5   : > { %1919 = vmatpush.bf16.msra.mxu2 %v2662_v4 }
 0x6e9   : > { %v1277_v51 = vpop.xlane.xlu1 %1276 }
 0x6ea   : > { %v1280_v59 = vmul.f32 %v1277_v51, %v3543_v27  ;;  %v2673_v51 = vld [vmem:[#allocation14 + $0x60] sm:$0xff] }
 0x6eb   : > { %1930 = vmatpush.bf16.msrb.mxu3 %v2673_v51 }
 0x6ec   : > { %v1282_v6 = vadd.f32 1e-05, %v1280_v59  ;;  %v2686_v59 = vld [vmem:[#allocation14 + $0xc8] sm:$0xff] }
 0x6ed   : > { %1961 = vmatpush.bf16.msrb.mxu1 %v2686_v59 }
 0x6ee   : > { %2854 = vrsqrt.f32 %v1282_v6  ;;  %vm1290_vm14 = vweird.f32 %v1282_v6 }
 0x6ef   : > { %1931 = vmatpush.bf16.msrb.mxu3 %v2672_v57 }
 0x6f1   : > { %v1279_v10 = vpop.xlane.xlu2 %1278  ;;  %1962 = vmatpush.bf16.msrb.mxu1 %v2685_v2 }
 0x6f2   : > { %v1281_v11 = vmul.f32 %v1279_v10, %v3543_v27  ;;  %v1353_v10 = vperm.slane %v3574_v62, 0 }
 0x6f3   : > { %1932 = vmatpush.bf16.msrb.mxu3 %v2671_v0 }
 0x6f4   : > { %v2855_v12 = vpop.eup %2854  ;;  %v1283_v13 = vadd.f32 1e-05, %v1281_v11  ;;  %v1354_v11 = vperm.slane %v3574_v62, 1 }
 0x6f5   : > { %v1285_v14 = vmul.f32 %v2855_v12, %v1282_v6  ;;  %vm1291_vm13 = vweird.f32 %v2855_v12 }
 0x6f6   : > { %2856 = vrsqrt.f32 %v1283_v13  ;;  %vm1292_vm15 = vmor %vm1290_vm14, %vm1291_vm13  ;;  %vm1300_vm1 = vweird.f32 %v1283_v13 }
 0x6f7   : > { %v1286_v15 = vmul.f32 %v2855_v12, %v1285_v14  ;;  %1933 = vmatpush.bf16.msrb.mxu3 %v2670_v5  ;;  %v2661_v14 = vld [vmem:[#allocation14] sm:$0xff] }
 0x6f8   : > { %1920 = vmatpush.bf16.msra.mxu2 %v2661_v14 }
 0x6f9   : > { %v1287_v16 = vmul.f32 0.5, %v1286_v15  ;;  %v2669_v15 = vld [vmem:[#allocation14 + $0x40] sm:$0xff] }
 0x6fb   : > { %v1288_v17 = vsub.f32 1.5, %v1287_v16  ;;  %1934 = vmatpush.bf16.msrb.mxu3 %v2669_v15 }
 0x6fc   : > { %v2857_v18 = vpop.eup %2856 }
 0x6fd   : > { %v1289_v19 = vmul.f32 %v2855_v12, %v1288_v17  ;;  %v1295_v20 = vmul.f32 %v2857_v18, %v1283_v13  ;;  %vm1301_vm0 = vweird.f32 %v2857_v18 }
 0x6fe   : > { %vm1302_vm2 = vmor %vm1300_vm1, %vm1301_vm0 }
 0x6ff   : > { %v1296_v21 = vmul.f32 %v2857_v18, %v1295_v20  ;;  %v1293_v22 = vsel %vm1292_vm15, %v2855_v12, %v1289_v19 }
 0x700   : > { %v1304_v25 = vmul.f32 %v1293_v22, %v3546_v60 }
 0x701   : > { %v1297_v23 = vmul.f32 0.5, %v1296_v21 }
 0x702   : > { %v1310_v63 = vmul.f32 %v2815_v26, %v1304_v25 }
 0x703   : > { %v1298_v24 = vsub.f32 1.5, %v1297_v23 }
 0x704   : > { %v3565_v31 = vadd.f32 %v2816_v47, %v1310_v63 }
 0x705   : > { %v1299_v28 = vmul.f32 %v2857_v18, %v1298_v24 }
 0x707   : > { %v1303_v44 = vsel %vm1302_vm2, %v2857_v18, %v1299_v28 }
 0x708   : > { %v1305_v29 = vmul.f32 %v1303_v44, %v3551_v55  ;;  %v2683_v55 = vld [vmem:[#allocation14 + $0xb0] sm:$0xff] }
 0x709   : > { %1942 = vmatpush.bf16.msra.mxu0 %v2683_v55 }
 0x70a   : > { %v1311_v30 = vmul.f32 %v2815_v26, %v1305_v29 }
 0x70c   : > { %v3567_v32 = vadd.f32 %v2816_v47, %v1311_v30 }
 0x70d   : > { %1943 = vmatpush.bf16.msra.mxu0 %v2682_v39 }
 0x70e   : > { %v1318_v60 = vpack.c.bf16 %v3567_v32, %v3565_v31 }
 0x710   : > { %1529 = vmatmul.bf16.vlgmr.msrb.gmra.mxu2 %v1318_v60  ;;  %1543 = vmatmul.bf16.vlgmr.msra.gmra.mxu3 %v1318_v60 }
 0x711   : > { %1557 = vmatmul.bf16.vlgmr.msrb.gmra.mxu0 %v1318_v60  ;;  %1571 = vmatmul.bf16.vlgmr.msra.gmra.mxu1 %v1318_v60 }
 0x712   : > { %1944 = vmatpush.bf16.msra.mxu0 %v2681_v43 }
 0x716   : > { %1945 = vmatpush.bf16.msra.mxu0 %v2680_v49 }
 0x71a   : > { %1946 = vmatpush.bf16.msra.mxu0 %v2679_v52 }
 0x71e   : > { %1947 = vmatpush.bf16.msra.mxu0 %v2678_v58 }
 0x722   : > { %1948 = vmatpush.bf16.msra.mxu0 %v2677_v1 }
 0x78e   : > { %v1558_v6 = vpop.f32.mrf.mxu0  ;;  %v1572_v7 = vpop.f32.mrf.mxu1 }
 0x78f   : > { %v3578_v8 = vadd.f32 %v1558_v6, %v1355_v61  ;;  %v3580_v9 = vadd.f32 %v1572_v7, %v1356_v3 }
 0x791   : > { %v1587_v12 = vmul.f32 0.044715, %v3578_v8  ;;  %v1588_v13 = vmul.f32 0.044715, %v3580_v9  ;;  %v1579_v14 = vmul.f32 0.5, %v3578_v8 }
 0x793   : > { %v1595_v16 = vmul.f32 %v1587_v12, %v3578_v8  ;;  %v1596_v17 = vmul.f32 %v1588_v13, %v3580_v9  ;;  %v1530_v18 = vpop.f32.mrf.mxu2  ;;  %v1544_v19 = vpop.f32.mrf.mxu3 }
 0x794   : > { %v3588_v20 = vadd.f32 %v1530_v18, %v1353_v10  ;;  %v3590_v21 = vadd.f32 %v1544_v19, %v1354_v11  ;;  %v1580_v18 = vmul.f32 0.5, %v3580_v9 }
 0x795   : > { %v1603_v22 = vmul.f32 %v1595_v16, %v3578_v8  ;;  %v1604_v23 = vmul.f32 %v1596_v17, %v3580_v9 }
 0x796   : > { %v1585_v24 = vmul.f32 0.044715, %v3588_v20  ;;  %v1586_v25 = vmul.f32 0.044715, %v3590_v21  ;;  %v1560_v26 = vpop.f32.mrf.mxu0  ;;  %v1574_v28 = vpop.f32.mrf.mxu1 }
 0x797   : > { %v1611_v44 = vadd.f32 %v1603_v22, %v3578_v8  ;;  %v1561_v29 = vadd.f32 %v1560_v26, %v1355_v61  ;;  %v1575_v63 = vadd.f32 %v1574_v28, %v1356_v3  ;;  %v1612_v47 = vadd.f32 %v1604_v23, %v3580_v9 }
 0x798   : > { %v1593_v30 = vmul.f32 %v1585_v24, %v3588_v20  ;;  %v1594_v60 = vmul.f32 %v1586_v25, %v3590_v21 }
 0x799   : > { %v1591_v33 = vmul.f32 0.044715, %v1561_v29  ;;  %v1592_v35 = vmul.f32 0.044715, %v1575_v63  ;;  %v1619_v37 = vmul.f32 0.7978846, %v1611_v44 }
 0x79a   : > { %v1601_v34 = vmul.f32 %v1593_v30, %v3588_v20  ;;  %v1602_v55 = vmul.f32 %v1594_v60, %v3590_v21  ;;  %v1620_v41 = vmul.f32 0.7978846, %v1612_v47  ;;  %v1583_v15 = vmul.f32 0.5, %v1561_v29 }
 0x79b   : > { %v1599_v38 = vmul.f32 %v1591_v33, %v1561_v29  ;;  %v1532_v39 = vpop.f32.mrf.mxu2  ;;  %v1546_v40 = vpop.f32.mrf.mxu3  ;;  %v1600_v43 = vmul.f32 %v1592_v35, %v1575_v63  ;;  %2858 = vtanh.f32 %v1619_v37  ;;  %v1584_v19 = vmul.f32 0.5, %v1575_v63 }
 0x79c   : > { %v1609_v42 = vadd.f32 %v1601_v34, %v3588_v20  ;;  %v1533_v45 = vadd.f32 %v1532_v39, %v1353_v10  ;;  %v1610_v46 = vadd.f32 %v1602_v55, %v3590_v21  ;;  %v1547_v49 = vadd.f32 %v1546_v40, %v1354_v11 }
 0x79d   : > { %v1607_v48 = vmul.f32 %v1599_v38, %v1561_v29  ;;  %v1608_v50 = vmul.f32 %v1600_v43, %v1575_v63  ;;  %2860 = vtanh.f32 %v1620_v41  ;;  %v1577_v34 = vmul.f32 0.5, %v3588_v20  ;;  %v2817_v20 = vld [vmem:[%s3669_s11] ss:$0 sm:$0xff] }
 0x79e   : > { %v1617_v36 = vmul.f32 0.7978846, %v1609_v42  ;;  %v1589_v51 = vmul.f32 0.044715, %v1533_v45  ;;  %v1590_v53 = vmul.f32 0.044715, %v1547_v49 }
 0x79f   : > { %v1615_v52 = vadd.f32 %v1607_v48, %v1561_v29  ;;  %v1616_v54 = vadd.f32 %v1608_v50, %v1575_v63  ;;  %v1618_v58 = vmul.f32 0.7978846, %v1610_v46  ;;  %v1581_v8 = vmul.f32 0.5, %v1533_v45 }
 0x7a0   : > { %v1597_v57 = vmul.f32 %v1589_v51, %v1533_v45  ;;  %v1598_v62 = vmul.f32 %v1590_v53, %v1547_v49  ;;  %2862 = vtanh.f32 %v1617_v36  ;;  %v1578_v55 = vmul.f32 0.5, %v3590_v21 }
 0x7a1   : > { %v1623_v59 = vmul.f32 0.7978846, %v1615_v52  ;;  %v1624_v56 = vmul.f32 0.7978846, %v1616_v54  ;;  %v2859_v61 = vpop.eup %2858  ;;  %v1582_v9 = vmul.f32 0.5, %v1547_v49 }
 0x7a2   : > { %v1605_v0 = vmul.f32 %v1597_v57, %v1533_v45  ;;  %v1606_v1 = vmul.f32 %v1598_v62, %v1547_v49  ;;  %v1635_v10 = vadd.f32 1.0, %v2859_v61 }
 0x7a3   : > { %2864 = vtanh.f32 %v1623_v59  ;;  %v2861_v4 = vpop.eup %2860 }
 0x7a4   : > { %v1613_v2 = vadd.f32 %v1605_v0, %v1533_v45  ;;  %2866 = vtanh.f32 %v1624_v56  ;;  %v1614_v3 = vadd.f32 %v1606_v1, %v1547_v49  ;;  %v1636_v12 = vadd.f32 1.0, %v2861_v4 }
 0x7a5   : > { %2868 = vtanh.f32 %v1618_v58  ;;  %v1643_v23 = vmul.f32 %v1635_v10, %v1579_v14 }
 0x7a6   : > { %v1621_v5 = vmul.f32 0.7978846, %v1613_v2  ;;  %v1622_v6 = vmul.f32 0.7978846, %v1614_v3  ;;  %v2863_v7 = vpop.eup %2862  ;;  %v1644_v25 = vmul.f32 %v1636_v12, %v1580_v18 }
 0x7a7   : > { %v1633_v28 = vadd.f32 1.0, %v2863_v7 }
 0x7a8   : > { %2870 = vtanh.f32 %v1621_v5 }
 0x7a9   : > { %v2865_v11 = vpop.eup %2864  ;;  %2872 = vtanh.f32 %v1622_v6  ;;  %v1641_v35 = vmul.f32 %v1633_v28, %v1577_v34 }
 0x7aa   : > { %v2867_v13 = vpop.eup %2866  ;;  %v1639_v16 = vadd.f32 1.0, %v2865_v11 }
 0x7ab   : > { %v2869_v17 = vpop.eup %2868  ;;  %v1640_v22 = vadd.f32 1.0, %v2867_v13 }
 0x7ac   : > { %v1647_v24 = vmul.f32 %v1639_v16, %v1583_v15  ;;  %v1634_v30 = vadd.f32 1.0, %v2869_v17 }
 0x7ad   : > { %v1648_v26 = vmul.f32 %v1640_v22, %v1584_v19 }
 0x7ae   : > { %v2871_v44 = vpop.eup %2870  ;;  %v1651_v47 = vpack.c.bf16 %v1647_v24, %v1643_v23  ;;  %v1642_v38 = vmul.f32 %v1634_v30, %v1578_v55  ;;  %v2818_v23 = vld [vmem:[%s3704_s18] ss:$0 sm:$0xff] }
 0x7af   : > { %v2873_v60 = vpop.eup %2872  ;;  %v1652_v33 = vpack.c.bf16 %v1648_v26, %v1644_v25  ;;  %v1637_v29 = vadd.f32 1.0, %v2871_v44  ;;  %v2819_v25 = vld [vmem:[%s3705_s12] ss:$0 sm:$0xff] }
 0x7b0   : > { %1949 = vmatmul.bf16.vlgmr.msra.gmra.mxu0 %v1651_v47  ;;  %v1638_v63 = vadd.f32 1.0, %v2873_v60 }
 0x7b1   : > { %1963 = vmatmul.bf16.vlgmr.msrb.gmra.mxu1 %v1652_v33  ;;  %v1645_v37 = vmul.f32 %v1637_v29, %v1581_v8 }
 0x7b2   : > { %v1646_v39 = vmul.f32 %v1638_v63, %v1582_v9 }
 0x7b3   : > { %v1649_v40 = vpack.c.bf16 %v1645_v37, %v1641_v35 }
 0x7b4   : > { %v1650_v41 = vpack.c.bf16 %v1646_v39, %v1642_v38 }
 0x7b5   : > { %1921 = vmatmul.bf16.vlgmr.msra.gmra.mxu2 %v1649_v40 }
 0x7b6   : > { %1935 = vmatmul.bf16.vlgmr.msrb.gmra.mxu3 %v1650_v41 }
 0x82d   : > { %v1950_v46 = vpop.f32.mrf.mxu0 }
 0x82e   : > { %v1964_v48 = vpop.f32.mrf.mxu1 }
 0x835   : > { %v1952_v57 = vpop.f32.mrf.mxu0 }
 0x836   : > { %v1966_v59 = vpop.f32.mrf.mxu1 }
 0x838   : > { %v1922_v42 = vpop.f32.mrf.mxu2 }
 0x839   : > { %v1923_v43 = vadd.f32 %v2817_v20, %v1922_v42  ;;  %v1936_v45 = vpop.f32.mrf.mxu3 }
 0x83b   : > { %v1937_v21 = vadd.f32 %v1936_v45, %v1923_v43 }
 0x83d   : > { %v1951_v49 = vadd.f32 %v1950_v46, %v1937_v21 }
 0x83f   : > { %v1965_v36 = vadd.f32 %v1964_v48, %v1951_v49 }
 0x840   : > { %v1924_v50 = vpop.f32.mrf.mxu2 }
 0x841   : > { %v1925_v51 = vadd.f32 %v2817_v20, %v1924_v50  ;;  %v1969_v52 = vadd.f32 %v1965_v36, %v3565_v31  ;;  %v1938_v53 = vpop.f32.mrf.mxu3 }
 0x843   : > { %v1939_v54 = vadd.f32 %v1938_v53, %v1925_v51  ;;  %1971 = vadd.xlane.f32.xlu2 %v1969_v52 }
 0x845   : > { %v1953_v58 = vadd.f32 %v1952_v57, %v1939_v54 }
 0x847   : > { %v1967_v62 = vadd.f32 %v1966_v59, %v1953_v58 }
 0x849   : > { %v1970_v56 = vadd.f32 %v1967_v62, %v3567_v32 }
 0x84b   : > { %1973 = vadd.xlane.f32.xlu2 %v1970_v56 }
 0x8b6   : > { %v1972_v0 = vpop.xlane.xlu2 %1971 }
 0x8b7   : > { %v1975_v1 = vmul.f32 %v1972_v0, %v3543_v27 }
 0x8b9   : > { %v1977_v2 = vsub.f32 %v1969_v52, %v1975_v1 }
 0x8bb   : > { %v1979_v61 = vmul.f32 %v1977_v2, %v1977_v2 }
 0x8bd   : > { %1981 = vadd.xlane.f32.xlu2 %v1979_v61 }
 0x8be   : > { %v1974_v3 = vpop.xlane.xlu2 %1973 }
 0x8bf   : > { %v1976_v4 = vmul.f32 %v1974_v3, %v3543_v27 }
 0x8c1   : > { %v1978_v31 = vsub.f32 %v1970_v56, %v1976_v4 }
 0x8c3   : > { %v1980_v5 = vmul.f32 %v1978_v31, %v1978_v31 }
 0x8c5   : > { %1983 = vadd.xlane.f32.xlu2 %v1980_v5 }
 0x930   : > { %v1982_v6 = vpop.xlane.xlu2 %1981 }
 0x931   : > { %v1985_v7 = vmul.f32 %v1982_v6, %v3543_v27 }
 0x933   : > { %v1987_v10 = vadd.f32 1e-05, %v1985_v7 }
 0x935   : > { %2874 = vrsqrt.f32 %v1987_v10  ;;  %vm1995_vm4 = vweird.f32 %v1987_v10 }
 0x938   : > { %v1984_v11 = vpop.xlane.xlu2 %1983 }
 0x939   : > { %v1986_v32 = vmul.f32 %v1984_v11, %v3543_v27 }
 0x93b   : > { %v2875_v12 = vpop.eup %2874  ;;  %v1988_v13 = vadd.f32 1e-05, %v1986_v32 }
 0x93c   : > { %v1990_v14 = vmul.f32 %v2875_v12, %v1987_v10  ;;  %vm1996_vm3 = vweird.f32 %v2875_v12 }
 0x93d   : > { %2876 = vrsqrt.f32 %v1988_v13  ;;  %vm1997_vm5 = vmor %vm1995_vm4, %vm1996_vm3  ;;  %vm2005_vm7 = vweird.f32 %v1988_v13 }
 0x93e   : > { %v1991_v15 = vmul.f32 %v2875_v12, %v1990_v14 }
 0x940   : > { %v1992_v16 = vmul.f32 0.5, %v1991_v15 }
 0x942   : > { %v1993_v17 = vsub.f32 1.5, %v1992_v16 }
 0x943   : > { %v2877_v18 = vpop.eup %2876 }
 0x944   : > { %v1994_v19 = vmul.f32 %v2875_v12, %v1993_v17  ;;  %v2000_v22 = vmul.f32 %v2877_v18, %v1988_v13  ;;  %vm2006_vm6 = vweird.f32 %v2877_v18 }
 0x945   : > { %vm2007_vm8 = vmor %vm2005_vm7, %vm2006_vm6 }
 0x946   : > { %v1998_v27 = vsel %vm1997_vm5, %v2875_v12, %v1994_v19  ;;  %v2001_v24 = vmul.f32 %v2877_v18, %v2000_v22 }
 0x947   : > { %v2009_v26 = vmul.f32 %v1998_v27, %v1977_v2 }
 0x948   : > { %v2002_v28 = vmul.f32 0.5, %v2001_v24 }
 0x949   : > { %v2015_v44 = vmul.f32 %v2818_v23, %v2009_v26 }
 0x94a   : > { %v2003_v47 = vsub.f32 1.5, %v2002_v28 }
 0x94b   : > { %v2021_v30 = vadd.f32 %v2819_v25, %v2015_v44 }
 0x94c   : > { %v2004_v60 = vmul.f32 %v2877_v18, %v2003_v47 }
 0x94d   : > { %2023 = vst [vmem:[%s602_s26] sm:$0xff] %v2021_v30 }
 0x94e   : > { %v2008_v33 = vsel %vm2007_vm8, %v2877_v18, %v2004_v60 }
 0x94f   : > { %v2010_v34 = vmul.f32 %v2008_v33, %v1978_v31 }
 0x951   : > { %v2016_v8 = vmul.f32 %v2818_v23, %v2010_v34 }
 0x953   : > { %v2022_v29 = vadd.f32 %v2819_v25, %v2016_v8 }
 0x955   : > { %2024 = vst [vmem:[%s602_s26 + $0x8] sm:$0xff] %v2022_v29 }
 0x956   : > { %3115 = shalt.err (!%p3112_p10)
}
 0x957   : > { %s3191_s8 = smov 128   ;;  %s3192_s18 = smov 8  }
 0x958   : > { %2720 = dma.vmem_to_hbm [thread:$0]  (%p3358_p0), %s2039_s4, 256, %s2041_s10, %s2026_s20, %s3191_s8, %s3191_s8, %s3192_s18  }
 0x959 PF: > { %s3707_s27 = sld [smem:[#allocation22_spill]]  ;;  %p3709_p11 = scmp.ge.s32.totalorder %s3170_s16, 2 }
 0x95b   : > { %p2746_p12 = pnand %p3709_p11, %p3366_p6 }
 0x95d   : > { %p2747_p2 = pneg %p2746_p12 }
 0x95f   : > { %s2055_s12 = sand.u32 1, %s3707_s27  }
 0x960   : > { %s2056_s13 = scalar_lea.sflag [#allocation5], %s2055_s12 }
 0x961   : > { %3153 = dma.done.wait (%p2747_p2), %s2056_s13, 256  }
 0x962   : > { %3155 = vsyncadd (%p2747_p2), %s2056_s13, 4294967040  ;;  %s3710_s16 = sld [smem:[#allocation24_spill]]  ;;  %s3713_s29 = smov %s3162_s30 }
 0x963   : > { %s3711_s23 = sld [smem:[#allocation23_spill]] }
 0x964   : > { %s3712_s15 = sld [smem:[#allocation25_spill]] }
 0x968   : > { %p32_p4 = scmp.ge.s32.totalorder %s3710_s16, 4  }
 0x969   : > { %s3714_s30 = smov %s3711_s23 }
 0x96a   :  { %34 = sbr.rel (!%p32_p4) target bundleno = 18 (0x12), region = 154 }
 0x96f   :  { %2062 = vsyncpa [#allocation4], 1 }
 0x970   :  { %2064 = vsyncpa [#allocation4 + $0x1], 1 }
 0x971   :  { %2065 = vsyncpa [#allocation7], 1 }
 0x972   :  { %2067 = vsyncpa [#allocation7 + $0x1], 1 }
 0x973   :  { %2068 = vsyncpa [#allocation10], 1 }
 0x974   :  { %2069 = vsyncpa [#allocation13], 1 }
 0x975   :  { %2070 = vsyncpa [#allocation5], 1 }
 0x976   :  { %2072 = vsyncpa [#allocation5 + $0x1], 1 }

// kernel: tpu_custom_call.1
= control target key start
LH: loop header
LB: loop body
LE: loop exit
PB: predicated region body
PF: predicated region fallthrough
CT: control target
= control target key end

     0   :  { %s3658_s0 = inlined_call_operand.hbm [shape: f32[2,16,128], index: 0, kind: input, shape index: {}]   ;;  %s3659_s1 = inlined_call_operand.hbm [shape: f32[2,1,16], index: 1, kind: input, shape index: {}]   ;;  %s3660_s2 = inlined_call_operand.hbm [shape: bf16[128,384], index: 2, kind: input, shape index: {}]   ;;  %s3661_s3 = inlined_call_operand.hbm [shape: f32[1,384], index: 3, kind: input, shape index: {}]   ;;  %s3662_s4 = inlined_call_operand.hbm [shape: bf16[128,128], index: 4, kind: input, shape index: {}]   ;;  %s3663_s5 = inlined_call_operand.vmem [shape: f32[1,128], index: 5, kind: input, shape index: {}]   ;;  %s3664_s6 = inlined_call_operand.vmem [shape: f32[1,128], index: 6, kind: input, shape index: {}]   ;;  %s3665_s7 = inlined_call_operand.vmem [shape: f32[1,128], index: 7, kind: input, shape index: {}]   ;;  %s3666_s8 = inlined_call_operand.hbm [shape: bf16[128,512], index: 8, kind: input, shape index: {}]   ;;  %s3667_s9 = inlined_call_operand.vmem [shape: f32[1,512], index: 9, kind: input, shape index: {}]   ;;  %s3668_s10 = inlined_call_operand.hbm [shape: bf16[512,128], index: 10, kind: input, shape index: {}]   ;;  %s3669_s11 = inlined_call_operand.vmem [shape: f32[1,128], index: 11, kind: input, shape index: {}]   ;;  %s3670_s12 = inlined_call_operand.vmem [shape: f32[1,128], index: 12, kind: input, shape index: {}]   ;;  %s3671_s13 = inlined_call_operand.vmem [shape: f32[1,128], index: 13, kind: input, shape index: {}]   ;;  %s3672_s14 = inlined_call_operand.hbm [shape: f32[2,16,128], index: 14, kind: output, shape index: {}]  }
   0x1   :  { %3679 = sst [smem:[#allocation27_spill]] %s3660_s2 }
   0x2   :  { %3680 = sst [smem:[#allocation28_spill]] %s3661_s3 }
   0x3   :  { %3681 = sst [smem:[#allocation29_spill]] %s3662_s4 }
   0x4   :  { %3682 = sst [smem:[#allocation30_spill]] %s3666_s8 }
   0x5   :  { %3683 = sst [smem:[#allocation31_spill]] %s3668_s10 }
   0x6   :  { %3684 = sst [smem:[#allocation32_spill]] %s3670_s12 }
   0x7   :  { %3685 = sst [smem:[#allocation33_spill]] %s3671_s13 }
   0x8   :  { %3686 = sst [smem:[#allocation34_spill]] %s3672_s14 }
   0x9   :  { %19 = vsyncpa [#allocation4], 0 }
   0xa   :  { %21 = vsyncpa [#allocation4 + $0x1], 0 }
   0xb   :  { %22 = vsyncpa [#allocation7], 0 }
   0xc   :  { %24 = vsyncpa [#allocation7 + $0x1], 0 }
   0xd   :  { %25 = vsyncpa [#allocation10], 0 }
   0xe   :  { %26 = vsyncpa [#allocation13], 0 }
   0xf   :  { %27 = vsyncpa [#allocation5], 0 }
  0x10   :  { %29 = vsyncpa [#allocation5 + $0x1], 0  ;;  %s3268_s29 = smov 0   ;;  %s3270_s30 = smov 0  }
  0x11   :  { %s3272_s15 = smov 0   ;;  %s3274_s16 = smov 0  }
  0x12 LB: > { %3687 = sst [smem:[#allocation22_spill]] %s3158_s29  ;;  %s3292_s20 = sadd.s32 4294967295, %s3170_s16   ;;  %s3170_s16 = sphi %s3274_s16, %s3710_s16   ;;  %s3166_s15 = sphi %s3272_s15, %s3712_s15   ;;  %s3162_s30 = sphi %s3270_s30, %s3714_s30   ;;  %s3158_s29 = sphi %s3268_s29, %s3713_s29  }
  0x13   : > { %3688 = sst [smem:[#allocation23_spill]] %s3166_s15  ;;  %p2181_p0 = scmp.ge.s32.totalorder %s3170_s16, 1 }
  0x14   : > { %s3689_s2 = sld [smem:[#allocation27_spill]]  ;;  %p56_p1 = scmp.eq.s32.totalorder %s3292_s20, 0 }
  0x15   : > { %p370_p2 = scmp.lt.s32.totalorder %s3170_s16, 3  ;;  %s3172_s22 = smov [#allocation8]  }
  0x16   : > { %s383_s23 = sshll.u32 %s3172_s22, 4  ;;  %s3691_s3 = sld [smem:[#allocation28_spill]]  ;;  %s384_s23 = int_to_ptr.vmem [resolvable:$true] %s383_s23 }
  0x17   : > { %p3297_p3 = pnand %p2181_p0, %p370_p2  ;;  %s3693_s8 = sld [smem:[#allocation30_spill]] }
  0x18   : > { %s3173_s22 = smov [#allocation9]   ;;  %s3174_s14 = smov 192  }
  0x19   : > { %p2722_p4 = pneg %p3297_p3  ;;  %s3175_s13 = smov 12  }
  0x1a   : > { %s381_s19 = sshll.u32 %s3689_s2, 4  ;;  %s398_s2 = sshll.u32 %s3173_s22, 4  ;;  %s382_s19 = int_to_ptr.hbm [resolvable:$true] %s381_s19  ;;  %s399_s2 = int_to_ptr.vmem [resolvable:$true] %s398_s2 }
  0x1b   : > { %p3309_p6 = pnand %p2722_p4, %p56_p1  ;;  %s3176_s24 = smov [#allocation12]  }
  0x1c   : > { %s396_s26 = sshll.u32 %s3691_s3, 4  ;;  %s432_s25 = sshll.u32 %s3176_s24, 4  ;;  %s397_s26 = int_to_ptr.hbm [resolvable:$true] %s396_s26  ;;  %s433_s25 = int_to_ptr.vmem [resolvable:$true] %s432_s25 }
  0x1d   : > { %s430_s18 = sshll.u32 %s3693_s8, 4  ;;  %s3694_s4 = sld [smem:[#allocation29_spill]]  ;;  %s431_s18 = int_to_ptr.hbm [resolvable:$true] %s430_s18 }
  0x1e   : > { %2725 = dma.hbm_to_vmem [thread:$0]  (!%p3309_p6), %s382_s19, 3072, %s384_s23, [#allocation7], %s3174_s14, %s3174_s14, %s3175_s13  }
  0x1f   : > { %2728 = dma.hbm_to_vmem [thread:$0]  (!%p3309_p6), %s397_s26, 48, %s399_s2, [#allocation10]  }
  0x20   : > { %s3177_s17 = smov 256   ;;  %s3178_s22 = smov 16  }
  0x21   : > { %2734 = dma.hbm_to_vmem [thread:$0]  (!%p3309_p6), %s431_s18, 4096, %s433_s25, [#allocation13], %s3177_s17, %s3177_s17, %s3178_s22  }
  0x22   : > { %s3179_s13 = smov [#allocation11]   ;;  %s3180_s14 = smov 64  }
  0x23   : > { %s407_s28 = sshll.u32 %s3694_s4, 4  ;;  %s409_s2 = sshll.u32 %s3179_s13, 4  ;;  %s408_s28 = int_to_ptr.hbm [resolvable:$true] %s407_s28  ;;  %s410_s2 = int_to_ptr.vmem [resolvable:$true] %s409_s2 }
  0x24   : > { %s3181_s3 = smov 4   ;;  %s3695_s10 = sld [smem:[#allocation31_spill]] }
  0x25   : > { %2731 = dma.hbm_to_vmem [thread:$0]  (!%p3309_p6), %s408_s28, 1024, %s410_s2, [#allocation10], %s3180_s14, %s3180_s14, %s3181_s3  }
  0x26   : > { %s3182_s26 = smov [#allocation14]   ;;  %s2180_s24 = sadd.s32 4294967294, %s3170_s16  }
  0x27   : > { %s449_s18 = sshll.u32 %s3182_s26, 4  ;;  %s3334_s25 = sadd.s32 1, %s3170_s16   ;;  %s450_s18 = int_to_ptr.vmem [resolvable:$true] %s449_s18 }
  0x28   : > { %3696 = sst [smem:[#allocation24_spill]] %s3334_s25  ;;  %s42_s17 = sadd.s32 1, %s3166_s15 }
  0x29   : > { %s39_s28 = ssub.s32 %s3170_s16, %s3334_s25  ;;  %p49_p7 = scmp.ne.s32.totalorder %s3166_s15, %s3162_s30 }
  0x2a   : > { %s447_s23 = sshll.u32 %s3695_s10, 4  ;;  %p40_p8 = scmp.eq.s32.totalorder %s39_s28, 0  ;;  %s448_s23 = int_to_ptr.hbm [resolvable:$true] %s447_s23 }
  0x2b   : > { %2737 = dma.hbm_to_vmem [thread:$0]  (!%p3309_p6), %s448_s23, 4096, %s450_s18, [#allocation13], %s3180_s14, %s3180_s14, %s3181_s3  }
  0x2c   : > { %p50_p9 = scmp.eq.s32.totalorder %s3170_s16, 0  ;;  %p55_p10 = scmp.ne.s32.totalorder %s3162_s30, %s3158_s29 }
  0x2d   : > { %p357_p11 = scmp.eq.s32.totalorder %s3292_s20, 1  ;;  %p363_p2 = scmp.eq.s32.totalorder %s2180_s24, 1 }
  0x2e   : > { %s3346_s22 = scalar_select %p40_p8, %s3166_s15, %s42_s17  }
  0x2f   : > { %p3348_p12 = por %p50_p9, %p49_p7  ;;  %p3354_p13 = por %p56_p1, %p55_p10 }
  0x30   : > { %3697 = sst [smem:[#allocation25_spill]] %s3346_s22  ;;  %p3358_p0 = por %p357_p11, %p49_p7 }
  0x31   : > { %p2754_p4 = scmp.lt.s32.totalorder %s3170_s16, 2  ;;  %s3364_s14 = sand.u32 1, %s3166_s15  }
  0x32   : > { %p3366_p6 = por %p363_p2, %p55_p10  ;;  %s2188_s12 = sshll.u32 %s3364_s14, 4 }
  0x33   : > { %s2596_s19 = sshll.u32 %s3170_s16, 4  ;;  %s476_s28 = scalar_lea.vmem [#allocation3], %s2188_s12 }
  0x34   : > { %s3701_s3 = scalar_select %p3366_p6, 1, 0 }
  0x35   : > { %s481_s18 = scalar_lea.hbm %s3658_s0, %s2596_s19  ;;  %s484_s4 = sshll.u32 %s476_s28, 4  ;;  %s485_s4 = int_to_ptr.vmem [resolvable:$true] %s484_s4 }
  0x36   : > { %3702 = sst [smem:[#allocation26_spill]] %s3701_s3  ;;  %s482_s17 = sshll.u32 %s481_s18, 4  ;;  %s483_s17 = int_to_ptr.hbm [resolvable:$true] %s482_s17 }
  0x37   : > { %p3377_p7 = pnand %p2754_p4, %p3348_p12  ;;  %s494_s8 = sand.u32 1, %s3170_s16  }
  0x38   : > { %s473_s10 = scalar_lea.sflag [#allocation4], %s3364_s14  ;;  %s3028_s22 = sshra.s32 %s483_s17, 4  ;;  %s3029_s22 = int_to_ptr.hbm [resolvable:$true] %s3028_s22 }
  0x39   : > { %s3030_s15 = scalar_lea.hbm %s3029_s22, 16  ;;  %p3032_p9 = pneg %p3377_p7 }
  0x3a   : > { %p3031_p8 = scmp.ne.s32.totalorder %s3029_s22, %s3030_s15  ;;  %s3035_s19 = scalar_lea.hbm %s3658_s0, 32 }
  0x3b   : > { %p3036_p12 = scmp.lt.s32.totalorder %s3029_s22, %s3658_s0  ;;  %p3037_p2 = scmp.lt.s32.totalorder %s3035_s19, %s3030_s15 }
  0x3c   : > { %p3033_p10 = pnand %p3032_p9, %p3031_p8 }
  0x3d   : > { %p3038_p4 = por %p3037_p2, %p3036_p12 }
  0x3e   : > { %p3034_p11 = pneg %p3033_p10 }
  0x40   : > { %p3039_p5 = pnand %p3038_p4, %p3034_p11 }
  0x42   : > { %3042 = shalt.err (!%p3039_p5)
}
  0x43   : > { %s3183_s18 = smov 128   ;;  %s3184_s28 = smov 8  }
  0x44   : > { %2741 = dma.hbm_to_vmem [thread:$0]  (!%p3377_p7), %s483_s17, 256, %s485_s4, %s473_s10, %s3183_s18, %s3183_s18, %s3184_s28  }
  0x45   : > { %s500_s12 = scalar_lea.hbm %s3659_s1, %s3170_s16  ;;  %s497_s29 = scalar_lea.vmem [#allocation6], %s3364_s14 }
  0x46   : > { %s502_s13 = sshll.u32 %s500_s12, 4  ;;  %s504_s23 = sshll.u32 %s497_s29, 4  ;;  %s503_s13 = int_to_ptr.hbm [resolvable:$true] %s502_s13  ;;  %s505_s23 = int_to_ptr.vmem [resolvable:$true] %s504_s23 }
  0x47   : > { %s495_s15 = scalar_lea.sflag [#allocation7], %s494_s8  ;;  %s3058_s22 = sshra.s32 %s503_s13, 4  ;;  %s3059_s22 = int_to_ptr.hbm [resolvable:$true] %s3058_s22 }
  0x48   : > { %s3060_s19 = scalar_lea.hbm %s3059_s22, 1  ;;  %s3065_s10 = scalar_lea.hbm %s3659_s1, 2 }
  0x49   : > { %p3061_p5 = scmp.ne.s32.totalorder %s3059_s22, %s3060_s19  ;;  %p3066_p11 = scmp.lt.s32.totalorder %s3059_s22, %s3659_s1 }
  0x4a   : > { %p3067_p12 = scmp.lt.s32.totalorder %s3065_s10, %s3060_s19 }
  0x4b   : > { %p3063_p8 = pnand %p3061_p5, %p3032_p9 }
  0x4c   : > { %p3068_p2 = por %p3067_p12, %p3066_p11 }
  0x4d   : > { %p3064_p10 = pneg %p3063_p8 }
  0x4f   : > { %p3069_p4 = pnand %p3068_p2, %p3064_p10 }
  0x51   : > { %3072 = shalt.err (!%p3069_p4)
}
  0x52   : > { %2744 = dma.hbm_to_vmem [thread:$0]  (!%p3377_p7), %s503_s13, 16, %s505_s23, %s495_s15  }
  0x53   : > { %513 = sbr.rel (%p3297_p3) target bundleno = 2393 (0x959), region = 76  ;;  %s3415_s8 = sand.u32 (!%p3297_p3), 1, %s3162_s30  }
  0x54   : > { %s2192_s29 = sshll.u32 (!%p3297_p3), %s3415_s8, 4  ;;  %s516_s14 = scalar_lea.sflag (!%p3297_p3), [#allocation4], %s3415_s8 }
  0x55   : > { %s3421_s17 = scalar_lea.vmem (!%p3297_p3), [#allocation3], %s2192_s29 }
  0x58   : > { %3133 = dma.done.wait (%p3354_p13), %s516_s14, 256  }
  0x59   : > { %3135 = vsyncadd (%p3354_p13), %s516_s14, 4294967040  ;;  %s525_s21 = sand.u32 1, %s3292_s20   ;;  %s528_s18 = scalar_lea.vmem [#allocation6], %s3415_s8 }
  0x5a   : > { %s526_s24 = scalar_lea.sflag [#allocation7], %s525_s21 }
  0x5b   : > { %3137 = dma.done.wait (%p3354_p13), %s526_s24, 16  }
  0x5c   : > { %3139 = vsyncadd (%p3354_p13), %s526_s24, 4294967280 }
  0x5d   : > { %3141 = dma.done.wait (%p56_p1), [#allocation7], 3072  }
  0x5e   : > { %3143 = vsyncadd (%p56_p1), [#allocation7], 4294964224 }
  0x5f   : > { %3145 = dma.done.wait (%p56_p1), [#allocation10], 1072  }
  0x60   : > { %3147 = vsyncadd (%p56_p1), [#allocation10], 4294966224 }
  0x61   : > { %3149 = dma.done.wait (%p56_p1), [#allocation13], 8192  }
  0x62   : > { %3151 = vsyncadd (%p56_p1), [#allocation13], 4294959104  ;;  %v2285_v0 = vld [vmem:[#allocation8 + $0xa8] sm:$0xf]  ;;  %v2619_v1 = vld [vmem:[#allocation8 + $0xb0] sm:$0xf0] }
  0x63   : > { %v2618_v2 = vld [vmem:[#allocation8 + $0xac] sm:$0xf]  ;;  %v2286_v3 = vor.u32 %v2619_v1, %v2285_v0  ;;  %v2287_v4 = vld [vmem:[#allocation8 + $0xb4] sm:$0xf0]  ;;  %v2273_v5 = vld [vmem:[#allocation8 + $0x90] sm:$0xf] }
  0x64   : > { %v2616_v6 = vld [vmem:[#allocation8 + $0x98] sm:$0xf0]  ;;  %v2290_v7 = vor.u32 %v2618_v2, %v2287_v4  ;;  %v2615_v8 = vld [vmem:[#allocation8 + $0x94] sm:$0xf]  ;;  %v2275_v9 = vld [vmem:[#allocation8 + $0x9c] sm:$0xf0] }
  0x65   : > { %776 = vmatpush.bf16.msra.mxu0 %v2286_v3  ;;  %v2274_v10 = vor.u32 %v2616_v6, %v2273_v5  ;;  %v2278_v11 = vor.u32 %v2615_v8, %v2275_v9  ;;  %v2261_v12 = vld [vmem:[#allocation8 + $0x78] sm:$0xf]  ;;  %v2613_v13 = vld [vmem:[#allocation8 + $0x80] sm:$0xf0]  ;;  %v2612_v14 = vld [vmem:[#allocation8 + $0x7c] sm:$0xf] }
  0x66   : > { %790 = vmatpush.bf16.msra.mxu1 %v2290_v7  ;;  %v2263_v15 = vld [vmem:[#allocation8 + $0x84] sm:$0xf0]  ;;  %v2262_v16 = vor.u32 %v2613_v13, %v2261_v12  ;;  %v2249_v18 = vld [vmem:[#allocation8 + $0x60] sm:$0xf]  ;;  %v2610_v19 = vld [vmem:[#allocation8 + $0x68] sm:$0xf0] }
  0x67   : > { %v2266_v17 = vor.u32 %v2612_v14, %v2263_v15  ;;  %v2609_v20 = vld [vmem:[#allocation8 + $0x64] sm:$0xf]  ;;  %v2251_v21 = vld [vmem:[#allocation8 + $0x6c] sm:$0xf0]  ;;  %v2250_v22 = vor.u32 %v2610_v19, %v2249_v18  ;;  %v2237_v23 = vld [vmem:[#allocation8 + $0x48] sm:$0xf] }
  0x68   : > { %v2293_v24 = vld [vmem:[#allocation8 + $0xb0] sm:$0xf]  ;;  %v2620_v25 = vld [vmem:[#allocation8 + $0xb8] sm:$0xf0]  ;;  %v2254_v26 = vor.u32 %v2609_v20, %v2251_v21  ;;  %v2607_v27 = vld [vmem:[#allocation8 + $0x50] sm:$0xf0] }
  0x69   : > { %777 = vmatpush.bf16.msra.mxu0 %v2274_v10  ;;  %v2294_v28 = vor.u32 %v2620_v25, %v2293_v24  ;;  %v2281_v29 = vld [vmem:[#allocation8 + $0x98] sm:$0xf]  ;;  %v2617_v30 = vld [vmem:[#allocation8 + $0xa0] sm:$0xf0]  ;;  %v2606_v31 = vld [vmem:[#allocation8 + $0x4c] sm:$0xf]  ;;  %v2238_v34 = vor.u32 %v2607_v27, %v2237_v23 }
  0x6a   : > { %791 = vmatpush.bf16.msra.mxu1 %v2278_v11  ;;  %v2239_v32 = vld [vmem:[#allocation8 + $0x54] sm:$0xf0]  ;;  %v2282_v33 = vor.u32 %v2617_v30, %v2281_v29  ;;  %v2269_v35 = vld [vmem:[#allocation8 + $0x80] sm:$0xf]  ;;  %v2614_v36 = vld [vmem:[#allocation8 + $0x88] sm:$0xf0] }
  0x6b   : > { %804 = vmatpush.bf16.msra.mxu2 %v2294_v28  ;;  %v2242_v37 = vor.u32 %v2606_v31, %v2239_v32  ;;  %v2225_v38 = vld [vmem:[#allocation8 + $0x30] sm:$0xf]  ;;  %v2604_v39 = vld [vmem:[#allocation8 + $0x38] sm:$0xf0]  ;;  %v2603_v40 = vld [vmem:[#allocation8 + $0x34] sm:$0xf]  ;;  %v2270_v42 = vor.u32 %v2614_v36, %v2269_v35 }
  0x6c   : > { %v2227_v41 = vld [vmem:[#allocation8 + $0x3c] sm:$0xf0]  ;;  %v2226_v43 = vor.u32 %v2604_v39, %v2225_v38  ;;  %v2257_v44 = vld [vmem:[#allocation8 + $0x68] sm:$0xf]  ;;  %v2611_v45 = vld [vmem:[#allocation8 + $0x70] sm:$0xf0] }
  0x6d   : > { %778 = vmatpush.bf16.msra.mxu0 %v2262_v16  ;;  %v2230_v46 = vor.u32 %v2603_v40, %v2227_v41  ;;  %v2213_v47 = vld [vmem:[#allocation8 + $0x18] sm:$0xf]  ;;  %v2601_v48 = vld [vmem:[#allocation8 + $0x20] sm:$0xf0]  ;;  %v2600_v49 = vld [vmem:[#allocation8 + $0x1c] sm:$0xf]  ;;  %v2258_v51 = vor.u32 %v2611_v45, %v2257_v44 }
  0x6e   : > { %792 = vmatpush.bf16.msra.mxu1 %v2266_v17  ;;  %v2215_v50 = vld [vmem:[#allocation8 + $0x24] sm:$0xf0]  ;;  %v2214_v52 = vor.u32 %v2601_v48, %v2213_v47  ;;  %v2245_v53 = vld [vmem:[#allocation8 + $0x50] sm:$0xf]  ;;  %v2608_v54 = vld [vmem:[#allocation8 + $0x58] sm:$0xf0]  ;;  %v820_v48 = vlaneseq }
  0x6f   : > { %805 = vmatpush.bf16.msra.mxu2 %v2282_v33  ;;  %v2218_v55 = vor.u32 %v2600_v49, %v2215_v50  ;;  %v2201_v56 = vld [vmem:[#allocation8] sm:$0xf]  ;;  %v2598_v57 = vld [vmem:[#allocation8 + $0x8] sm:$0xf0]  ;;  %v2597_v58 = vld [vmem:[#allocation8 + $0x4] sm:$0xf]  ;;  %v2246_v61 = vor.u32 %v2608_v54, %v2245_v53 }
  0x70   : > { %v2203_v59 = vld [vmem:[#allocation8 + $0xc] sm:$0xf0]  ;;  %v2202_v62 = vor.u32 %v2598_v57, %v2201_v56  ;;  %v3449_v63 = vld [vmem:[%s3421_s17 + $0x8] sm:$0xff]  ;;  %v2221_v5 = vld [vmem:[#allocation8 + $0x20] sm:$0xf]  ;;  %vm865_vm0 = vcmask 261120  }
  0x71   : > { %779 = vmatpush.bf16.msra.mxu0 %v2250_v22  ;;  %v3446_v60 = vld [vmem:[%s3421_s17] sm:$0xff]  ;;  %v2233_v0 = vld [vmem:[#allocation8 + $0x38] sm:$0xf]  ;;  %v2206_v2 = vor.u32 %v2597_v58, %v2203_v59  ;;  %v2209_v8 = vld [vmem:[#allocation8 + $0x8] sm:$0xf]  ;;  %s3185_s27 = smov 96  }
  0x72   : > { %793 = vmatpush.bf16.msra.mxu1 %v2254_v26  ;;  %v2605_v1 = vld [vmem:[#allocation8 + $0x40] sm:$0xf0]  ;;  %v607_v3 = vpack.c.bf16 %v3449_v63, %v3446_v60  ;;  %v2602_v6 = vld [vmem:[#allocation8 + $0x28] sm:$0xf0]  ;;  %v2599_v9 = vld [vmem:[#allocation8 + $0x10] sm:$0xf0] }
  0x73   : > { %806 = vmatpush.bf16.msra.mxu2 %v2270_v42  ;;  %v2234_v4 = vor.u32 %v2605_v1, %v2233_v0  ;;  %v2222_v7 = vor.u32 %v2602_v6, %v2221_v5  ;;  %v2210_v10 = vor.u32 %v2599_v9, %v2209_v8  ;;  %v640_v11 = vld [vmem:[#allocation9] sm:$0x7]  ;;  %s3186_s28 = smov 64   ;;  %s3187_s12 = smov 32   ;;  %v3469_v47 = vld [vmem:[%s528_s18] sm:$0x1] }
  0x74   : > { %v643_v14 = vperm.slane %v640_v11, 1  ;;  %v642_v15 = vperm.slane %v640_v11, 0  ;;  %v644_v30 = vperm.slane %v640_v11, 2  ;;  %vm827_vm1 = vcmp.gt.f32.partialorder %v3469_v47, 0.5  ;;  %s3704_s18 = sld [smem:[#allocation32_spill]]  ;;  %s602_s26 = scalar_lea.vmem [#allocation15], %s2192_s29 }
  0x75   : > { %780 = vmatpush.bf16.msra.mxu0 %v2238_v34  ;;  %v3188_v49 = vmov 0   ;;  %vm886_vm5 = vcmask 130048   ;;  %vm836_vm8 = vcmask 122880   ;;  %vm1010_vm9 = vcmask 523520   ;;  %s3706_s22 = sld [smem:[#allocation34_spill]]  ;;  %s2038_s4 = sshll.u32 %s602_s26, 4  ;;  %s2039_s4 = int_to_ptr.vmem [resolvable:$true] %s2038_s4 }
  0x76   : > { %794 = vmatpush.bf16.msra.mxu1 %v2242_v37  ;;  %v828_v50 = vsel %vm827_vm1, 1, %v3188_v49  ;;  %vm1088_vm10 = vcmask 785920   ;;  %vm1166_vm11 = vcmask 1048320  }
  0x77   : > { %807 = vmatpush.bf16.msra.mxu2 %v2258_v51  ;;  %v821_v51 = vshrl.u32 %v820_v48, 7  ;;  %v829_v53 = vperm.slane %v828_v50, 0 }
  0x79   : > { %781 = vmatpush.bf16.msra.mxu0 %v2226_v43  ;;  %vm830_vm3 = vcmp.eq.s32.totalorder %v829_v53, 1  ;;  %v822_v54 = vadd.s32 8, %v821_v51 }
  0x7a   : > { %795 = vmatpush.bf16.msra.mxu1 %v2230_v46 }
  0x7b   : > { %808 = vmatpush.bf16.msra.mxu2 %v2246_v61  ;;  %s3108_s17 = scalar_lea.hbm %s3706_s22, 32 }
  0x7d   : > { %782 = vmatpush.bf16.msra.mxu0 %v2214_v52  ;;  %v824_v52 = vand.u32 127, %v820_v48 }
  0x7e   : > { %796 = vmatpush.bf16.msra.mxu1 %v2218_v55  ;;  %v3189_v55 = vmov 0.0  }
  0x7f   : > { %809 = vmatpush.bf16.msra.mxu2 %v2234_v4  ;;  %vm825_vm2 = vcmp.gt.s32.totalorder %v824_v52, %v821_v51  ;;  %vm826_vm6 = vcmp.gt.s32.totalorder %v824_v52, %v822_v54 }
  0x80   : > { %vm831_vm4 = vmor %vm825_vm2, %vm830_vm3 }
  0x81   : > { %783 = vmatpush.bf16.msra.mxu0 %v2202_v62  ;;  %v3475_v56 = vsel %vm831_vm4, -1e+30, %v3189_v55  ;;  %vm832_vm7 = vmor %vm826_vm6, %vm830_vm3 }
  0x82   : > { %797 = vmatpush.bf16.msra.mxu1 %v2206_v2  ;;  %v3480_v61 = vsel %vm832_vm7, -1e+30, %v3189_v55 }
  0x83   : > { %810 = vmatpush.bf16.msra.mxu2 %v2222_v7 }
  0x84   : > { %784 = vmatmul.bf16.vlgmr.msra.gmra.mxu0 %v607_v3 }
  0x85   : > { %798 = vmatmul.bf16.vlgmr.msra.gmra.mxu1 %v607_v3 }
  0x87   : > { %811 = vmatpush.bf16.msra.mxu2 %v2210_v10 }
  0x8a   : > { %812 = vmatmul.bf16.vlgmr.msra.gmra.mxu2 %v607_v3 }
 0x101   : > { %v785_v12 = vpop.f32.mrf.mxu0 }
 0x102   : > { %v799_v13 = vpop.f32.mrf.mxu1  ;;  %v786_v20 = vadd.f32 %v785_v12, %v642_v15 }
 0x103   : > { %v800_v16 = vadd.f32 %v799_v13, %v643_v14 }
 0x104   : > { %v818_v25 = vmul.f32 0.17677669, %v786_v20 }
 0x105   : > { %v851_v21 = vpack.c.bf16 %v800_v16, %v800_v16 }
 0x106   : > { %v849_v32 = vpack.c.bf16 %v818_v25, %v818_v25 }
 0x107   : > { %v862_v26 = vunpack.c.l.b16 %v851_v21 }
 0x108   : > { %v857_v36 = vunpack.c.l.b16 %v849_v32 }
 0x109   : > { %v787_v17 = vpop.f32.mrf.mxu0 }
 0x10a   : > { %v788_v18 = vadd.f32 %v787_v17, %v642_v15  ;;  %v801_v19 = vpop.f32.mrf.mxu1 }
 0x10b   : > { %v802_v22 = vadd.f32 %v801_v19, %v643_v14 }
 0x10c   : > { %v819_v23 = vmul.f32 0.17677669, %v788_v18 }
 0x10d   : > { %v852_v24 = vpack.c.bf16 %v802_v22, %v802_v22  ;;  %v813_v31 = vpop.f32.mrf.mxu2 }
 0x10e   : > { %v850_v28 = vpack.c.bf16 %v819_v23, %v819_v23  ;;  %v814_v35 = vadd.f32 %v813_v31, %v644_v30 }
 0x10f   : > { %v863_v27 = vunpack.c.l.b16 %v852_v24 }
 0x110   : > { %v858_v34 = vunpack.c.l.b16 %v850_v28  ;;  %v853_v38 = vpack.c.bf16 %v814_v35, %v814_v35 }
 0x111   : > { %v3453_v29 = vpack.c.b16 %v863_v27, %v862_v26 }
 0x112   : > { %v859_v37 = vpack.c.b16 %v858_v34, %v857_v36  ;;  %v912_v41 = vunpack.c.l.b16 %v853_v38 }
 0x113   : > { %937 = vrot.lane.b32.xlu2 %v3453_v29, %s3185_s27  ;;  %v870_v33 = vsel %vm865_vm0, %v3453_v29, 0 }
 0x114   : > { %879 = vmatpush.bf16.xpose.msra.mxu3 %v870_v33 }
 0x115   : > { %v815_v39 = vpop.f32.mrf.mxu2 }
 0x116   : > { %v816_v40 = vadd.f32 %v815_v39, %v644_v30 }
 0x118   : > { %v854_v42 = vpack.c.bf16 %v816_v40, %v816_v40 }
 0x11a   : > { %v913_v43 = vunpack.c.l.b16 %v854_v42 }
 0x11b   : > { %935 = vrot.lane.b32.xlu2 %v859_v37, %s3185_s27  ;;  %2295 = vmatmul.msk.bf16.vlgmr.msra.gmra.mxu3 %vm865_vm0, %v859_v37 }
 0x11c   : > { %v3461_v44 = vpack.c.b16 %v913_v43, %v912_v41 }
 0x11e   : > { %926 = vmatpush.bf16.msrb.mxu3 %v3461_v44 }
 0x123   : > { %1013 = vrot.lane.b32.xlu2 %v859_v37, %s3186_s28 }
 0x12b   : > { %1091 = vrot.lane.b32.xlu2 %v859_v37, %s3187_s12 }
 0x16d   : > { %v938_v45 = vpop.permute.xlu2 %937 }
 0x16e   : > { %v943_v46 = vsel %vm865_vm0, %v938_v45, 0 }
 0x16f   : > { %952 = vmatpush.bf16.xpose.msra.mxu3 %v943_v46 }
 0x175   : > { %v936_v12 = vpop.permute.xlu2 %935 }
 0x17d   : > { %v1014_v15 = vpop.permute.xlu2 %1013 }
 0x185   : > { %v1092_v28 = vpop.permute.xlu2 %1091 }
 0x19e   : > { %v881_v57 = vpop.f32.mrf.mxu3 }
 0x19f   : > { %v882_v58 = vadd.f32 %v881_v57, %v3475_v56 }
 0x1a1   : > { %v887_v59 = vsel %vm886_vm5, %v882_v58, -inf }
 0x1a2   : > { %888 = vmax.xlane.f32.xlu0 %v887_v59 }
 0x1a6   : > { %v883_v62 = vpop.f32.mrf.mxu3 }
 0x1a7   : > { %v884_v0 = vadd.f32 %v883_v62, %v3480_v61 }
 0x1a9   : > { %v890_v1 = vsel %vm886_vm5, %v884_v0, -inf }
 0x1aa   : > { %891 = vmax.xlane.f32.xlu0 %v890_v1 }
 0x1be   : > { %1015 = vrot.lane.b32.xlu0 %v3453_v29, %s3186_s28 }
 0x215   : > { %v889_v2 = vpop.xlane.xlu0 %888 }
 0x216   : > { %v893_v3 = vsub.f32 %v882_v58, %v889_v2 }
 0x218   : > { %v895_v4 = vmul.f32 1.442695, %v893_v3 }
 0x21a   : > { %2820 = vpow2.f32 %v895_v4 }
 0x21d   : > { %v892_v5 = vpop.xlane.xlu0 %891 }
 0x21e   : > { %v894_v6 = vsub.f32 %v884_v0, %v892_v5 }
 0x220   : > { %v2821_v7 = vpop.eup %2820  ;;  %v897_v8 = vmul.f32 1.442695, %v894_v6 }
 0x221   : > { %v899_v9 = vsel %vm886_vm5, %v2821_v7, 0.0 }
 0x222   : > { %2822 = vpow2.f32 %v897_v8  ;;  %900 = vadd.xlane.f32.xlu1 %v899_v9 }
 0x228   : > { %v2823_v10 = vpop.eup %2822 }
 0x229   : > { %v902_v11 = vsel %vm886_vm5, %v2823_v10, 0.0 }
 0x22a   : > { %903 = vadd.xlane.f32.xlu1 %v902_v11 }
 0x230   : > { %v1016_v13 = vpop.permute.xlu0 %1015 }
 0x231   : > { %v1021_v14 = vsel %vm865_vm0, %v1016_v13, 0 }
 0x232   : > { %1030 = vmatpush.bf16.xpose.msrb.mxu2 %v1021_v14 }
 0x239   : > { %2299 = vmatmul.msk.bf16.vlgmr.msrb.gmra.mxu2 %vm865_vm0, %v1014_v15 }
 0x243   : > { %1093 = vrot.lane.b32.xlu1 %v3453_v29, %s3187_s12 }
 0x295   : > { %v901_v16 = vpop.xlane.xlu1 %900 }
 0x296   : > { %2824 = vrcp.f32 %v901_v16 }
 0x29c   : > { %v2825_v18 = vpop.eup %2824 }
 0x29d   : > { %v904_v17 = vpop.xlane.xlu1 %903  ;;  %v907_v20 = vmul.f32 %v2825_v18, %v2821_v7 }
 0x29e   : > { %2826 = vrcp.f32 %v904_v17 }
 0x2a4   : > { %v2827_v19 = vpop.eup %2826 }
 0x2a5   : > { %v908_v21 = vmul.f32 %v2827_v19, %v2823_v10 }
 0x2a7   : > { %v909_v22 = vpack.c.bf16 %v908_v21, %v907_v20  ;;  %v835_v21 = vsel %vm827_vm1, 1.0, %v3189_v55 }
 0x2a9   : > { %2296 = vmatmul.msk.bf16.vlgmr.msrb.gmra.mxu3 %vm886_vm5, %v909_v22 }
 0x2b5   : > { %v1094_v23 = vpop.permute.xlu1 %1093 }
 0x2b6   : > { %v1099_v24 = vsel %vm865_vm0, %v1094_v23, 0  ;;  %v837_v23 = vsel %vm836_vm8, %v835_v21, inf  ;;  %v3190_v21 = vmov 128.0  }
 0x2b7   : > { %1108 = vmatpush.bf16.xpose.msrb.mxu3 %v1099_v24 }
 0x2b9   : > { %2297 = vmatmul.msk.bf16.vlgmr.msra.gmra.mxu3 %vm865_vm0, %v936_v12 }
 0x2bc   : > { %v1032_v25 = vpop.f32.mrf.mxu2 }
 0x2bd   : > { %v1033_v26 = vadd.f32 %v1032_v25, %v3475_v56 }
 0x2bf   : > { %v1037_v27 = vsel %vm886_vm5, %v1033_v26, -inf }
 0x2c0   : > { %1038 = vmax.xlane.f32.xlu1 %v1037_v27 }
 0x2c4   : > { %v1034_v39 = vpop.f32.mrf.mxu2 }
 0x2c5   : > { %v1035_v40 = vadd.f32 %v1034_v39, %v3480_v61 }
 0x2c7   : > { %v1040_v45 = vsel %vm886_vm5, %v1035_v40, -inf }
 0x2c9   : > { %2301 = vmatmul.msk.bf16.vlgmr.msrb.gmra.mxu3 %vm865_vm0, %v1092_v28 }
 0x32c   : > { %v928_v29 = vpop.f32.mrf.mxu3 }
 0x32d   : > { %933 = vst.msk [vmem:[#allocation2] sm:$0xff] %vm865_vm0, %v928_v29 }
 0x333   : > { %v1039_v30 = vpop.xlane.xlu1 %1038 }
 0x334   : > { %v1043_v31 = vsub.f32 %v1033_v26, %v1039_v30  ;;  %v930_v32 = vpop.f32.mrf.mxu3 }
 0x335   : > { %934 = vst.msk [vmem:[#allocation2 + $0x8] sm:$0xff] %vm865_vm0, %v930_v32 }
 0x336   : > { %v1045_v33 = vmul.f32 1.442695, %v1043_v31 }
 0x338   : > { %2828 = vpow2.f32 %v1045_v33 }
 0x33c   : > { %v954_v34 = vpop.f32.mrf.mxu3 }
 0x33d   : > { %v955_v35 = vadd.f32 %v954_v34, %v3475_v56 }
 0x33e   : > { %v3501_v36 = vpop.eup %2828 }
 0x33f   : > { %v959_v37 = vsel %vm886_vm5, %v955_v35, -inf  ;;  %v1049_v38 = vsel %vm886_vm5, %v3501_v36, 0.0 }
 0x340   : > { %960 = vmax.xlane.f32.xlu2 %v959_v37  ;;  %1050 = vadd.xlane.f32.xlu1 %v1049_v38 }
 0x344   : > { %v956_v41 = vpop.f32.mrf.mxu3 }
 0x345   : > { %v957_v42 = vadd.f32 %v956_v41, %v3480_v61 }
 0x347   : > { %v962_v43 = vsel %vm886_vm5, %v957_v42, -inf }
 0x348   : > { %963 = vmax.xlane.f32.xlu0 %v962_v43  ;;  %1041 = vmax.xlane.f32.xlu2 %v1040_v45 }
 0x34c   : > { %v1110_v46 = vpop.f32.mrf.mxu3 }
 0x34d   : > { %v1111_v48 = vadd.f32 %v1110_v46, %v3475_v56 }
 0x34f   : > { %v1115_v49 = vsel %vm886_vm5, %v1111_v48, -inf }
 0x350   : > { %1116 = vmax.xlane.f32.xlu0 %v1115_v49 }
 0x354   : > { %v1112_v50 = vpop.f32.mrf.mxu3 }
 0x355   : > { %v1113_v51 = vadd.f32 %v1112_v50, %v3480_v61 }
 0x357   : > { %v1118_v52 = vsel %vm886_vm5, %v1113_v51, -inf }
 0x358   : > { %1119 = vmax.xlane.f32.xlu2 %v1118_v52 }
 0x370   : > { %982 = vrot.lane.b32.xlu2 %v3461_v44, %s3185_s27 }
 0x399   : > { %838 = vmin.xlane.f32.xlu2 %v837_v23 }
 0x3b3   : > { %v961_v53 = vpop.xlane.xlu2 %960  ;;  %v1051_v18 = vpop.xlane.xlu1 %1050 }
 0x3b4   : > { %v965_v54 = vsub.f32 %v955_v35, %v961_v53 }
 0x3b6   : > { %v967_v57 = vmul.f32 1.442695, %v965_v54 }
 0x3b8   : > { %2830 = vpow2.f32 %v967_v57  ;;  %v2628_v57 = vld [vmem:[#allocation11 + $0x38] sm:$0xff] }
 0x3b9   : > { %1243 = vmatpush.bf16.msrb.mxu1 %v2628_v57  ;;  %v2443_v57 = vld [vmem:[#allocation12 + $0xd8] sm:$0xf0] }
 0x3bb   : > { %v1042_v58 = vpop.xlane.xlu2 %1041  ;;  %v964_v59 = vpop.xlane.xlu0 %963 }
 0x3bc   : > { %v1044_v62 = vsub.f32 %v1035_v40, %v1042_v58  ;;  %v966_v1 = vsub.f32 %v957_v42, %v964_v59  ;;  %v2627_v58 = vld [vmem:[#allocation11 + $0x30] sm:$0xff]  ;;  %v2626_v59 = vld [vmem:[#allocation11 + $0x28] sm:$0xff] }
 0x3bd   : > { %1244 = vmatpush.bf16.msrb.mxu1 %v2627_v58 }
 0x3be   : > { %v2831_v56 = vpop.eup %2830  ;;  %v1047_v0 = vmul.f32 1.442695, %v1044_v62  ;;  %v969_v61 = vmul.f32 1.442695, %v966_v1  ;;  %v2625_v62 = vld [vmem:[#allocation11 + $0x20] sm:$0xff]  ;;  %v2622_v1 = vld [vmem:[#allocation11 + $0x8] sm:$0xff] }
 0x3bf   : > { %v971_v2 = vsel %vm886_vm5, %v2831_v56, 0.0 }
 0x3c0   : > { %2832 = vpow2.f32 %v1047_v0  ;;  %972 = vadd.xlane.f32.xlu1 %v971_v2  ;;  %v2623_v0 = vld [vmem:[#allocation11 + $0x10] sm:$0xff]  ;;  %v2621_v2 = vld [vmem:[#allocation11] sm:$0xff] }
 0x3c1   : > { %2834 = vpow2.f32 %v969_v61  ;;  %1245 = vmatpush.bf16.msrb.mxu1 %v2626_v59  ;;  %v2417_v59 = vld [vmem:[#allocation12 + $0xa0] sm:$0xf] }
 0x3c3   : > { %v1117_v3 = vpop.xlane.xlu0 %1116 }
 0x3c4   : > { %v1121_v4 = vsub.f32 %v1111_v48, %v1117_v3 }
 0x3c5   : > { %1246 = vmatpush.bf16.msrb.mxu1 %v2625_v62  ;;  %v2651_v62 = vld [vmem:[#allocation12 + $0xac] sm:$0xf0] }
 0x3c6   : > { %v2833_v5 = vpop.eup %2832  ;;  %v1123_v6 = vmul.f32 1.442695, %v1121_v4 }
 0x3c7   : > { %v1052_v7 = vsel %vm886_vm5, %v2833_v5, 0.0  ;;  %v2835_v9 = vpop.eup %2834 }
 0x3c8   : > { %2836 = vpow2.f32 %v1123_v6  ;;  %1053 = vadd.xlane.f32.xlu0 %v1052_v7  ;;  %v974_v13 = vsel %vm886_vm5, %v2835_v9, 0.0 }
 0x3cb   : > { %v1120_v8 = vpop.xlane.xlu2 %1119 }
 0x3cc   : > { %v1122_v10 = vsub.f32 %v1113_v51, %v1120_v8 }
 0x3ce   : > { %v2837_v11 = vpop.eup %2836  ;;  %v1125_v12 = vmul.f32 1.442695, %v1122_v10 }
 0x3cf   : > { %v1127_v14 = vsel %vm886_vm5, %v2837_v11, 0.0 }
 0x3d0   : > { %2838 = vpow2.f32 %v1125_v12  ;;  %975 = vadd.xlane.f32.xlu0 %v974_v13  ;;  %1128 = vadd.xlane.f32.xlu1 %v1127_v14  ;;  %v2814_v14 = vld [vmem:[%s3663_s5] ss:$0 sm:$0xff] }
 0x3d3   : > { %v983_v15 = vpop.permute.xlu2 %982 }
 0x3d4   : > { %995 = vmatpush.bf16.msrb.mxu0 %v983_v15 }
 0x3d6   : > { %v2839_v16 = vpop.eup %2838 }
 0x3d7   : > { %v1130_v17 = vsel %vm886_vm5, %v2839_v16, 0.0 }
 0x3d8   : > { %1131 = vadd.xlane.f32.xlu0 %v1130_v17 }
 0x3e9   : > { %1060 = vrot.lane.b32.xlu1 %v3461_v44, %s3186_s28 }
 0x3ec   : > { %1138 = vrot.lane.b32.xlu0 %v3461_v44, %s3187_s12 }
 0x40c   : > { %v839_v41 = vpop.xlane.xlu2 %838 }
 0x40d   : > { %v840_v42 = vrot.slane %v839_v41, 4 }
 0x40f   : > { %v841_v45 = vmin.f32 %v839_v41, %v840_v42  ;;  %v2658_v41 = vld [vmem:[#allocation12 + $0xec] sm:$0xf]  ;;  %v2459_v42 = vld [vmem:[#allocation12 + $0xf8] sm:$0xf0] }
 0x411   : > { %v842_v46 = vrot.slane %v841_v45, 2 }
 0x413   : > { %v843_v49 = vmin.f32 %v841_v45, %v842_v46  ;;  %v2433_v45 = vld [vmem:[#allocation12 + $0xc0] sm:$0xf]  ;;  %v2655_v46 = vld [vmem:[#allocation12 + $0xcc] sm:$0xf0] }
 0x433   : > { %v973_v20 = vpop.xlane.xlu1 %972 }
 0x434   : > { %2840 = vrcp.f32 %v973_v20 }
 0x43a   : > { %v2841_v24 = vpop.eup %2840 }
 0x43b   : > { %v1054_v19 = vpop.xlane.xlu0 %1053  ;;  %v979_v26 = vmul.f32 %v2841_v24, %v2831_v56  ;;  %v2624_v56 = vld [vmem:[#allocation11 + $0x18] sm:$0xff] }
 0x43c   : > { %1247 = vmatpush.bf16.msrb.mxu1 %v2624_v56  ;;  %v2649_v56 = vld [vmem:[#allocation12 + $0xa4] sm:$0xf] }
 0x440   : > { %1248 = vmatpush.bf16.msrb.mxu1 %v2623_v0  ;;  %v2418_v0 = vor.u32 %v2651_v62, %v2417_v59 }
 0x443   : > { %v976_v22 = vpop.xlane.xlu0 %975  ;;  %v1129_v29 = vpop.xlane.xlu1 %1128 }
 0x444   : > { %2842 = vrcp.f32 %v976_v22  ;;  %1249 = vmatpush.bf16.msrb.mxu1 %v2622_v1  ;;  %v2419_v1 = vld [vmem:[#allocation12 + $0xb0] sm:$0xf0] }
 0x445   : > { %2844 = vrcp.f32 %v1054_v19 }
 0x446   : > { %2846 = vrcp.f32 %v1051_v18 }
 0x448   : > { %1250 = vmatpush.bf16.msrb.mxu1 %v2621_v2  ;;  %v2425_v2 = vld [vmem:[#allocation12 + $0xa8] sm:$0xf] }
 0x44a   : > { %v2843_v25 = vpop.eup %2842 }
 0x44b   : > { %v980_v27 = vmul.f32 %v2843_v25, %v2835_v9  ;;  %v1132_v44 = vpop.xlane.xlu0 %1131  ;;  %v2845_v47 = vpop.eup %2844 }
 0x44c   : > { %2848 = vrcp.f32 %v1132_v44  ;;  %v2847_v55 = vpop.eup %2846  ;;  %v1058_v31 = vmul.f32 %v2845_v47, %v2833_v5 }
 0x44d   : > { %v981_v28 = vpack.c.bf16 %v980_v27, %v979_v26  ;;  %2850 = vrcp.f32 %v1129_v29  ;;  %v1057_v33 = vmul.f32 %v2847_v55, %v3501_v36  ;;  %v844_v36 = vrot.slane %v843_v49, 1 }
 0x44e   : > { %2852 = vrcp.f32 %v3190_v21  ;;  %v2643_v21 = vld [vmem:[#allocation12 + $0x6c] sm:$0xf0] }
 0x44f   : > { %2298 = vmatmul.msk.bf16.vlgmr.msrb.gmra.mxu0 %vm886_vm5, %v981_v28  ;;  %v1059_v37 = vpack.c.bf16 %v1058_v31, %v1057_v33  ;;  %v845_v50 = vmin.f32 %v843_v49, %v844_v36  ;;  %v2449_v31 = vld [vmem:[#allocation12 + $0xe0] sm:$0xf]  ;;  %v2657_v33 = vld [vmem:[#allocation12 + $0xe4] sm:$0xf]  ;;  %v2434_v49 = vor.u32 %v2655_v46, %v2433_v45  ;;  %v2435_v36 = vld [vmem:[#allocation12 + $0xd0] sm:$0xf0] }
 0x450   : > { %v2635_v45 = vld [vmem:[#allocation12 + $0x2c] sm:$0xf0]  ;;  %v2633_v46 = vld [vmem:[#allocation12 + $0x24] sm:$0xf] }
 0x451   : > { %2694 = vpush %v845_v50  ;;  %v2441_v50 = vld [vmem:[#allocation12 + $0xc8] sm:$0xf] }
 0x452   : > { %v2849_v30 = vpop.eup %2848 }
 0x453   : > { %v2851_v32 = vpop.eup %2850  ;;  %v1136_v35 = vmul.f32 %v2849_v30, %v2839_v16 }
 0x454   : > { %v1135_v38 = vmul.f32 %v2851_v32, %v2837_v11  ;;  %v2853_v22 = vpop.eup %2852  ;;  %v2659_v32 = vld [vmem:[#allocation12 + $0xec] sm:$0xf0] }
 0x455   : > { %v1264_v23 = vmul.f32 128.0, %v2853_v22  ;;  %vm1268_vm12 = vweird.f32 %v2853_v22 }
 0x456   : > { %v1137_v40 = vpack.c.bf16 %v1136_v35, %v1135_v38  ;;  %v2451_v35 = vld [vmem:[#allocation12 + $0xf0] sm:$0xf0]  ;;  %v2660_v38 = vld [vmem:[#allocation12 + $0xf4] sm:$0xf0] }
 0x457   : > { %v1265_v24 = vsub.f32 1.0, %v1264_v23 }
 0x459   : > { %v1266_v25 = vmul.f32 %v2853_v22, %v1265_v24  ;;  %v2387_v24 = vld [vmem:[#allocation12 + $0x70] sm:$0xf0] }
 0x45b   : > { %v1061_v34 = vpop.permute.xlu1 %1060  ;;  %v1267_v26 = vadd.f32 %v2853_v22, %v1266_v25  ;;  %v2393_v25 = vld [vmem:[#allocation12 + $0x68] sm:$0xf] }
 0x45c   : > { %1073 = vmatpush.bf16.msra.mxu2 %v1061_v34  ;;  %v2450_v34 = vor.u32 %v2659_v32, %v2449_v31  ;;  %v2639_v31 = vld [vmem:[#allocation12 + $0x4c] sm:$0xf0]  ;;  %v2637_v32 = vld [vmem:[#allocation12 + $0x44] sm:$0xf] }
 0x45d   : > { %v3543_v27 = vsel %vm1268_vm12, %v2853_v22, %v1267_v26  ;;  %v2641_v22 = vld [vmem:[#allocation12 + $0x64] sm:$0xf]  ;;  %v2644_v26 = vld [vmem:[#allocation12 + $0x74] sm:$0xf0] }
 0x45e   : > { %v1139_v39 = vpop.permute.xlu0 %1138 }
 0x45f   : > { %2300 = vmatmul.msk.bf16.vlgmr.msra.gmra.mxu2 %vm886_vm5, %v1059_v37  ;;  %1151 = vmatpush.bf16.msra.mxu0 %v1139_v39  ;;  %v2457_v37 = vld [vmem:[#allocation12 + $0xe8] sm:$0xf]  ;;  %v2454_v39 = vor.u32 %v2657_v33, %v2451_v35 }
 0x460   : > { %1521 = vmatpush.bf16.msrb.mxu2 %v2450_v34  ;;  %v2371_v34 = vld [vmem:[#allocation12 + $0x50] sm:$0xf0]  ;;  %v2377_v35 = vld [vmem:[#allocation12 + $0x48] sm:$0xf] }
 0x461   : > { %1535 = vmatpush.bf16.msra.mxu3 %v2454_v39 }
 0x462   : > { %2302 = vmatmul.msk.bf16.vlgmr.msra.gmra.mxu0 %vm886_vm5, %v1137_v40  ;;  %v2458_v40 = vor.u32 %v2660_v38, %v2457_v37  ;;  %v2640_v37 = vld [vmem:[#allocation12 + $0x54] sm:$0xf0]  ;;  %v2374_v38 = vor.u32 %v2637_v32, %v2371_v34 }
 0x463   : > { %v2378_v39 = vor.u32 %v2640_v37, %v2377_v35  ;;  %v2692_v34 = vld [vmem:[#allocation14 + $0xf8] sm:$0xff]  ;;  %v2691_v35 = vld [vmem:[#allocation14 + $0xf0] sm:$0xff] }
 0x464   : > { %1549 = vmatpush.bf16.msrb.mxu0 %v2458_v40  ;;  %1522 = vmatpush.bf16.msrb.mxu2 %v2434_v49  ;;  %v2638_v40 = vld [vmem:[#allocation12 + $0x4c] sm:$0xf]  ;;  %v2355_v49 = vld [vmem:[#allocation12 + $0x30] sm:$0xf0]  ;;  %v2668_v37 = vld [vmem:[#allocation14 + $0x38] sm:$0xff] }
 0x468   : > { %1523 = vmatpush.bf16.msrb.mxu2 %v2418_v0  ;;  %v2629_v0 = vld [vmem:[#allocation12 + $0x4] sm:$0xf] }
 0x482   : > { %s2695_s13 = spop %2694 }
 0x483   : > { %p847_p1 = scmp.gt.f32.partialorder %s2695_s13, 0.0  ;;  %s2693_s13 = sshll.u32 %s3292_s20, 4 }
 0x484   : > { %s2037_s19 = scalar_lea.hbm %s3706_s22, %s2693_s13  ;;  %s2026_s20 = scalar_lea.sflag [#allocation5], %s3415_s8 }
 0x485   : > { %s848_s23 = scalar_select %p847_p1, 0.0, 1.0 }
 0x486   : > { %s2040_s10 = sshll.u32 %s2037_s19, 4  ;;  %s2041_s10 = int_to_ptr.hbm [resolvable:$true] %s2040_s10 }
 0x487   : > { %v1171_v9 = vstv %s848_s23  ;;  %s3102_s25 = sshra.s32 %s2041_s10, 4  ;;  %s3103_s25 = int_to_ptr.hbm [resolvable:$true] %s3102_s25 }
 0x488   : > { %s3104_s3 = scalar_lea.hbm %s3103_s25, 16  ;;  %p3109_p9 = scmp.lt.s32.totalorder %s3103_s25, %s3706_s22 }
 0x489   : > { %p3105_p3 = scmp.ne.s32.totalorder %s3103_s25, %s3104_s3  ;;  %p3110_p5 = scmp.lt.s32.totalorder %s3108_s17, %s3104_s3 }
 0x48b   : > { %p3106_p13 = pnand %p3105_p3, %p3358_p0  ;;  %p3111_p8 = por %p3110_p5, %p3109_p9 }
 0x48d   : > { %p3107_p7 = pneg %p3106_p13 }
 0x48f   : > { %p3112_p10 = pnand %p3111_p8, %p3107_p7 }
 0x4cc   : > { %v997_v43 = vpop.f32.mrf.mxu0 }
 0x4d4   : > { %v999_v51 = vpop.f32.mrf.mxu0 }
 0x4df   : > { %v1153_v53 = vpop.f32.mrf.mxu0 }
 0x4e2   : > { %v1075_v48 = vpop.f32.mrf.mxu2 }
 0x4e3   : > { %1082 = vrot.lane.b32.xlu0 %v1075_v48, %s3186_s28  ;;  %v2653_v48 = vld [vmem:[#allocation12 + $0xc4] sm:$0xf] }
 0x4e7   : > { %v1155_v54 = vpop.f32.mrf.mxu0 }
 0x4ea   : > { %v1077_v52 = vpop.f32.mrf.mxu2 }
 0x4eb   : > { %1084 = vrot.lane.b32.xlu1 %v1077_v52, %s3186_s28  ;;  %1004 = vrot.lane.b32.xlu0 %v997_v43, %s3187_s12  ;;  %v2462_v43 = vor.u32 %v2658_v41, %v2459_v42  ;;  %v2438_v52 = vor.u32 %v2653_v48, %v2435_v36  ;;  %v2379_v41 = vld [vmem:[#allocation12 + $0x58] sm:$0xf0]  ;;  %v2361_v36 = vld [vmem:[#allocation12 + $0x28] sm:$0xf] }
 0x4ec   : > { %v2382_v42 = vor.u32 %v2638_v40, %v2379_v41  ;;  %v2690_v40 = vld [vmem:[#allocation14 + $0xe8] sm:$0xff]  ;;  %v2667_v41 = vld [vmem:[#allocation14 + $0x30] sm:$0xff] }
 0x4ed   : > { %1563 = vmatpush.bf16.msra.mxu1 %v2462_v43  ;;  %1536 = vmatpush.bf16.msra.mxu3 %v2438_v52  ;;  %v2353_v43 = vld [vmem:[#allocation12 + $0x20] sm:$0xf]  ;;  %v2358_v52 = vor.u32 %v2633_v46, %v2355_v49  ;;  %v2666_v46 = vld [vmem:[#allocation14 + $0x28] sm:$0xff]  ;;  %v2680_v49 = vld [vmem:[#allocation14 + $0x98] sm:$0xff] }
 0x4ee   : > { %v2354_v48 = vor.u32 %v2635_v45, %v2353_v43  ;;  %v2681_v43 = vld [vmem:[#allocation14 + $0xa0] sm:$0xff] }
 0x4ef   : > { %v2689_v45 = vld [vmem:[#allocation14 + $0xe0] sm:$0xff] }
 0x4f3   : > { %1006 = vrot.lane.b32.xlu1 %v999_v51, %s3187_s12  ;;  %1160 = vrot.lane.b32.xlu0 %v1153_v53, %s3185_s27  ;;  %v2656_v51 = vld [vmem:[#allocation12 + $0xd4] sm:$0xf0]  ;;  %s3705_s12 = sld [smem:[#allocation33_spill]] }
 0x4f4   : > { %v2442_v53 = vor.u32 %v2656_v51, %v2441_v50  ;;  %v2636_v50 = vld [vmem:[#allocation12 + $0x34] sm:$0xf0] }
 0x4f6   : > { %1550 = vmatpush.bf16.msrb.mxu0 %v2442_v53  ;;  %v2362_v53 = vor.u32 %v2636_v50, %v2361_v36  ;;  %v2688_v36 = vld [vmem:[#allocation14 + $0xd8] sm:$0xff]  ;;  %v2665_v50 = vld [vmem:[#allocation14 + $0x20] sm:$0xff] }
 0x4fb   : > { %1162 = vrot.lane.b32.xlu1 %v1155_v54, %s3185_s27  ;;  %v2654_v54 = vld [vmem:[#allocation12 + $0xcc] sm:$0xf] }
 0x4fc   : > { %v2446_v58 = vor.u32 %v2654_v54, %v2443_v57  ;;  %v2634_v54 = vld [vmem:[#allocation12 + $0x2c] sm:$0xf]  ;;  %v2363_v57 = vld [vmem:[#allocation12 + $0x38] sm:$0xf0] }
 0x4fd   : > { %v2366_v62 = vor.u32 %v2634_v54, %v2363_v57  ;;  %v2664_v54 = vld [vmem:[#allocation14 + $0x18] sm:$0xff] }
 0x4fe   : > { %1564 = vmatpush.bf16.msra.mxu1 %v2446_v58  ;;  %v2337_v58 = vld [vmem:[#allocation12] sm:$0xf]  ;;  %v2672_v57 = vld [vmem:[#allocation14 + $0x58] sm:$0xff] }
 0x555   : > { %v1083_v61 = vpop.permute.xlu0 %1082 }
 0x55d   : > { %v1085_v3 = vpop.permute.xlu1 %1084  ;;  %v1005_v4 = vpop.permute.xlu0 %1004 }
 0x55e   : > { %1011 = vst.msk [vmem:[#allocation2] sm:$0xff] %vm1010_vm9, %v1005_v4 }
 0x55f   : > { %1089 = vst.msk [vmem:[#allocation2] sm:$0xff] %vm1088_vm10, %v1083_v61  ;;  %v2652_v61 = vld [vmem:[#allocation12 + $0xb4] sm:$0xf0] }
 0x560   : > { %v2426_v4 = vor.u32 %v2652_v61, %v2425_v2 }
 0x562   : > { %1551 = vmatpush.bf16.msrb.mxu0 %v2426_v4  ;;  %v2632_v4 = vld [vmem:[#allocation12 + $0x14] sm:$0xf0] }
 0x565   : > { %v1007_v5 = vpop.permute.xlu1 %1006  ;;  %v1161_v6 = vpop.permute.xlu0 %1160 }
 0x566   : > { %1012 = vst.msk [vmem:[#allocation2 + $0x8] sm:$0xff] %vm1010_vm9, %v1007_v5  ;;  %v2650_v5 = vld [vmem:[#allocation12 + $0xac] sm:$0xf] }
 0x567   : > { %1167 = vst.msk [vmem:[#allocation2] sm:$0xff] %vm1166_vm11, %v1161_v6  ;;  %v2427_v6 = vld [vmem:[#allocation12 + $0xb8] sm:$0xf0] }
 0x568   : > { %1090 = vst.msk [vmem:[#allocation2 + $0x8] sm:$0xff] %vm1088_vm10, %v1085_v3  ;;  %v2422_v3 = vor.u32 %v2649_v56, %v2419_v1  ;;  %v2631_v56 = vld [vmem:[#allocation12 + $0xc] sm:$0xf0]  ;;  %v2339_v1 = vld [vmem:[#allocation12 + $0x10] sm:$0xf0] }
 0x569   : > { %v2338_v2 = vor.u32 %v2631_v56, %v2337_v58  ;;  %v2342_v61 = vor.u32 %v2629_v0, %v2339_v1  ;;  %v2678_v58 = vld [vmem:[#allocation14 + $0x88] sm:$0xff]  ;;  %v2663_v56 = vld [vmem:[#allocation14 + $0x10] sm:$0xff]  ;;  %v2677_v1 = vld [vmem:[#allocation14 + $0x80] sm:$0xff] }
 0x56a   : > { %1537 = vmatpush.bf16.msra.mxu3 %v2422_v3  ;;  %v2345_v3 = vld [vmem:[#allocation12 + $0x8] sm:$0xf]  ;;  %v2671_v0 = vld [vmem:[#allocation14 + $0x50] sm:$0xff] }
 0x56d   : > { %v1163_v7 = vpop.permute.xlu1 %1162 }
 0x56e   : > { %1168 = vst.msk [vmem:[#allocation2 + $0x8] sm:$0xff] %vm1166_vm11, %v1163_v7  ;;  %v1169_v8 = vld [vmem:[#allocation2] sm:$0xff]  ;;  %v2430_v7 = vor.u32 %v2650_v5, %v2427_v6 }
 0x56f   : > { %v1172_v11 = vmul.f32 %v1171_v9, %v1169_v8  ;;  %v2401_v8 = vld [vmem:[#allocation12 + $0x80] sm:$0xf]  ;;  %v2630_v5 = vld [vmem:[#allocation12 + $0xc] sm:$0xf] }
 0x570   : > { %1565 = vmatpush.bf16.msra.mxu1 %v2430_v7  ;;  %v2346_v7 = vor.u32 %v2632_v4, %v2345_v3  ;;  %v2662_v4 = vld [vmem:[#allocation14 + $0x8] sm:$0xff] }
 0x575   : > { %v1170_v10 = vld [vmem:[#allocation2 + $0x8] sm:$0xff] }
 0x576   : > { %v1173_v12 = vmul.f32 %v1171_v9, %v1170_v10  ;;  %v2647_v9 = vld [vmem:[#allocation12 + $0x8c] sm:$0xf0]  ;;  %v2645_v10 = vld [vmem:[#allocation12 + $0x84] sm:$0xf] }
 0x578   : > { %v1174_v13 = vpack.c.bf16 %v1173_v12, %v1172_v11  ;;  %v2402_v11 = vor.u32 %v2647_v9, %v2401_v8  ;;  %v2403_v12 = vld [vmem:[#allocation12 + $0x90] sm:$0xf0]  ;;  %v2347_v8 = vld [vmem:[#allocation12 + $0x18] sm:$0xf0] }
 0x579   : > { %v2350_v9 = vor.u32 %v2630_v5, %v2347_v8  ;;  %v2670_v5 = vld [vmem:[#allocation14 + $0x48] sm:$0xff] }
 0x57a   : > { %1251 = vmatmul.bf16.vlgmr.msrb.gmra.mxu1 %v1174_v13  ;;  %v2409_v13 = vld [vmem:[#allocation12 + $0x88] sm:$0xf]  ;;  %1524 = vmatpush.bf16.msrb.mxu2 %v2402_v11 }
 0x5f7   : > { %v1252_v15 = vpop.f32.mrf.mxu1 }
 0x5f8   : > { %v1253_v16 = vadd.f32 %v2814_v14, %v1252_v15  ;;  %v2406_v15 = vor.u32 %v2645_v10, %v2403_v12 }
 0x5fa   : > { %v1257_v17 = vadd.f32 %v1253_v16, %v3446_v60  ;;  %1538 = vmatpush.bf16.msra.mxu3 %v2406_v15 }
 0x5fc   : > { %1259 = vadd.xlane.f32.xlu0 %v1257_v17 }
 0x5ff   : > { %v1254_v18 = vpop.f32.mrf.mxu1 }
 0x600   : > { %v1255_v19 = vadd.f32 %v2814_v14, %v1254_v18  ;;  %v2648_v14 = vld [vmem:[#allocation12 + $0x94] sm:$0xf0]  ;;  %v2411_v18 = vld [vmem:[#allocation12 + $0x98] sm:$0xf0] }
 0x601   : > { %v2410_v16 = vor.u32 %v2648_v14, %v2409_v13 }
 0x602   : > { %v1258_v20 = vadd.f32 %v1255_v19, %v3449_v63 }
 0x603   : > { %1552 = vmatpush.bf16.msrb.mxu0 %v2410_v16 }
 0x604   : > { %1261 = vadd.xlane.f32.xlu2 %v1258_v20 }
 0x66f   : > { %v1260_v28 = vpop.xlane.xlu0 %1259 }
 0x670   : > { %v1270_v44 = vmul.f32 %v3543_v27, %v1260_v28  ;;  %v2390_v28 = vor.u32 %v2641_v22, %v2387_v24 }
 0x672   : > { %v3546_v60 = vsub.f32 %v1257_v17, %v1270_v44  ;;  %v2646_v17 = vld [vmem:[#allocation12 + $0x8c] sm:$0xf]  ;;  %v2394_v44 = vor.u32 %v2644_v26, %v2393_v25  ;;  %1539 = vmatpush.bf16.msra.mxu3 %v2390_v28  ;;  %v2815_v26 = vld [vmem:[%s3664_s6] ss:$0 sm:$0xff] }
 0x673   : > { %v2414_v19 = vor.u32 %v2646_v17, %v2411_v18 }
 0x674   : > { %v1274_v29 = vmul.f32 %v3546_v60, %v3546_v60  ;;  %1553 = vmatpush.bf16.msrb.mxu0 %v2394_v44 }
 0x675   : > { %1566 = vmatpush.bf16.msra.mxu1 %v2414_v19 }
 0x676   : > { %1276 = vadd.xlane.f32.xlu1 %v1274_v29  ;;  %v2642_v29 = vld [vmem:[#allocation12 + $0x6c] sm:$0xf]  ;;  %1540 = vmatpush.bf16.msra.mxu3 %v2374_v38  ;;  %v2676_v38 = vld [vmem:[#allocation14 + $0x78] sm:$0xff] }
 0x677   : > { %v1262_v63 = vpop.xlane.xlu2 %1261 }
 0x678   : > { %v1271_v47 = vmul.f32 %v3543_v27, %v1262_v63  ;;  %v2395_v63 = vld [vmem:[#allocation12 + $0x78] sm:$0xf0]  ;;  %1554 = vmatpush.bf16.msrb.mxu0 %v2378_v39  ;;  %v2682_v39 = vld [vmem:[#allocation14 + $0xa8] sm:$0xff] }
 0x67a   : > { %v3551_v55 = vsub.f32 %v1258_v20, %v1271_v47  ;;  %v2385_v20 = vld [vmem:[#allocation12 + $0x60] sm:$0xf]  ;;  %v2398_v47 = vor.u32 %v2642_v29, %v2395_v63  ;;  %1541 = vmatpush.bf16.msra.mxu3 %v2358_v52  ;;  %v2679_v52 = vld [vmem:[#allocation14 + $0x90] sm:$0xff] }
 0x67b   : > { %v2386_v23 = vor.u32 %v2643_v21, %v2385_v20 }
 0x67c   : > { %v1275_v30 = vmul.f32 %v3551_v55, %v3551_v55  ;;  %1567 = vmatpush.bf16.msra.mxu1 %v2398_v47  ;;  %1555 = vmatpush.bf16.msrb.mxu0 %v2362_v53  ;;  %v2816_v47 = vld [vmem:[%s3665_s7] ss:$0 sm:$0xff]  ;;  %v2687_v53 = vld [vmem:[#allocation14 + $0xd0] sm:$0xff] }
 0x67d   : > { %1525 = vmatpush.bf16.msrb.mxu2 %v2386_v23 }
 0x67e   : > { %1278 = vadd.xlane.f32.xlu2 %v1275_v30  ;;  %v2369_v30 = vld [vmem:[#allocation12 + $0x40] sm:$0xf]  ;;  %1542 = vmatpush.bf16.msra.mxu3 %v2342_v61 }
 0x67f   : > { %v2370_v33 = vor.u32 %v2639_v31, %v2369_v30 }
 0x680   : > { %1568 = vmatpush.bf16.msra.mxu1 %v2382_v42  ;;  %1556 = vmatpush.bf16.msrb.mxu0 %v2346_v7  ;;  %v2675_v42 = vld [vmem:[#allocation14 + $0x70] sm:$0xff] }
 0x681   : > { %1526 = vmatpush.bf16.msrb.mxu2 %v2370_v33  ;;  %v2684_v33 = vld [vmem:[#allocation14 + $0xb8] sm:$0xff] }
 0x682   : > { %1927 = vmatpush.bf16.msrb.mxu3 %v2676_v38 }
 0x684   : > { %1569 = vmatpush.bf16.msra.mxu1 %v2366_v62  ;;  %1941 = vmatpush.bf16.msra.mxu0 %v2684_v33  ;;  %v3574_v62 = vld [vmem:[%s3667_s9] sm:$0xf] }
 0x685   : > { %1527 = vmatpush.bf16.msrb.mxu2 %v2354_v48  ;;  %v2674_v48 = vld [vmem:[#allocation14 + $0x68] sm:$0xff]  ;;  %v1355_v61 = vperm.slane %v3574_v62, 2  ;;  %v1356_v3 = vperm.slane %v3574_v62, 3 }
 0x686   : > { %1928 = vmatpush.bf16.msrb.mxu3 %v2675_v42 }
 0x688   : > { %1570 = vmatpush.bf16.msra.mxu1 %v2350_v9 }
 0x689   : > { %1528 = vmatpush.bf16.msrb.mxu2 %v2338_v2  ;;  %v2685_v2 = vld [vmem:[#allocation14 + $0xc0] sm:$0xff] }
 0x68a   : > { %1929 = vmatpush.bf16.msrb.mxu3 %v2674_v48 }
 0x68c   : > { %1955 = vmatpush.bf16.msrb.mxu1 %v2692_v34 }
 0x68d   : > { %1913 = vmatpush.bf16.msra.mxu2 %v2668_v37 }
 0x690   : > { %1956 = vmatpush.bf16.msrb.mxu1 %v2691_v35 }
 0x691   : > { %1914 = vmatpush.bf16.msra.mxu2 %v2667_v41 }
 0x694   : > { %1957 = vmatpush.bf16.msrb.mxu1 %v2690_v40 }
 0x695   : > { %1915 = vmatpush.bf16.msra.mxu2 %v2666_v46 }
 0x698   : > { %1958 = vmatpush.bf16.msrb.mxu1 %v2689_v45 }
 0x699   : > { %1916 = vmatpush.bf16.msra.mxu2 %v2665_v50 }
 0x69c   : > { %1959 = vmatpush.bf16.msrb.mxu1 %v2688_v36 }
 0x69d   : > { %1917 = vmatpush.bf16.msra.mxu2 %v2664_v54 }
 0x6a0   : > { %1960 = vmatpush.bf16.msrb.mxu1 %v2687_v53 }
 0x6a1   : > { %1918 = vmatpush.bf16.msra.mxu2 %v2663_v56 }
 0x6a5   : > { %1919 = vmatpush.bf16.msra.mxu2 %v2662_v4 }
 0x6e9   : > { %v1277_v51 = vpop.xlane.xlu1 %1276 }
 0x6ea   : > { %v1280_v59 = vmul.f32 %v1277_v51, %v3543_v27  ;;  %v2673_v51 = vld [vmem:[#allocation14 + $0x60] sm:$0xff] }
 0x6eb   : > { %1930 = vmatpush.bf16.msrb.mxu3 %v2673_v51 }
 0x6ec   : > { %v1282_v6 = vadd.f32 1e-05, %v1280_v59  ;;  %v2686_v59 = vld [vmem:[#allocation14 + $0xc8] sm:$0xff] }
 0x6ed   : > { %1961 = vmatpush.bf16.msrb.mxu1 %v2686_v59 }
 0x6ee   : > { %2854 = vrsqrt.f32 %v1282_v6  ;;  %vm1290_vm14 = vweird.f32 %v1282_v6 }
 0x6ef   : > { %1931 = vmatpush.bf16.msrb.mxu3 %v2672_v57 }
 0x6f1   : > { %v1279_v10 = vpop.xlane.xlu2 %1278  ;;  %1962 = vmatpush.bf16.msrb.mxu1 %v2685_v2 }
 0x6f2   : > { %v1281_v11 = vmul.f32 %v1279_v10, %v3543_v27  ;;  %v1353_v10 = vperm.slane %v3574_v62, 0 }
 0x6f3   : > { %1932 = vmatpush.bf16.msrb.mxu3 %v2671_v0 }
 0x6f4   : > { %v2855_v12 = vpop.eup %2854  ;;  %v1283_v13 = vadd.f32 1e-05, %v1281_v11  ;;  %v1354_v11 = vperm.slane %v3574_v62, 1 }
 0x6f5   : > { %v1285_v14 = vmul.f32 %v2855_v12, %v1282_v6  ;;  %vm1291_vm13 = vweird.f32 %v2855_v12 }
 0x6f6   : > { %2856 = vrsqrt.f32 %v1283_v13  ;;  %vm1292_vm15 = vmor %vm1290_vm14, %vm1291_vm13  ;;  %vm1300_vm1 = vweird.f32 %v1283_v13 }
 0x6f7   : > { %v1286_v15 = vmul.f32 %v2855_v12, %v1285_v14  ;;  %1933 = vmatpush.bf16.msrb.mxu3 %v2670_v5  ;;  %v2661_v14 = vld [vmem:[#allocation14] sm:$0xff] }
 0x6f8   : > { %1920 = vmatpush.bf16.msra.mxu2 %v2661_v14 }
 0x6f9   : > { %v1287_v16 = vmul.f32 0.5, %v1286_v15  ;;  %v2669_v15 = vld [vmem:[#allocation14 + $0x40] sm:$0xff] }
 0x6fb   : > { %v1288_v17 = vsub.f32 1.5, %v1287_v16  ;;  %1934 = vmatpush.bf16.msrb.mxu3 %v2669_v15 }
 0x6fc   : > { %v2857_v18 = vpop.eup %2856 }
 0x6fd   : > { %v1289_v19 = vmul.f32 %v2855_v12, %v1288_v17  ;;  %v1295_v20 = vmul.f32 %v2857_v18, %v1283_v13  ;;  %vm1301_vm0 = vweird.f32 %v2857_v18 }
 0x6fe   : > { %vm1302_vm2 = vmor %vm1300_vm1, %vm1301_vm0 }
 0x6ff   : > { %v1296_v21 = vmul.f32 %v2857_v18, %v1295_v20  ;;  %v1293_v22 = vsel %vm1292_vm15, %v2855_v12, %v1289_v19 }
 0x700   : > { %v1304_v25 = vmul.f32 %v1293_v22, %v3546_v60 }
 0x701   : > { %v1297_v23 = vmul.f32 0.5, %v1296_v21 }
 0x702   : > { %v1310_v63 = vmul.f32 %v2815_v26, %v1304_v25 }
 0x703   : > { %v1298_v24 = vsub.f32 1.5, %v1297_v23 }
 0x704   : > { %v3565_v31 = vadd.f32 %v2816_v47, %v1310_v63 }
 0x705   : > { %v1299_v28 = vmul.f32 %v2857_v18, %v1298_v24 }
 0x707   : > { %v1303_v44 = vsel %vm1302_vm2, %v2857_v18, %v1299_v28 }
 0x708   : > { %v1305_v29 = vmul.f32 %v1303_v44, %v3551_v55  ;;  %v2683_v55 = vld [vmem:[#allocation14 + $0xb0] sm:$0xff] }
 0x709   : > { %1942 = vmatpush.bf16.msra.mxu0 %v2683_v55 }
 0x70a   : > { %v1311_v30 = vmul.f32 %v2815_v26, %v1305_v29 }
 0x70c   : > { %v3567_v32 = vadd.f32 %v2816_v47, %v1311_v30 }
 0x70d   : > { %1943 = vmatpush.bf16.msra.mxu0 %v2682_v39 }
 0x70e   : > { %v1318_v60 = vpack.c.bf16 %v3567_v32, %v3565_v31 }
 0x710   : > { %1529 = vmatmul.bf16.vlgmr.msrb.gmra.mxu2 %v1318_v60  ;;  %1543 = vmatmul.bf16.vlgmr.msra.gmra.mxu3 %v1318_v60 }
 0x711   : > { %1557 = vmatmul.bf16.vlgmr.msrb.gmra.mxu0 %v1318_v60  ;;  %1571 = vmatmul.bf16.vlgmr.msra.gmra.mxu1 %v1318_v60 }
 0x712   : > { %1944 = vmatpush.bf16.msra.mxu0 %v2681_v43 }
 0x716   : > { %1945 = vmatpush.bf16.msra.mxu0 %v2680_v49 }
 0x71a   : > { %1946 = vmatpush.bf16.msra.mxu0 %v2679_v52 }
 0x71e   : > { %1947 = vmatpush.bf16.msra.mxu0 %v2678_v58 }
 0x722   : > { %1948 = vmatpush.bf16.msra.mxu0 %v2677_v1 }
 0x78e   : > { %v1558_v6 = vpop.f32.mrf.mxu0  ;;  %v1572_v7 = vpop.f32.mrf.mxu1 }
 0x78f   : > { %v3578_v8 = vadd.f32 %v1558_v6, %v1355_v61  ;;  %v3580_v9 = vadd.f32 %v1572_v7, %v1356_v3 }
 0x791   : > { %v1587_v12 = vmul.f32 0.044715, %v3578_v8  ;;  %v1588_v13 = vmul.f32 0.044715, %v3580_v9  ;;  %v1579_v14 = vmul.f32 0.5, %v3578_v8 }
 0x793   : > { %v1595_v16 = vmul.f32 %v1587_v12, %v3578_v8  ;;  %v1596_v17 = vmul.f32 %v1588_v13, %v3580_v9  ;;  %v1530_v18 = vpop.f32.mrf.mxu2  ;;  %v1544_v19 = vpop.f32.mrf.mxu3 }
 0x794   : > { %v3588_v20 = vadd.f32 %v1530_v18, %v1353_v10  ;;  %v3590_v21 = vadd.f32 %v1544_v19, %v1354_v11  ;;  %v1580_v18 = vmul.f32 0.5, %v3580_v9 }
 0x795   : > { %v1603_v22 = vmul.f32 %v1595_v16, %v3578_v8  ;;  %v1604_v23 = vmul.f32 %v1596_v17, %v3580_v9 }
 0x796   : > { %v1585_v24 = vmul.f32 0.044715, %v3588_v20  ;;  %v1586_v25 = vmul.f32 0.044715, %v3590_v21  ;;  %v1560_v26 = vpop.f32.mrf.mxu0  ;;  %v1574_v28 = vpop.f32.mrf.mxu1 }
 0x797   : > { %v1611_v44 = vadd.f32 %v1603_v22, %v3578_v8  ;;  %v1561_v29 = vadd.f32 %v1560_v26, %v1355_v61  ;;  %v1575_v63 = vadd.f32 %v1574_v28, %v1356_v3  ;;  %v1612_v47 = vadd.f32 %v1604_v23, %v3580_v9 }
 0x798   : > { %v1593_v30 = vmul.f32 %v1585_v24, %v3588_v20  ;;  %v1594_v60 = vmul.f32 %v1586_v25, %v3590_v21 }
 0x799   : > { %v1591_v33 = vmul.f32 0.044715, %v1561_v29  ;;  %v1592_v35 = vmul.f32 0.044715, %v1575_v63  ;;  %v1619_v37 = vmul.f32 0.7978846, %v1611_v44 }
 0x79a   : > { %v1601_v34 = vmul.f32 %v1593_v30, %v3588_v20  ;;  %v1602_v55 = vmul.f32 %v1594_v60, %v3590_v21  ;;  %v1620_v41 = vmul.f32 0.7978846, %v1612_v47  ;;  %v1583_v15 = vmul.f32 0.5, %v1561_v29 }
 0x79b   : > { %v1599_v38 = vmul.f32 %v1591_v33, %v1561_v29  ;;  %v1532_v39 = vpop.f32.mrf.mxu2  ;;  %v1546_v40 = vpop.f32.mrf.mxu3  ;;  %v1600_v43 = vmul.f32 %v1592_v35, %v1575_v63  ;;  %2858 = vtanh.f32 %v1619_v37  ;;  %v1584_v19 = vmul.f32 0.5, %v1575_v63 }
 0x79c   : > { %v1609_v42 = vadd.f32 %v1601_v34, %v3588_v20  ;;  %v1533_v45 = vadd.f32 %v1532_v39, %v1353_v10  ;;  %v1610_v46 = vadd.f32 %v1602_v55, %v3590_v21  ;;  %v1547_v49 = vadd.f32 %v1546_v40, %v1354_v11 }
 0x79d   : > { %v1607_v48 = vmul.f32 %v1599_v38, %v1561_v29  ;;  %v1608_v50 = vmul.f32 %v1600_v43, %v1575_v63  ;;  %2860 = vtanh.f32 %v1620_v41  ;;  %v1577_v34 = vmul.f32 0.5, %v3588_v20  ;;  %v2817_v20 = vld [vmem:[%s3669_s11] ss:$0 sm:$0xff] }
 0x79e   : > { %v1617_v36 = vmul.f32 0.7978846, %v1609_v42  ;;  %v1589_v51 = vmul.f32 0.044715, %v1533_v45  ;;  %v1590_v53 = vmul.f32 0.044715, %v1547_v49 }
 0x79f   : > { %v1615_v52 = vadd.f32 %v1607_v48, %v1561_v29  ;;  %v1616_v54 = vadd.f32 %v1608_v50, %v1575_v63  ;;  %v1618_v58 = vmul.f32 0.7978846, %v1610_v46  ;;  %v1581_v8 = vmul.f32 0.5, %v1533_v45 }
 0x7a0   : > { %v1597_v57 = vmul.f32 %v1589_v51, %v1533_v45  ;;  %v1598_v62 = vmul.f32 %v1590_v53, %v1547_v49  ;;  %2862 = vtanh.f32 %v1617_v36  ;;  %v1578_v55 = vmul.f32 0.5, %v3590_v21 }
 0x7a1   : > { %v1623_v59 = vmul.f32 0.7978846, %v1615_v52  ;;  %v1624_v56 = vmul.f32 0.7978846, %v1616_v54  ;;  %v2859_v61 = vpop.eup %2858  ;;  %v1582_v9 = vmul.f32 0.5, %v1547_v49 }
 0x7a2   : > { %v1605_v0 = vmul.f32 %v1597_v57, %v1533_v45  ;;  %v1606_v1 = vmul.f32 %v1598_v62, %v1547_v49  ;;  %v1635_v10 = vadd.f32 1.0, %v2859_v61 }
 0x7a3   : > { %2864 = vtanh.f32 %v1623_v59  ;;  %v2861_v4 = vpop.eup %2860 }
 0x7a4   : > { %v1613_v2 = vadd.f32 %v1605_v0, %v1533_v45  ;;  %2866 = vtanh.f32 %v1624_v56  ;;  %v1614_v3 = vadd.f32 %v1606_v1, %v1547_v49  ;;  %v1636_v12 = vadd.f32 1.0, %v2861_v4 }
 0x7a5   : > { %2868 = vtanh.f32 %v1618_v58  ;;  %v1643_v23 = vmul.f32 %v1635_v10, %v1579_v14 }
 0x7a6   : > { %v1621_v5 = vmul.f32 0.7978846, %v1613_v2  ;;  %v1622_v6 = vmul.f32 0.7978846, %v1614_v3  ;;  %v2863_v7 = vpop.eup %2862  ;;  %v1644_v25 = vmul.f32 %v1636_v12, %v1580_v18 }
 0x7a7   : > { %v1633_v28 = vadd.f32 1.0, %v2863_v7 }
 0x7a8   : > { %2870 = vtanh.f32 %v1621_v5 }
 0x7a9   : > { %v2865_v11 = vpop.eup %2864  ;;  %2872 = vtanh.f32 %v1622_v6  ;;  %v1641_v35 = vmul.f32 %v1633_v28, %v1577_v34 }
 0x7aa   : > { %v2867_v13 = vpop.eup %2866  ;;  %v1639_v16 = vadd.f32 1.0, %v2865_v11 }
 0x7ab   : > { %v2869_v17 = vpop.eup %2868  ;;  %v1640_v22 = vadd.f32 1.0, %v2867_v13 }
 0x7ac   : > { %v1647_v24 = vmul.f32 %v1639_v16, %v1583_v15  ;;  %v1634_v30 = vadd.f32 1.0, %v2869_v17 }
 0x7ad   : > { %v1648_v26 = vmul.f32 %v1640_v22, %v1584_v19 }
 0x7ae   : > { %v2871_v44 = vpop.eup %2870  ;;  %v1651_v47 = vpack.c.bf16 %v1647_v24, %v1643_v23  ;;  %v1642_v38 = vmul.f32 %v1634_v30, %v1578_v55  ;;  %v2818_v23 = vld [vmem:[%s3704_s18] ss:$0 sm:$0xff] }
 0x7af   : > { %v2873_v60 = vpop.eup %2872  ;;  %v1652_v33 = vpack.c.bf16 %v1648_v26, %v1644_v25  ;;  %v1637_v29 = vadd.f32 1.0, %v2871_v44  ;;  %v2819_v25 = vld [vmem:[%s3705_s12] ss:$0 sm:$0xff] }
 0x7b0   : > { %1949 = vmatmul.bf16.vlgmr.msra.gmra.mxu0 %v1651_v47  ;;  %v1638_v63 = vadd.f32 1.0, %v2873_v60 }
 0x7b1   : > { %1963 = vmatmul.bf16.vlgmr.msrb.gmra.mxu1 %v1652_v33  ;;  %v1645_v37 = vmul.f32 %v1637_v29, %v1581_v8 }
 0x7b2   : > { %v1646_v39 = vmul.f32 %v1638_v63, %v1582_v9 }
 0x7b3   : > { %v1649_v40 = vpack.c.bf16 %v1645_v37, %v1641_v35 }
 0x7b4   : > { %v1650_v41 = vpack.c.bf16 %v1646_v39, %v1642_v38 }
 0x7b5   : > { %1921 = vmatmul.bf16.vlgmr.msra.gmra.mxu2 %v1649_v40 }
 0x7b6   : > { %1935 = vmatmul.bf16.vlgmr.msrb.gmra.mxu3 %v1650_v41 }
 0x82d   : > { %v1950_v46 = vpop.f32.mrf.mxu0 }
 0x82e   : > { %v1964_v48 = vpop.f32.mrf.mxu1 }
 0x835   : > { %v1952_v57 = vpop.f32.mrf.mxu0 }
 0x836   : > { %v1966_v59 = vpop.f32.mrf.mxu1 }
 0x838   : > { %v1922_v42 = vpop.f32.mrf.mxu2 }
 0x839   : > { %v1923_v43 = vadd.f32 %v2817_v20, %v1922_v42  ;;  %v1936_v45 = vpop.f32.mrf.mxu3 }
 0x83b   : > { %v1937_v21 = vadd.f32 %v1936_v45, %v1923_v43 }
 0x83d   : > { %v1951_v49 = vadd.f32 %v1950_v46, %v1937_v21 }
 0x83f   : > { %v1965_v36 = vadd.f32 %v1964_v48, %v1951_v49 }
 0x840   : > { %v1924_v50 = vpop.f32.mrf.mxu2 }
 0x841   : > { %v1925_v51 = vadd.f32 %v2817_v20, %v1924_v50  ;;  %v1969_v52 = vadd.f32 %v1965_v36, %v3565_v31  ;;  %v1938_v53 = vpop.f32.mrf.mxu3 }
 0x843   : > { %v1939_v54 = vadd.f32 %v1938_v53, %v1925_v51  ;;  %1971 = vadd.xlane.f32.xlu2 %v1969_v52 }
 0x845   : > { %v1953_v58 = vadd.f32 %v1952_v57, %v1939_v54 }
 0x847   : > { %v1967_v62 = vadd.f32 %v1966_v59, %v1953_v58 }
 0x849   : > { %v1970_v56 = vadd.f32 %v1967_v62, %v3567_v32 }
 0x84b   : > { %1973 = vadd.xlane.f32.xlu2 %v1970_v56 }
 0x8b6   : > { %v1972_v0 = vpop.xlane.xlu2 %1971 }
 0x8b7   : > { %v1975_v1 = vmul.f32 %v1972_v0, %v3543_v27 }
 0x8b9   : > { %v1977_v2 = vsub.f32 %v1969_v52, %v1975_v1 }
 0x8bb   : > { %v1979_v61 = vmul.f32 %v1977_v2, %v1977_v2 }
 0x8bd   : > { %1981 = vadd.xlane.f32.xlu2 %v1979_v61 }
 0x8be   : > { %v1974_v3 = vpop.xlane.xlu2 %1973 }
 0x8bf   : > { %v1976_v4 = vmul.f32 %v1974_v3, %v3543_v27 }
 0x8c1   : > { %v1978_v31 = vsub.f32 %v1970_v56, %v1976_v4 }
 0x8c3   : > { %v1980_v5 = vmul.f32 %v1978_v31, %v1978_v31 }
 0x8c5   : > { %1983 = vadd.xlane.f32.xlu2 %v1980_v5 }
 0x930   : > { %v1982_v6 = vpop.xlane.xlu2 %1981 }
 0x931   : > { %v1985_v7 = vmul.f32 %v1982_v6, %v3543_v27 }
 0x933   : > { %v1987_v10 = vadd.f32 1e-05, %v1985_v7 }
 0x935   : > { %2874 = vrsqrt.f32 %v1987_v10  ;;  %vm1995_vm4 = vweird.f32 %v1987_v10 }
 0x938   : > { %v1984_v11 = vpop.xlane.xlu2 %1983 }
 0x939   : > { %v1986_v32 = vmul.f32 %v1984_v11, %v3543_v27 }
 0x93b   : > { %v2875_v12 = vpop.eup %2874  ;;  %v1988_v13 = vadd.f32 1e-05, %v1986_v32 }
 0x93c   : > { %v1990_v14 = vmul.f32 %v2875_v12, %v1987_v10  ;;  %vm1996_vm3 = vweird.f32 %v2875_v12 }
 0x93d   : > { %2876 = vrsqrt.f32 %v1988_v13  ;;  %vm1997_vm5 = vmor %vm1995_vm4, %vm1996_vm3  ;;  %vm2005_vm7 = vweird.f32 %v1988_v13 }
 0x93e   : > { %v1991_v15 = vmul.f32 %v2875_v12, %v1990_v14 }
 0x940   : > { %v1992_v16 = vmul.f32 0.5, %v1991_v15 }
 0x942   : > { %v1993_v17 = vsub.f32 1.5, %v1992_v16 }
 0x943   : > { %v2877_v18 = vpop.eup %2876 }
 0x944   : > { %v1994_v19 = vmul.f32 %v2875_v12, %v1993_v17  ;;  %v2000_v22 = vmul.f32 %v2877_v18, %v1988_v13  ;;  %vm2006_vm6 = vweird.f32 %v2877_v18 }
 0x945   : > { %vm2007_vm8 = vmor %vm2005_vm7, %vm2006_vm6 }
 0x946   : > { %v1998_v27 = vsel %vm1997_vm5, %v2875_v12, %v1994_v19  ;;  %v2001_v24 = vmul.f32 %v2877_v18, %v2000_v22 }
 0x947   : > { %v2009_v26 = vmul.f32 %v1998_v27, %v1977_v2 }
 0x948   : > { %v2002_v28 = vmul.f32 0.5, %v2001_v24 }
 0x949   : > { %v2015_v44 = vmul.f32 %v2818_v23, %v2009_v26 }
 0x94a   : > { %v2003_v47 = vsub.f32 1.5, %v2002_v28 }
 0x94b   : > { %v2021_v30 = vadd.f32 %v2819_v25, %v2015_v44 }
 0x94c   : > { %v2004_v60 = vmul.f32 %v2877_v18, %v2003_v47 }
 0x94d   : > { %2023 = vst [vmem:[%s602_s26] sm:$0xff] %v2021_v30 }
 0x94e   : > { %v2008_v33 = vsel %vm2007_vm8, %v2877_v18, %v2004_v60 }
 0x94f   : > { %v2010_v34 = vmul.f32 %v2008_v33, %v1978_v31 }
 0x951   : > { %v2016_v8 = vmul.f32 %v2818_v23, %v2010_v34 }
 0x953   : > { %v2022_v29 = vadd.f32 %v2819_v25, %v2016_v8 }
 0x955   : > { %2024 = vst [vmem:[%s602_s26 + $0x8] sm:$0xff] %v2022_v29 }
 0x956   : > { %3115 = shalt.err (!%p3112_p10)
}
 0x957   : > { %s3191_s8 = smov 128   ;;  %s3192_s18 = smov 8  }
 0x958   : > { %2720 = dma.vmem_to_hbm [thread:$0]  (%p3358_p0), %s2039_s4, 256, %s2041_s10, %s2026_s20, %s3191_s8, %s3191_s8, %s3192_s18  }
 0x959 PF: > { %s3707_s27 = sld [smem:[#allocation22_spill]]  ;;  %p3709_p11 = scmp.ge.s32.totalorder %s3170_s16, 2 }
 0x95b   : > { %p2746_p12 = pnand %p3709_p11, %p3366_p6 }
 0x95d   : > { %p2747_p2 = pneg %p2746_p12 }
 0x95f   : > { %s2055_s12 = sand.u32 1, %s3707_s27  }
 0x960   : > { %s2056_s13 = scalar_lea.sflag [#allocation5], %s2055_s12 }
 0x961   : > { %3153 = dma.done.wait (%p2747_p2), %s2056_s13, 256  }
 0x962   : > { %3155 = vsyncadd (%p2747_p2), %s2056_s13, 4294967040  ;;  %s3710_s16 = sld [smem:[#allocation24_spill]]  ;;  %s3713_s29 = smov %s3162_s30 }
 0x963   : > { %s3711_s23 = sld [smem:[#allocation23_spill]] }
 0x964   : > { %s3712_s15 = sld [smem:[#allocation25_spill]] }
 0x968   : > { %p32_p4 = scmp.ge.s32.totalorder %s3710_s16, 4  }
 0x969   : > { %s3714_s30 = smov %s3711_s23 }
 0x96a   :  { %34 = sbr.rel (!%p32_p4) target bundleno = 18 (0x12), region = 154 }
 0x96f   :  { %2062 = vsyncpa [#allocation4], 1 }
 0x970   :  { %2064 = vsyncpa [#allocation4 + $0x1], 1 }
 0x971   :  { %2065 = vsyncpa [#allocation7], 1 }
 0x972   :  { %2067 = vsyncpa [#allocation7 + $0x1], 1 }
 0x973   :  { %2068 = vsyncpa [#allocation10], 1 }
 0x974   :  { %2069 = vsyncpa [#allocation13], 1 }
 0x975   :  { %2070 = vsyncpa [#allocation5], 1 }
 0x976   :  { %2072 = vsyncpa [#allocation5 + $0x1], 1 }

</bundles_post_ra>
